<compile_context>
chip_gen: v5e
topology: v5e:2x2
jax: 0.10.0
libtpu: 0.0.40
codegen_flags: <defaults>
</compile_context>

<pallas_src>
import jax
import jax.numpy as jnp
from jax.experimental import pallas as pl
from jax.experimental.pallas import tpu as pltpu

OUT_LANE = 128  # lane-dense padded class dimension (>= num_classes)


def _sentiment_kernel(img_ref, txt_ref,
                      w_if_ref, b_fuse_ref,
                      w1_ref, b1_ref,
                      w2_ref, b2_ref,
                      out_ref):
    # --- fusion with folded CLIP projections (single K=d_img+d_txt MXU pass) -
    #   relu(concat(img@Wi, txt@Wt) @ Wf + b)
    # = relu(concat(img, txt) @ [[Wi@Wf_top]; [Wt@Wf_bot]] + b)
    x = jnp.concatenate([img_ref[...], txt_ref[...]], axis=-1)        # (TM, 2D) bf16
    fused = jnp.dot(x, w_if_ref[...],
                    preferred_element_type=jnp.float32)               # f32 acc
    fused = jnp.maximum(fused + b_fuse_ref[...], 0.0)                 # (TM, H) f32

    # --- classifier -----------------------------------------------------------
    h = jnp.dot(fused.astype(jnp.bfloat16), w1_ref[...],
                preferred_element_type=jnp.float32) + b1_ref[...]     # (TM, H/2)
    # exact GELU (PyTorch nn.GELU default: erf form), f32
    h = 0.5 * h * (1.0 + jax.lax.erf(h * jnp.float32(0.7071067811865476)))
    # Dropout(p=0.4) is identity at inference time.

    # one-pass LayerNorm statistics (var = E[x^2] - mean^2), affine folded into W2
    inv_n = jnp.float32(1.0 / h.shape[-1])
    s1 = jnp.sum(h, axis=-1, keepdims=True)
    s2 = jnp.sum(h * h, axis=-1, keepdims=True)
    mean = s1 * inv_n
    var = s2 * inv_n - mean * mean
    hn = (h - mean) * jax.lax.rsqrt(var + 1e-5)

    # lane-dense (TM, 128) output; real classes live in the first columns.
    out_ref[...] = jnp.dot(hn.astype(jnp.bfloat16), w2_ref[...],
                           preferred_element_type=jnp.float32) + b2_ref[...]


def multimodal_sentiment_forward(image_features, text_features, kparams,
                                 *, num_classes, tm=None):
    """Runs the fused Pallas kernel with a 1-D 'parallel' grid over batch tiles.

    Weights use constant index_maps (DMA'd once, VMEM-resident); activations
    (bf16) and the lane-padded f32 output are tiled (tm, D) per grid step."""
    B, d_img = image_features.shape
    _, d_txt = text_features.shape
    H = kparams["w_if"].shape[1]
    h2 = kparams["w1"].shape[1]
    assert num_classes <= OUT_LANE

    if tm is None:
        # Biggest tile up to 512 rows (per-step overhead amortization).
        tm = min(512, pl.cdiv(B, 128) * 128)

    # Pad batch to a multiple of the tile so every block is full.
    bp = pl.cdiv(B, tm) * tm
    if bp != B:
        pad = bp - B
        image_features = jnp.pad(image_features, ((0, pad), (0, 0)))
        text_features = jnp.pad(text_features, ((0, pad), (0, 0)))

    # bf16 MXU operands; f32 accumulation happens inside the kernel.
    img_bf = image_features.astype(jnp.bfloat16)
    txt_bf = text_features.astype(jnp.bfloat16)

    def act_spec(d):
        return pl.BlockSpec((tm, d), lambda i: (i, 0))

    def resident(arr):
        # Whole-array block, same block every grid step -> stays in VMEM.
        # TODO(synk): at real CLIP dims (feature_dim 512/768) add
        # pipeline_mode=pl.Buffered(1) here and an explicit vmem_limit_bytes
        # to avoid double-buffered resident weights on v7x's 64 MiB VMEM.
        return pl.BlockSpec(arr.shape, lambda i: (0, 0))

    in_specs = [
        act_spec(d_img), act_spec(d_txt),
        resident(kparams["w_if"]), resident(kparams["b_fuse"]),
        resident(kparams["w1"]), resident(kparams["b1"]),
        resident(kparams["w2p"]), resident(kparams["b2p"]),
    ]
    out_spec = pl.BlockSpec((tm, OUT_LANE), lambda i: (i, 0))

    # Advisory cost estimate (per whole call) for XLA's scheduler.
    flops = 2 * bp * ((d_img + d_txt) * H + H * h2 + h2 * OUT_LANE)
    transcendentals = bp * (h2 + 1)              # erf per hidden elem + rsqrt per row
    bytes_accessed = (bp * (d_img + d_txt) * 2   # bf16 activation streams in
                      + bp * OUT_LANE * 4        # f32 logits out
                      + ((d_img + d_txt) * H + H * h2 + h2 * OUT_LANE) * 2  # bf16 weights
                      + (H + h2 + OUT_LANE) * 4)                            # f32 biases
    cost = pl.CostEstimate(flops=flops, transcendentals=transcendentals,
                           bytes_accessed=bytes_accessed)

    out = pl.pallas_call(
        _sentiment_kernel,
        out_shape=jax.ShapeDtypeStruct((bp, OUT_LANE), jnp.float32),
        grid=(bp // tm,),
        in_specs=in_specs,
        out_specs=out_spec,
        compiler_params=pltpu.CompilerParams(
            dimension_semantics=("parallel",)),
        cost_estimate=cost,
    )(img_bf, txt_bf,
      kparams["w_if"], kparams["b_fuse"],
      kparams["w1"], kparams["b1"],
      kparams["w2p"], kparams["b2p"])

    return out[:B, :num_classes]


def make_params(key, d_img, d_txt, feature_dim, hidden_dim, num_classes):
    """Raw (unfolded) f32 parameters matching the PyTorch module structure."""
    ks = jax.random.split(key, 10)
    scale = 0.02
    h2 = hidden_dim // 2
    return {
        # CLIP projection stand-ins (no bias, like visual.proj / text.proj)
        "w_img": scale * jax.random.normal(ks[0], (d_img, feature_dim), jnp.float32),
        "w_txt": scale * jax.random.normal(ks[1], (d_txt, feature_dim), jnp.float32),
        # ConcatFusion: Linear(2F -> H) + ReLU
        "w_fuse": scale * jax.random.normal(ks[2], (2 * feature_dim, hidden_dim), jnp.float32),
        "b_fuse": 0.01 * jax.random.normal(ks[3], (1, hidden_dim), jnp.float32),
        # classifier
        "w1": scale * jax.random.normal(ks[4], (hidden_dim, h2), jnp.float32),
        "b1": 0.01 * jax.random.normal(ks[5], (1, h2), jnp.float32),
        "gamma": 1.0 + 0.1 * jax.random.normal(ks[6], (1, h2), jnp.float32),
        "beta": 0.05 * jax.random.normal(ks[7], (1, h2), jnp.float32),
        "w2": scale * jax.random.normal(ks[8], (h2, num_classes), jnp.float32),
        "b2": 0.01 * jax.random.normal(ks[9], (1, num_classes), jnp.float32),
    }


def fold_params(p):
    """Offline kernel prep (all folds done in f32, then MXU weights -> bf16):
      1) fold the bias-free CLIP projection heads into the fusion weight and
         stack the img/txt halves into one (d_img+d_txt, H) matrix,
      2) fold LayerNorm's gamma/beta into the final linear,
      3) lane-pad the final linear to OUT_LANE columns."""
    F = p["w_img"].shape[1]
    h2, nc = p["w2"].shape

    w_img_f = p["w_img"] @ p["w_fuse"][:F]       # (d_img, H)
    w_txt_f = p["w_txt"] @ p["w_fuse"][F:]       # (d_txt, H)
    w_if = jnp.concatenate([w_img_f, w_txt_f], axis=0)   # (d_img+d_txt, H)

    # (hn*gamma + beta) @ W2 + b2 == hn @ (gamma.T * W2) + (beta @ W2 + b2)
    w2_aff = p["w2"] * p["gamma"].reshape(h2, 1)          # (h2, nc)
    b2_aff = p["b2"] + p["beta"] @ p["w2"]                # (1, nc)
    w2p = jnp.zeros((h2, OUT_LANE), jnp.float32).at[:, :nc].set(w2_aff)
    b2p = jnp.zeros((1, OUT_LANE), jnp.float32).at[:, :nc].set(b2_aff)

    return {
        "w_if": w_if.astype(jnp.bfloat16),
        "b_fuse": p["b_fuse"],                   # f32
        "w1": p["w1"].astype(jnp.bfloat16),
        "b1": p["b1"],                           # f32
        "w2p": w2p.astype(jnp.bfloat16),
        "b2p": b2p,                              # f32
    }


def reference_forward(image_features, text_features, p):
    """Pure-JAX f32 reference (unfolded, unpadded) matching the PyTorch module."""
    img_feat = image_features @ p["w_img"]
    txt_feat = text_features @ p["w_txt"]
    fused = jnp.maximum(jnp.concatenate([img_feat, txt_feat], -1) @ p["w_fuse"]
                        + p["b_fuse"], 0.0)
    h = fused @ p["w1"] + p["b1"]
    h = 0.5 * h * (1.0 + jax.lax.erf(h / jnp.sqrt(2.0)))
    mean = jnp.mean(h, -1, keepdims=True)
    var = jnp.mean((h - mean) ** 2, -1, keepdims=True)
    hn = (h - mean) * jax.lax.rsqrt(var + 1e-5) * p["gamma"] + p["beta"]
    return hn @ p["w2"] + p["b2"]


def kernel_math_reference(image_features, text_features, kp):
    """Pure-JAX replica of the kernel's exact math path (folded bf16 weights,
    bf16 MXU operands, f32 accumulation). Used for a tight correctness check."""
    x = jnp.concatenate([image_features.astype(jnp.bfloat16),
                         text_features.astype(jnp.bfloat16)], axis=-1)
    fused = jnp.dot(x, kp["w_if"], preferred_element_type=jnp.float32) + kp["b_fuse"]
    fused = jnp.maximum(fused, 0.0)
    h = jnp.dot(fused.astype(jnp.bfloat16), kp["w1"],
                preferred_element_type=jnp.float32) + kp["b1"]
    h = 0.5 * h * (1.0 + jax.lax.erf(h * jnp.float32(0.7071067811865476)))
    mean = jnp.mean(h, -1, keepdims=True)
    var = jnp.mean((h - mean) ** 2, -1, keepdims=True)
    hn = (h - mean) * jax.lax.rsqrt(var + 1e-5)
    return jnp.dot(hn.astype(jnp.bfloat16), kp["w2p"],
                   preferred_element_type=jnp.float32) + kp["b2p"]


if __name__ == "__main__":
    # Small, TPU-friendly shapes consistent with the module's forward.
    B = 256            # batch
    D_IMG = 128        # raw image-feature input dim fed to the CLIP image head
    D_TXT = 128        # raw text-feature input dim fed to the CLIP text head
    FEATURE_DIM = 128  # stands in for CLIP's 512/768 feature_dim
    HIDDEN_DIM = 128   # config.hidden_dim
    NUM_CLASSES = 8    # config.num_classes
    TM = 256           # batch tile: whole demo batch in one grid step
                       # (production: TM=512-1024 and grid >= 2 per TensorCore)

    key = jax.random.PRNGKey(0)
    k_img, k_txt, k_params = jax.random.split(key, 3)

    image_features = jax.random.normal(k_img, (B, D_IMG), jnp.float32)
    text_features = jax.random.normal(k_txt, (B, D_TXT), jnp.float32)

    params = make_params(k_params, D_IMG, D_TXT, FEATURE_DIM, HIDDEN_DIM, NUM_CLASSES)
    kparams = fold_params(params)

    logits = multimodal_sentiment_forward(image_features, text_features, kparams,
                                          num_classes=NUM_CLASSES, tm=TM)
    logits = jax.block_until_ready(logits)
    assert logits.shape == (B, NUM_CLASSES)

    # Check 1 (tight): same math path in pure JAX (folded bf16 weights, f32
    # accumulation) — only MXU vs XLA accumulation order / approx details differ.
    ref_tight = kernel_math_reference(image_features, text_features,
                                      kparams)[:, :NUM_CLASSES]
    assert jnp.allclose(logits, ref_tight, atol=2e-3, rtol=2e-3), \
        "kernel vs folded-bf16 reference mismatch"

    # Check 2 (semantics): f32 PyTorch-equivalent reference. bf16 MXU operands
    # bound the error; LayerNorm amplifies sub-percent relative error to ~1e-3
    # absolute on logits of ~0.16 scale, so a bf16-appropriate tolerance is used.
    ref_f32 = reference_forward(image_features, text_features, params)
    assert jnp.allclose(logits, ref_f32, atol=5e-2, rtol=5e-2), \
        "kernel vs f32 PyTorch-semantics reference mismatch"

    print("KERNEL_OK")
</pallas_src>

<mosaic_0001>
module attributes {stable_mosaic.version = 11 : i64} {
  func.func @_sentiment_kernel(%arg0: i32, %arg1: memref<256x128xbf16, #tpu.memory_space<vmem>>, %arg2: memref<256x128xbf16, #tpu.memory_space<vmem>>, %arg3: memref<256x128xbf16, #tpu.memory_space<vmem>>, %arg4: memref<1x128xf32, #tpu.memory_space<vmem>>, %arg5: memref<128x64xbf16, #tpu.memory_space<vmem>>, %arg6: memref<1x64xf32, #tpu.memory_space<vmem>>, %arg7: memref<64x128xbf16, #tpu.memory_space<vmem>>, %arg8: memref<1x128xf32, #tpu.memory_space<vmem>>, %arg9: memref<256x128xf32, #tpu.memory_space<vmem>>) attributes {dimension_semantics = [#tpu.dimension_semantics<parallel>], iteration_bounds = array<i64: 1>, scalar_prefetch = 0 : i64, scratch_operands = 0 : i64, tpu.core_type = #tpu.core_type<tc>, window_params = [{transform_indices = @transform_0, window_bounds = array<i64: 256, 128>}, {transform_indices = @transform_1, window_bounds = array<i64: 256, 128>}, {pipeline_mode = #tpu.pipeline_mode<synchronous>, transform_indices = @transform_2, window_bounds = array<i64: 256, 128>}, {pipeline_mode = #tpu.pipeline_mode<synchronous>, transform_indices = @transform_3, window_bounds = array<i64: 1, 128>}, {pipeline_mode = #tpu.pipeline_mode<synchronous>, transform_indices = @transform_4, window_bounds = array<i64: 128, 64>}, {pipeline_mode = #tpu.pipeline_mode<synchronous>, transform_indices = @transform_5, window_bounds = array<i64: 1, 64>}, {pipeline_mode = #tpu.pipeline_mode<synchronous>, transform_indices = @transform_6, window_bounds = array<i64: 64, 128>}, {pipeline_mode = #tpu.pipeline_mode<synchronous>, transform_indices = @transform_7, window_bounds = array<i64: 1, 128>}, {transform_indices = @transform_8, window_bounds = array<i64: 256, 128>}]} {
    %c0 = arith.constant 0 : index
    %c0_0 = arith.constant 0 : index
    %0 = vector.load %arg1[%c0, %c0_0] : memref<256x128xbf16, #tpu.memory_space<vmem>>, vector<256x128xbf16>
    %c0_1 = arith.constant 0 : index
    %c0_2 = arith.constant 0 : index
    %1 = vector.load %arg2[%c0_1, %c0_2] : memref<256x128xbf16, #tpu.memory_space<vmem>>, vector<256x128xbf16>
    %2 = tpu.concatenate %0, %1 in 1 : vector<256x128xbf16>, vector<256x128xbf16> -> vector<256x256xbf16>
    %c0_3 = arith.constant 0 : index
    %c0_4 = arith.constant 0 : index
    %3 = vector.load %arg3[%c0_3, %c0_4] : memref<256x128xbf16, #tpu.memory_space<vmem>>, vector<256x128xbf16>
    %cst = arith.constant dense<0.000000e+00> : vector<256x128xf32>
    %4 = tpu.matmul %2, %3, %cst {dimension_numbers = #tpu.dot_dimension_numbers<[1], [0], [0], [1], [0, 0, 1, 1], [], []>} : vector<256x256xbf16>, vector<256x128xbf16>, vector<256x128xf32> -> vector<256x128xf32>
    %c0_5 = arith.constant 0 : index
    %c0_6 = arith.constant 0 : index
    %5 = vector.load %arg4[%c0_5, %c0_6] : memref<1x128xf32, #tpu.memory_space<vmem>>, vector<1x128xf32>
    %6 = vector.broadcast %5 : vector<1x128xf32> to vector<256x128xf32>
    %7 = arith.addf %4, %6 : vector<256x128xf32>
    %cst_7 = arith.constant 0.000000e+00 : f32
    %8 = vector.broadcast %cst_7 : f32 to vector<256x128xf32>
    %9 = arith.maximumf %7, %8 : vector<256x128xf32>
    %10 = arith.truncf %9 : vector<256x128xf32> to vector<256x128xbf16>
    %c0_8 = arith.constant 0 : index
    %c0_9 = arith.constant 0 : index
    %11 = vector.load %arg5[%c0_8, %c0_9] : memref<128x64xbf16, #tpu.memory_space<vmem>>, vector<128x64xbf16>
    %cst_10 = arith.constant dense<0.000000e+00> : vector<256x64xf32>
    %12 = tpu.matmul %10, %11, %cst_10 {dimension_numbers = #tpu.dot_dimension_numbers<[1], [0], [0], [1], [0, 0, 1, 1], [], []>} : vector<256x128xbf16>, vector<128x64xbf16>, vector<256x64xf32> -> vector<256x64xf32>
    %c0_11 = arith.constant 0 : index
    %c0_12 = arith.constant 0 : index
    %13 = vector.load %arg6[%c0_11, %c0_12] : memref<1x64xf32, #tpu.memory_space<vmem>>, vector<1x64xf32>
    %14 = vector.broadcast %13 : vector<1x64xf32> to vector<256x64xf32>
    %15 = arith.addf %12, %14 : vector<256x64xf32>
    %cst_13 = arith.constant 5.000000e-01 : f32
    %16 = vector.broadcast %cst_13 : f32 to vector<256x64xf32>
    %17 = arith.mulf %16, %15 : vector<256x64xf32>
    %cst_14 = arith.constant 0.707106769 : f32
    %18 = vector.broadcast %cst_14 : f32 to vector<256x64xf32>
    %19 = arith.mulf %15, %18 : vector<256x64xf32>
    %20 = math.erf %19 : vector<256x64xf32>
    %cst_15 = arith.constant 1.000000e+00 : f32
    %21 = vector.broadcast %cst_15 : f32 to vector<256x64xf32>
    %22 = arith.addf %21, %20 : vector<256x64xf32>
    %23 = arith.mulf %17, %22 : vector<256x64xf32>
    %cst_16 = arith.constant dense<0.000000e+00> : vector<256xf32>
    %24 = vector.multi_reduction <add>, %23, %cst_16 [1] : vector<256x64xf32> to vector<256xf32>
    %25 = vector.shape_cast %24 : vector<256xf32> to vector<256x1xf32>
    %26 = arith.mulf %23, %23 : vector<256x64xf32>
    %cst_17 = arith.constant dense<0.000000e+00> : vector<256xf32>
    %27 = vector.multi_reduction <add>, %26, %cst_17 [1] : vector<256x64xf32> to vector<256xf32>
    %28 = vector.shape_cast %27 : vector<256xf32> to vector<256x1xf32>
    %cst_18 = arith.constant 1.562500e-02 : f32
    %29 = vector.broadcast %cst_18 : f32 to vector<256x1xf32>
    %30 = arith.mulf %25, %29 : vector<256x1xf32>
    %cst_19 = arith.constant 1.562500e-02 : f32
    %31 = vector.broadcast %cst_19 : f32 to vector<256x1xf32>
    %32 = arith.mulf %28, %31 : vector<256x1xf32>
    %33 = arith.mulf %30, %30 : vector<256x1xf32>
    %34 = arith.subf %32, %33 : vector<256x1xf32>
    %35 = vector.broadcast %30 : vector<256x1xf32> to vector<256x64xf32>
    %36 = arith.subf %23, %35 : vector<256x64xf32>
    %cst_20 = arith.constant 9.99999974E-6 : f32
    %37 = vector.broadcast %cst_20 : f32 to vector<256x1xf32>
    %38 = arith.addf %34, %37 : vector<256x1xf32>
    %39 = math.rsqrt %38 : vector<256x1xf32>
    %40 = vector.broadcast %39 : vector<256x1xf32> to vector<256x64xf32>
    %41 = arith.mulf %36, %40 : vector<256x64xf32>
    %42 = arith.truncf %41 : vector<256x64xf32> to vector<256x64xbf16>
    %c0_21 = arith.constant 0 : index
    %c0_22 = arith.constant 0 : index
    %43 = vector.load %arg7[%c0_21, %c0_22] : memref<64x128xbf16, #tpu.memory_space<vmem>>, vector<64x128xbf16>
    %cst_23 = arith.constant dense<0.000000e+00> : vector<256x128xf32>
    %44 = tpu.matmul %42, %43, %cst_23 {dimension_numbers = #tpu.dot_dimension_numbers<[1], [0], [0], [1], [0, 0, 1, 1], [], []>} : vector<256x64xbf16>, vector<64x128xbf16>, vector<256x128xf32> -> vector<256x128xf32>
    %c0_24 = arith.constant 0 : index
    %c0_25 = arith.constant 0 : index
    %45 = vector.load %arg8[%c0_24, %c0_25] : memref<1x128xf32, #tpu.memory_space<vmem>>, vector<1x128xf32>
    %46 = vector.broadcast %45 : vector<1x128xf32> to vector<256x128xf32>
    %47 = arith.addf %44, %46 : vector<256x128xf32>
    %c0_26 = arith.constant 0 : index
    %c0_27 = arith.constant 0 : index
    %48 = vector.load %arg9[%c0_26, %c0_27] : memref<256x128xf32, #tpu.memory_space<vmem>>, vector<256x128xf32>
    tpu.vector_store %arg9[%c0_26, %c0_27], %47 {strides = array<i32>} : memref<256x128xf32, #tpu.memory_space<vmem>>, vector<256x128xf32>,
    return
  }
  func.func @transform_0(%arg0: i32) -> (i32, i32) {
    %c0_i32 = arith.constant 0 : i32
    %c0_i32_0 = arith.constant 0 : i32
    return %arg0, %c0_i32 : i32, i32
  }
  func.func @transform_1(%arg0: i32) -> (i32, i32) {
    %c0_i32 = arith.constant 0 : i32
    %c0_i32_0 = arith.constant 0 : i32
    return %arg0, %c0_i32 : i32, i32
  }
  func.func @transform_2(%arg0: i32) -> (i32, i32) {
    %c0_i32 = arith.constant 0 : i32
    %c0_i32_0 = arith.constant 0 : i32
    %c0_i32_1 = arith.constant 0 : i32
    return %c0_i32, %c0_i32_0 : i32, i32
  }
  func.func @transform_3(%arg0: i32) -> (i32, i32) {
    %c0_i32 = arith.constant 0 : i32
    %c0_i32_0 = arith.constant 0 : i32
    %c0_i32_1 = arith.constant 0 : i32
    return %c0_i32, %c0_i32_0 : i32, i32
  }
  func.func @transform_4(%arg0: i32) -> (i32, i32) {
    %c0_i32 = arith.constant 0 : i32
    %c0_i32_0 = arith.constant 0 : i32
    %c0_i32_1 = arith.constant 0 : i32
    return %c0_i32, %c0_i32_0 : i32, i32
  }
  func.func @transform_5(%arg0: i32) -> (i32, i32) {
    %c0_i32 = arith.constant 0 : i32
    %c0_i32_0 = arith.constant 0 : i32
    %c0_i32_1 = arith.constant 0 : i32
    return %c0_i32, %c0_i32_0 : i32, i32
  }
  func.func @transform_6(%arg0: i32) -> (i32, i32) {
    %c0_i32 = arith.constant 0 : i32
    %c0_i32_0 = arith.constant 0 : i32
    %c0_i32_1 = arith.constant 0 : i32
    return %c0_i32, %c0_i32_0 : i32, i32
  }
  func.func @transform_7(%arg0: i32) -> (i32, i32) {
    %c0_i32 = arith.constant 0 : i32
    %c0_i32_0 = arith.constant 0 : i32
    %c0_i32_1 = arith.constant 0 : i32
    return %c0_i32, %c0_i32_0 : i32, i32
  }
  func.func @transform_8(%arg0: i32) -> (i32, i32) {
    %c0_i32 = arith.constant 0 : i32
    %c0_i32_0 = arith.constant 0 : i32
    return %arg0, %c0_i32 : i32, i32
  }
}

</mosaic_0001>

<bundles_post_ra>
// kernel: tpu_custom_call.1
= control target key start
LH: loop header
LB: loop body
LE: loop exit
PB: predicated region body
PF: predicated region fallthrough
CT: control target
= control target key end

     0   :  { %13 = vsyncpa [#allocation3], 0  ;;  %s6616_s0 = inlined_call_operand.hbm [shape: bf16[256,128], index: 0, kind: input, shape index: {}]   ;;  %s6617_s1 = inlined_call_operand.hbm [shape: bf16[256,128], index: 1, kind: input, shape index: {}]   ;;  %s6618_s2 = inlined_call_operand.hbm [shape: bf16[256,128], index: 2, kind: input, shape index: {}]   ;;  %s6619_s3 = inlined_call_operand.vmem [shape: f32[1,128], index: 3, kind: input, shape index: {}]   ;;  %s6620_s4 = inlined_call_operand.vmem [shape: bf16[128,64], index: 4, kind: input, shape index: {}]   ;;  %s6621_s5 = inlined_call_operand.vmem [shape: f32[1,64], index: 5, kind: input, shape index: {}]   ;;  %s6622_s6 = inlined_call_operand.vmem [shape: bf16[64,128], index: 6, kind: input, shape index: {}]   ;;  %s6623_s7 = inlined_call_operand.vmem [shape: f32[1,128], index: 7, kind: input, shape index: {}]   ;;  %s6624_s8 = inlined_call_operand.hbm [shape: f32[256,128], index: 8, kind: output, shape index: {}]  }
   0x1   :  { %14 = vsyncpa [#allocation6], 0 }
   0x2   :  { %15 = vsyncpa [#allocation4], 0  ;;  %s33_s29 = sshll.u32 %s6617_s1, 4  ;;  %s3860_s30 = smov [#allocation5]   ;;  %s34_s29 = int_to_ptr.hbm [resolvable:$true] %s33_s29 }
   0x3   :  { %s35_s9 = sshll.u32 %s3860_s30, 4  ;;  %s20_s12 = sshll.u32 %s6616_s0, 4  ;;  %s36_s9 = int_to_ptr.vmem [resolvable:$true] %s35_s9  ;;  %s21_s12 = int_to_ptr.hbm [resolvable:$true] %s20_s12 }
   0x4   :  { %s3861_s13 = smov 64   ;;  %s3862_s14 = smov 4  }
   0x5   :  { %41 = dma.hbm_to_vmem [thread:$0]  %s34_s29, 2048, %s36_s9, [#allocation6], %s3861_s13, %s3861_s13, %s3862_s14  }
   0x6   :  { %s3863_s15 = smov [#allocation2]   ;;  %s46_s19 = sshll.u32 %s6618_s2, 4  ;;  %s47_s19 = int_to_ptr.hbm [resolvable:$true] %s46_s19 }
   0x7   :  { %s22_s16 = sshll.u32 %s3863_s15, 4  ;;  %s3864_s1 = smov [#allocation7]   ;;  %s23_s16 = int_to_ptr.vmem [resolvable:$true] %s22_s16 }
   0x8   :  { %28 = dma.hbm_to_vmem [thread:$0]  %s21_s12, 2048, %s23_s16, [#allocation3], %s3861_s13, %s3861_s13, %s3862_s14  }
   0x9   :  { %s48_s20 = sshll.u32 %s3864_s1, 4  ;;  %s49_s20 = int_to_ptr.vmem [resolvable:$true] %s48_s20 }
   0xa   :  { %54 = dma.hbm_to_vmem [thread:$0]  %s47_s19, 2048, %s49_s20, [#allocation6], %s3861_s13, %s3861_s13, %s3862_s14  }
   0xb   :  { %3854 = dma.done.wait [#allocation3], 2048  }
   0xc   :  { %3855 = vsyncadd [#allocation3], 4294965248 }
   0xd   :  { %3856 = dma.done.wait [#allocation6], 4096  }
   0xe   :  { %3857 = vsyncadd [#allocation6], 4294963200  ;;  %v3594_v0 = vld [vmem:[#allocation7 + $0x38] sm:$0xff]  ;;  %v3593_v2 = vld [vmem:[#allocation7 + $0x30] sm:$0xff]  ;;  %vm2257_vm13 = vcmask 523264   ;;  %s3253_s9 = sshll.u32 %s6624_s8, 4  ;;  %s3254_s9 = int_to_ptr.hbm [resolvable:$true] %s3253_s9 }
   0xf   :  { %v3602_v1 = vld [vmem:[#allocation7 + $0x78] sm:$0xff]  ;;  %466 = vmatpush.bf16.msra.mxu0 %v3594_v0  ;;  %v3601_v3 = vld [vmem:[#allocation7 + $0x70] sm:$0xff]  ;;  %v3592_v4 = vld [vmem:[#allocation7 + $0x28] sm:$0xff]  ;;  %s3866_s10 = smov 128   ;;  %s3867_s11 = smov 8  }
  0x10   :  { %555 = vmatpush.bf16.msra.mxu1 %v3602_v1  ;;  %v3600_v5 = vld [vmem:[#allocation7 + $0x68] sm:$0xff]  ;;  %v3591_v6 = vld [vmem:[#allocation7 + $0x20] sm:$0xff]  ;;  %v3590_v8 = vld [vmem:[#allocation7 + $0x18] sm:$0xff] }
  0x11   :  { %v3599_v7 = vld [vmem:[#allocation7 + $0x60] sm:$0xff]  ;;  %v3598_v9 = vld [vmem:[#allocation7 + $0x58] sm:$0xff]  ;;  %v3589_v10 = vld [vmem:[#allocation7 + $0x10] sm:$0xff] }
  0x12   :  { %v3597_v11 = vld [vmem:[#allocation7 + $0x50] sm:$0xff]  ;;  %v3588_v12 = vld [vmem:[#allocation7 + $0x8] sm:$0xff]  ;;  %v3587_v14 = vld [vmem:[#allocation7] sm:$0xff] }
  0x13   :  { %467 = vmatpush.bf16.msra.mxu0 %v3593_v2  ;;  %v3596_v13 = vld [vmem:[#allocation7 + $0x48] sm:$0xff]  ;;  %v3595_v15 = vld [vmem:[#allocation7 + $0x40] sm:$0xff]  ;;  %v3557_v20 = vld [vmem:[#allocation2 + $0x10] sm:$0xff] }
  0x14   :  { %556 = vmatpush.bf16.msra.mxu1 %v3601_v3  ;;  %v3555_v16 = vld [vmem:[#allocation2] sm:$0xff]  ;;  %v3556_v18 = vld [vmem:[#allocation2 + $0x8] sm:$0xff]  ;;  %v3573_v21 = vld [vmem:[#allocation5 + $0x10] sm:$0xff] }
  0x15   :  { %v3571_v17 = vld [vmem:[#allocation5] sm:$0xff]  ;;  %v3572_v19 = vld [vmem:[#allocation5 + $0x8] sm:$0xff]  ;;  %v3558_v22 = vld [vmem:[#allocation2 + $0x18] sm:$0xff] }
  0x16   :  { %v3574_v23 = vld [vmem:[#allocation5 + $0x18] sm:$0xff]  ;;  %v3559_v24 = vld [vmem:[#allocation2 + $0x20] sm:$0xff]  ;;  %v3560_v27 = vld [vmem:[#allocation2 + $0x28] sm:$0xff] }
  0x17   :  { %468 = vmatpush.bf16.msra.mxu0 %v3592_v4  ;;  %v3575_v25 = vld [vmem:[#allocation5 + $0x20] sm:$0xff]  ;;  %v3610_v26 = vld [vmem:[%s6620_s4 + $0x38] sm:$0xff]  ;;  %v3576_v28 = vld [vmem:[#allocation5 + $0x28] sm:$0xff] }
  0x18   :  { %557 = vmatpush.bf16.msra.mxu1 %v3600_v5  ;;  %760 = vmatpush.bf16.msra.mxu2 %v3610_v26  ;;  %v3609_v29 = vld [vmem:[%s6620_s4 + $0x30] sm:$0xff]  ;;  %v3608_v30 = vld [vmem:[%s6620_s4 + $0x28] sm:$0xff]  ;;  %v3607_v31 = vld [vmem:[%s6620_s4 + $0x20] sm:$0xff] }
  0x19   :  { %v3561_v32 = vld [vmem:[#allocation2 + $0x30] sm:$0xff]  ;;  %v3606_v34 = vld [vmem:[%s6620_s4 + $0x18] sm:$0xff]  ;;  %v3604_v36 = vld [vmem:[%s6620_s4 + $0x8] sm:$0xff] }
  0x1a   :  { %v3577_v33 = vld [vmem:[#allocation5 + $0x30] sm:$0xff]  ;;  %v3603_v37 = vld [vmem:[%s6620_s4] sm:$0xff]  ;;  %v3562_v38 = vld [vmem:[#allocation2 + $0x38] sm:$0xff] }
  0x1b   :  { %469 = vmatpush.bf16.msra.mxu0 %v3591_v6  ;;  %v3605_v35 = vld [vmem:[%s6620_s4 + $0x10] sm:$0xff]  ;;  %v3578_v39 = vld [vmem:[#allocation5 + $0x38] sm:$0xff]  ;;  %v3563_v40 = vld [vmem:[#allocation2 + $0x40] sm:$0xff] }
  0x1c   :  { %558 = vmatpush.bf16.msra.mxu1 %v3599_v7  ;;  %761 = vmatpush.bf16.msra.mxu2 %v3609_v29  ;;  %v3579_v41 = vld [vmem:[#allocation5 + $0x40] sm:$0xff]  ;;  %v3564_v54 = vld [vmem:[#allocation2 + $0x48] sm:$0xff]  ;;  %v3565_v3 = vld [vmem:[#allocation2 + $0x50] sm:$0xff] }
  0x1d   :  { %v3949_v44 = vld [vmem:[%s6619_s3] ss:$0 sm:$0xff]  ;;  %v3580_v55 = vld [vmem:[#allocation5 + $0x48] sm:$0xff]  ;;  %v3581_v4 = vld [vmem:[#allocation5 + $0x50] sm:$0xff] }
  0x1e   :  { %v3567_v29 = vld [vmem:[#allocation2 + $0x60] sm:$0xff] }
  0x1f   :  { %470 = vmatpush.bf16.msra.mxu0 %v3590_v8 }
  0x20   :  { %559 = vmatpush.bf16.msra.mxu1 %v3598_v9  ;;  %762 = vmatpush.bf16.msra.mxu2 %v3608_v30  ;;  %v3583_v30 = vld [vmem:[#allocation5 + $0x60] sm:$0xff] }
  0x23   :  { %471 = vmatpush.bf16.msra.mxu0 %v3589_v10 }
  0x24   :  { %560 = vmatpush.bf16.msra.mxu1 %v3597_v11  ;;  %763 = vmatpush.bf16.msra.mxu2 %v3607_v31 }
  0x27   :  { %472 = vmatpush.bf16.msra.mxu0 %v3588_v12 }
  0x28   :  { %561 = vmatpush.bf16.msra.mxu1 %v3596_v13  ;;  %764 = vmatpush.bf16.msra.mxu2 %v3606_v34 }
  0x2b   :  { %473 = vmatpush.bf16.msra.mxu0 %v3587_v14 }
  0x2c   :  { %562 = vmatpush.bf16.msra.mxu1 %v3595_v15  ;;  %765 = vmatpush.bf16.msra.mxu2 %v3605_v35 }
  0x2e   :  { %474 = vmatmul.bf16.vlgmr.msra.gmra.mxu0 %v3555_v16  ;;  %v3566_v16 = vld [vmem:[#allocation2 + $0x58] sm:$0xff] }
  0x2f   :  { %563 = vmatmul.bf16.vlgmr.msra.gmra.mxu1 %v3571_v17  ;;  %v3582_v17 = vld [vmem:[#allocation5 + $0x58] sm:$0xff] }
  0x30   :  { %766 = vmatpush.bf16.msra.mxu2 %v3604_v36 }
  0x34   :  { %767 = vmatpush.bf16.msra.mxu2 %v3603_v37 }
  0x3e   :  { %479 = vmatmul.bf16.gmra.mxu0 %v3556_v18 }
  0x3f   :  { %568 = vmatmul.bf16.gmra.mxu1 %v3572_v19 }
  0x4e   :  { %484 = vmatmul.bf16.gmra.mxu0 %v3557_v20 }
  0x4f   :  { %573 = vmatmul.bf16.gmra.mxu1 %v3573_v21 }
  0x5e   :  { %489 = vmatmul.bf16.gmra.mxu0 %v3558_v22 }
  0x5f   :  { %578 = vmatmul.bf16.gmra.mxu1 %v3574_v23 }
  0x6e   :  { %494 = vmatmul.bf16.gmra.mxu0 %v3559_v24 }
  0x6f   :  { %583 = vmatmul.bf16.gmra.mxu1 %v3575_v25 }
  0x7e   :  { %499 = vmatmul.bf16.gmra.mxu0 %v3560_v27 }
  0x7f   :  { %588 = vmatmul.bf16.gmra.mxu1 %v3576_v28 }
  0x8e   :  { %504 = vmatmul.bf16.gmra.mxu0 %v3561_v32 }
  0x8f   :  { %593 = vmatmul.bf16.gmra.mxu1 %v3577_v33 }
  0x9e   :  { %509 = vmatmul.bf16.gmra.mxu0 %v3562_v38 }
  0x9f   :  { %598 = vmatmul.bf16.gmra.mxu1 %v3578_v39 }
  0xab   :  { %v475_v42 = vpop.f32.mrf.mxu0 }
  0xac   :  { %v564_v43 = vpop.f32.mrf.mxu1  ;;  %v476_v45 = vadd.f32 %v3949_v44, %v475_v42  ;;  %v3568_v42 = vld [vmem:[#allocation2 + $0x68] sm:$0xff] }
  0xae   :  { %514 = vmatmul.bf16.gmra.mxu0 %v3563_v40  ;;  %v565_v48 = vadd.f32 %v564_v43, %v476_v45  ;;  %v3584_v43 = vld [vmem:[#allocation5 + $0x68] sm:$0xff] }
  0xaf   :  { %603 = vmatmul.bf16.gmra.mxu1 %v3579_v41 }
  0xb0   :  { %v644_v51 = vmax.f32 %v565_v48, 0.0 }
  0xb3   :  { %v477_v46 = vpop.f32.mrf.mxu0 }
  0xb4   :  { %v566_v47 = vpop.f32.mrf.mxu1  ;;  %v478_v49 = vadd.f32 %v3949_v44, %v477_v46 }
  0xb6   :  { %v567_v50 = vadd.f32 %v566_v47, %v478_v49 }
  0xb8   :  { %v645_v52 = vmax.f32 %v567_v50, 0.0 }
  0xba   :  { %v676_v53 = vpack.c.bf16 %v645_v52, %v644_v51 }
  0xbb   :  { %v480_v56 = vpop.f32.mrf.mxu0 }
  0xbc   :  { %v569_v57 = vpop.f32.mrf.mxu1  ;;  %768 = vmatmul.bf16.vlgmr.msra.gmra.mxu2 %v676_v53  ;;  %v481_v58 = vadd.f32 %v3949_v44, %v480_v56  ;;  %v3569_v56 = vld [vmem:[#allocation2 + $0x70] sm:$0xff] }
  0xbe   :  { %519 = vmatmul.bf16.gmra.mxu0 %v3564_v54  ;;  %v570_v61 = vadd.f32 %v569_v57, %v481_v58  ;;  %v3585_v57 = vld [vmem:[#allocation5 + $0x70] sm:$0xff] }
  0xbf   :  { %608 = vmatmul.bf16.gmra.mxu1 %v3580_v55 }
  0xc0   :  { %v646_v0 = vmax.f32 %v570_v61, 0.0 }
  0xc3   :  { %v482_v59 = vpop.f32.mrf.mxu0 }
  0xc4   :  { %v571_v60 = vpop.f32.mrf.mxu1  ;;  %v483_v62 = vadd.f32 %v3949_v44, %v482_v59 }
  0xc6   :  { %v572_v63 = vadd.f32 %v571_v60, %v483_v62 }
  0xc8   :  { %v647_v1 = vmax.f32 %v572_v63, 0.0 }
  0xca   :  { %v677_v2 = vpack.c.bf16 %v647_v1, %v646_v0 }
  0xcb   :  { %v485_v5 = vpop.f32.mrf.mxu0 }
  0xcc   :  { %v574_v6 = vpop.f32.mrf.mxu1  ;;  %773 = vmatmul.bf16.gmra.mxu2 %v677_v2  ;;  %v486_v7 = vadd.f32 %v3949_v44, %v485_v5  ;;  %v3570_v5 = vld [vmem:[#allocation2 + $0x78] sm:$0xff] }
  0xce   :  { %524 = vmatmul.bf16.gmra.mxu0 %v3565_v3  ;;  %v575_v10 = vadd.f32 %v574_v6, %v486_v7  ;;  %v3586_v6 = vld [vmem:[#allocation5 + $0x78] sm:$0xff] }
  0xcf   :  { %613 = vmatmul.bf16.gmra.mxu1 %v3581_v4 }
  0xd0   :  { %v648_v13 = vmax.f32 %v575_v10, 0.0 }
  0xd3   :  { %v487_v8 = vpop.f32.mrf.mxu0 }
  0xd4   :  { %v576_v9 = vpop.f32.mrf.mxu1  ;;  %v488_v11 = vadd.f32 %v3949_v44, %v487_v8 }
  0xd6   :  { %v577_v12 = vadd.f32 %v576_v9, %v488_v11 }
  0xd8   :  { %v649_v14 = vmax.f32 %v577_v12, 0.0 }
  0xda   :  { %v678_v15 = vpack.c.bf16 %v649_v14, %v648_v13 }
  0xdb   :  { %v490_v18 = vpop.f32.mrf.mxu0 }
  0xdc   :  { %v579_v19 = vpop.f32.mrf.mxu1  ;;  %778 = vmatmul.bf16.gmra.mxu2 %v678_v15  ;;  %v491_v20 = vadd.f32 %v3949_v44, %v490_v18 }
  0xde   :  { %529 = vmatmul.bf16.gmra.mxu0 %v3566_v16  ;;  %v580_v23 = vadd.f32 %v579_v19, %v491_v20 }
  0xdf   :  { %618 = vmatmul.bf16.gmra.mxu1 %v3582_v17 }
  0xe0   :  { %v650_v26 = vmax.f32 %v580_v23, 0.0 }
  0xe3   :  { %v492_v21 = vpop.f32.mrf.mxu0 }
  0xe4   :  { %v581_v22 = vpop.f32.mrf.mxu1  ;;  %v493_v24 = vadd.f32 %v3949_v44, %v492_v21 }
  0xe6   :  { %v582_v25 = vadd.f32 %v581_v22, %v493_v24 }
  0xe8   :  { %v651_v27 = vmax.f32 %v582_v25, 0.0 }
  0xea   :  { %v679_v28 = vpack.c.bf16 %v651_v27, %v650_v26 }
  0xeb   :  { %v495_v31 = vpop.f32.mrf.mxu0 }
  0xec   :  { %v584_v32 = vpop.f32.mrf.mxu1  ;;  %783 = vmatmul.bf16.gmra.mxu2 %v679_v28  ;;  %v496_v33 = vadd.f32 %v3949_v44, %v495_v31  ;;  %v3972_v31 = vld [vmem:[%s6621_s5] ss:$0 sm:$0xff] }
  0xee   :  { %534 = vmatmul.bf16.gmra.mxu0 %v3567_v29  ;;  %v585_v36 = vadd.f32 %v584_v32, %v496_v33 }
  0xef   :  { %623 = vmatmul.bf16.gmra.mxu1 %v3583_v30 }
  0xf0   :  { %v652_v39 = vmax.f32 %v585_v36, 0.0 }
  0xf3   :  { %v497_v34 = vpop.f32.mrf.mxu0 }
  0xf4   :  { %v586_v35 = vpop.f32.mrf.mxu1  ;;  %v498_v37 = vadd.f32 %v3949_v44, %v497_v34 }
  0xf6   :  { %v587_v38 = vadd.f32 %v586_v35, %v498_v37 }
  0xf8   :  { %v653_v40 = vmax.f32 %v587_v38, 0.0 }
  0xfa   :  { %v680_v41 = vpack.c.bf16 %v653_v40, %v652_v39 }
  0xfb   :  { %v500_v45 = vpop.f32.mrf.mxu0 }
  0xfc   :  { %v589_v46 = vpop.f32.mrf.mxu1  ;;  %788 = vmatmul.bf16.gmra.mxu2 %v680_v41  ;;  %v501_v47 = vadd.f32 %v3949_v44, %v500_v45 }
  0xfe   :  { %539 = vmatmul.bf16.gmra.mxu0 %v3568_v42  ;;  %v590_v50 = vadd.f32 %v589_v46, %v501_v47 }
  0xff   :  { %628 = vmatmul.bf16.gmra.mxu1 %v3584_v43 }
 0x100   :  { %v654_v53 = vmax.f32 %v590_v50, 0.0 }
 0x103   :  { %v502_v48 = vpop.f32.mrf.mxu0 }
 0x104   :  { %v591_v49 = vpop.f32.mrf.mxu1  ;;  %v503_v51 = vadd.f32 %v3949_v44, %v502_v48 }
 0x106   :  { %v592_v52 = vadd.f32 %v591_v49, %v503_v51 }
 0x108   :  { %v655_v54 = vmax.f32 %v592_v52, 0.0 }
 0x10a   :  { %v681_v55 = vpack.c.bf16 %v655_v54, %v654_v53 }
 0x10b   :  { %v505_v58 = vpop.f32.mrf.mxu0 }
 0x10c   :  { %v594_v59 = vpop.f32.mrf.mxu1  ;;  %793 = vmatmul.bf16.gmra.mxu2 %v681_v55  ;;  %v506_v60 = vadd.f32 %v3949_v44, %v505_v58 }
 0x10e   :  { %544 = vmatmul.bf16.gmra.mxu0 %v3569_v56  ;;  %v595_v63 = vadd.f32 %v594_v59, %v506_v60 }
 0x10f   :  { %633 = vmatmul.bf16.gmra.mxu1 %v3585_v57 }
 0x110   :  { %v656_v2 = vmax.f32 %v595_v63, 0.0 }
 0x113   :  { %v507_v61 = vpop.f32.mrf.mxu0 }
 0x114   :  { %v596_v62 = vpop.f32.mrf.mxu1  ;;  %v508_v0 = vadd.f32 %v3949_v44, %v507_v61 }
 0x116   :  { %v597_v1 = vadd.f32 %v596_v62, %v508_v0 }
 0x118   :  { %v657_v3 = vmax.f32 %v597_v1, 0.0 }
 0x11a   :  { %v682_v4 = vpack.c.bf16 %v657_v3, %v656_v2 }
 0x11b   :  { %v510_v7 = vpop.f32.mrf.mxu0 }
 0x11c   :  { %v599_v8 = vpop.f32.mrf.mxu1  ;;  %798 = vmatmul.bf16.gmra.mxu2 %v682_v4  ;;  %v511_v9 = vadd.f32 %v3949_v44, %v510_v7 }
 0x11e   :  { %549 = vmatmul.bf16.gmra.mxu0 %v3570_v5  ;;  %v600_v12 = vadd.f32 %v599_v8, %v511_v9 }
 0x11f   :  { %638 = vmatmul.bf16.gmra.mxu1 %v3586_v6 }
 0x120   :  { %v658_v15 = vmax.f32 %v600_v12, 0.0 }
 0x123   :  { %v512_v10 = vpop.f32.mrf.mxu0 }
 0x124   :  { %v601_v11 = vpop.f32.mrf.mxu1  ;;  %v513_v13 = vadd.f32 %v3949_v44, %v512_v10 }
 0x126   :  { %v602_v14 = vadd.f32 %v601_v11, %v513_v13 }
 0x128   :  { %v659_v16 = vmax.f32 %v602_v14, 0.0 }
 0x12a   :  { %v683_v17 = vpack.c.bf16 %v659_v16, %v658_v15 }
 0x12b   :  { %v515_v18 = vpop.f32.mrf.mxu0 }
 0x12c   :  { %v604_v19 = vpop.f32.mrf.mxu1  ;;  %803 = vmatmul.bf16.gmra.mxu2 %v683_v17  ;;  %v516_v20 = vadd.f32 %v3949_v44, %v515_v18 }
 0x12e   :  { %v605_v23 = vadd.f32 %v604_v19, %v516_v20 }
 0x130   :  { %v660_v26 = vmax.f32 %v605_v23, 0.0 }
 0x133   :  { %v517_v21 = vpop.f32.mrf.mxu0 }
 0x134   :  { %v606_v22 = vpop.f32.mrf.mxu1  ;;  %v518_v24 = vadd.f32 %v3949_v44, %v517_v21 }
 0x136   :  { %v607_v25 = vadd.f32 %v606_v22, %v518_v24 }
 0x138   :  { %v661_v27 = vmax.f32 %v607_v25, 0.0 }
 0x13a   :  { %v684_v28 = vpack.c.bf16 %v661_v27, %v660_v26 }
 0x13b   :  { %v520_v29 = vpop.f32.mrf.mxu0 }
 0x13c   :  { %v609_v30 = vpop.f32.mrf.mxu1  ;;  %808 = vmatmul.bf16.gmra.mxu2 %v684_v28  ;;  %v521_v32 = vadd.f32 %v3949_v44, %v520_v29 }
 0x13e   :  { %v610_v36 = vadd.f32 %v609_v30, %v521_v32 }
 0x13f   :  { %v769_v33 = vpop.f32.mrf.mxu2 }
 0x140   :  { %v3976_v34 = vadd.f32 %v3972_v31, %v769_v33  ;;  %v662_v43 = vmax.f32 %v610_v36, 0.0 }
 0x142   :  { %v3979_v35 = vmul.f32 0.70710677, %v3976_v34 }
 0x143   :  { %v522_v37 = vpop.f32.mrf.mxu0 }
 0x144   :  { %v611_v38 = vpop.f32.mrf.mxu1  ;;  %v913_v39 = vmul.f32 %v3979_v35, %v3979_v35  ;;  %v523_v40 = vadd.f32 %v3949_v44, %v522_v37 }
 0x146   :  { %v3984_v41 = vmin.f32 %v913_v39, 16.0  ;;  %v612_v42 = vadd.f32 %v611_v38, %v523_v40 }
 0x147   :  { %v771_v45 = vpop.f32.mrf.mxu2 }
 0x148   :  { %v915_v46 = vmul.f32 2.1237322e-06, %v3984_v41  ;;  %v926_v47 = vmul.f32 3.8918573e-05, %v3984_v41  ;;  %v663_v48 = vmax.f32 %v612_v42, 0.0  ;;  %v3989_v49 = vadd.f32 %v3972_v31, %v771_v45 }
 0x14a   :  { %v916_v50 = vadd.f32 0.00028619796, %v915_v46  ;;  %v927_v51 = vadd.f32 0.001143296, %v926_v47  ;;  %v685_v52 = vpack.c.bf16 %v663_v48, %v662_v43  ;;  %v3992_v53 = vmul.f32 0.70710677, %v3989_v49 }
 0x14b   :  { %v525_v54 = vpop.f32.mrf.mxu0 }
 0x14c   :  { %v614_v55 = vpop.f32.mrf.mxu1  ;;  %v917_v56 = vmul.f32 %v916_v50, %v3984_v41  ;;  %v928_v57 = vmul.f32 %v927_v51, %v3984_v41  ;;  %813 = vmatmul.bf16.gmra.mxu2 %v685_v52  ;;  %v953_v58 = vmul.f32 %v3992_v53, %v3992_v53  ;;  %v526_v3 = vadd.f32 %v3949_v44, %v525_v54 }
 0x14e   :  { %v929_v59 = vadd.f32 0.014752088, %v928_v57  ;;  %v3998_v60 = vmin.f32 %v953_v58, 16.0  ;;  %v918_v62 = vadd.f32 0.0036580483, %v917_v56  ;;  %v615_v14 = vadd.f32 %v614_v55, %v526_v3 }
 0x14f   :  { %v774_v61 = vpop.f32.mrf.mxu2 }
 0x150   :  { %v930_v63 = vmul.f32 %v929_v59, %v3984_v41  ;;  %v4002_v0 = vadd.f32 %v3972_v31, %v774_v61  ;;  %v955_v1 = vmul.f32 2.1237322e-06, %v3998_v60  ;;  %v966_v2 = vmul.f32 3.8918573e-05, %v3998_v60 }
 0x151   :  { %v919_v9 = vmul.f32 %v918_v62, %v3984_v41  ;;  %v664_v29 = vmax.f32 %v615_v14, 0.0 }
 0x152   :  { %v931_v4 = vadd.f32 0.112945676, %v930_v63  ;;  %v956_v5 = vadd.f32 0.00028619796, %v955_v1  ;;  %v967_v6 = vadd.f32 0.001143296, %v966_v2 }
 0x153   :  { %v4008_v7 = vmul.f32 0.70710677, %v4002_v0  ;;  %v527_v8 = vpop.f32.mrf.mxu0  ;;  %v920_v23 = vadd.f32 0.05243302, %v919_v9 }
 0x154   :  { %v932_v10 = vmul.f32 %v931_v4, %v3984_v41  ;;  %v528_v11 = vadd.f32 %v3949_v44, %v527_v8  ;;  %v957_v12 = vmul.f32 %v956_v5, %v3998_v60  ;;  %v968_v13 = vmul.f32 %v967_v6, %v3998_v60  ;;  %v616_v16 = vpop.f32.mrf.mxu1 }
 0x155   :  { %v993_v15 = vmul.f32 %v4008_v7, %v4008_v7  ;;  %v921_v40 = vmul.f32 %v920_v23, %v3984_v41 }
 0x156   :  { %v933_v17 = vadd.f32 0.4994258, %v932_v10  ;;  %v617_v18 = vadd.f32 %v616_v16, %v528_v11  ;;  %v958_v19 = vadd.f32 0.0036580483, %v957_v12  ;;  %v969_v20 = vadd.f32 0.014752088, %v968_v13 }
 0x157   :  { %v4017_v21 = vmin.f32 %v993_v15, 16.0  ;;  %v776_v22 = vpop.f32.mrf.mxu2  ;;  %v922_v52 = vadd.f32 0.18741608, %v921_v40 }
 0x158   :  { %v934_v24 = vmul.f32 %v933_v17, %v3984_v41  ;;  %v665_v25 = vmax.f32 %v617_v18, 0.0  ;;  %v4021_v26 = vadd.f32 %v3972_v31, %v776_v22  ;;  %v959_v27 = vmul.f32 %v958_v19, %v3998_v60 }
 0x159   :  { %v970_v28 = vmul.f32 %v969_v20, %v3998_v60  ;;  %v995_v30 = vmul.f32 2.1237322e-06, %v4017_v21  ;;  %v1006_v33 = vmul.f32 3.8918573e-05, %v4017_v21  ;;  %v923_v3 = vmul.f32 %v922_v52, %v3984_v41 }
 0x15a   :  { %v4026_v32 = vadd.f32 1.0, %v934_v24  ;;  %v4030_v36 = vmul.f32 0.70710677, %v4021_v26  ;;  %v686_v39 = vpack.c.bf16 %v665_v25, %v664_v29  ;;  %v960_v42 = vadd.f32 0.05243302, %v959_v27 }
 0x15b   :  { %v971_v37 = vadd.f32 0.112945676, %v970_v28  ;;  %v996_v38 = vadd.f32 0.00028619796, %v995_v30  ;;  %v1007_v46 = vadd.f32 0.001143296, %v1006_v33  ;;  %v530_v48 = vpop.f32.mrf.mxu0 }
 0x15c   :  { %3626 = vrcp.f32 %v4026_v32  ;;  %818 = vmatmul.bf16.gmra.mxu2 %v686_v39  ;;  %v1033_v47 = vmul.f32 %v4030_v36, %v4030_v36  ;;  %v961_v57 = vmul.f32 %v960_v42, %v3998_v60  ;;  %v619_v6 = vpop.f32.mrf.mxu1  ;;  %v4060_v41 = vmul.f32 0.5, %v3976_v34 }
 0x15d   :  { %v972_v43 = vmul.f32 %v971_v37, %v3998_v60  ;;  %v997_v45 = vmul.f32 %v996_v38, %v4017_v21  ;;  %v1008_v55 = vmul.f32 %v1007_v46, %v4017_v21  ;;  %v924_v15 = vadd.f32 1.1283791, %v923_v3 }
 0x15e   :  { %v4039_v56 = vmin.f32 %v1033_v47, 16.0  ;;  %v962_v9 = vadd.f32 0.18741608, %v961_v57  ;;  %v4064_v19 = vmul.f32 0.5, %v3989_v49  ;;  %v4068_v24 = vmul.f32 0.5, %v4002_v0 }
 0x15f   :  { %v973_v50 = vadd.f32 0.4994258, %v972_v43  ;;  %v779_v51 = vpop.f32.mrf.mxu2  ;;  %v998_v54 = vadd.f32 0.0036580483, %v997_v45  ;;  %v1009_v61 = vadd.f32 0.014752088, %v1008_v55  ;;  %v4081_v33 = vmul.f32 %v924_v15, %v3979_v35 }
 0x160   :  { %v1035_v62 = vmul.f32 2.1237322e-06, %v4039_v56  ;;  %v1046_v63 = vmul.f32 3.8918573e-05, %v4039_v56  ;;  %v4056_v12 = vadd.f32 %v3972_v31, %v779_v51  ;;  %v963_v20 = vmul.f32 %v962_v9, %v3998_v60 }
 0x161   :  { %v974_v58 = vmul.f32 %v973_v50, %v3998_v60  ;;  %v999_v2 = vmul.f32 %v998_v54, %v4017_v21  ;;  %v1010_v4 = vmul.f32 %v1009_v61, %v4017_v21  ;;  %v945_v29 = vand.u32 2147483647, %v4026_v32 }
 0x162   :  { %v4043_v59 = vpop.eup %3626  ;;  %v1047_v5 = vadd.f32 0.001143296, %v1046_v63  ;;  %v1036_v11 = vadd.f32 0.00028619796, %v1035_v62  ;;  %v4072_v34 = vmul.f32 0.70710677, %v4056_v12  ;;  %v531_v37 = vadd.f32 %v3949_v44, %v530_v48 }
 0x163   :  { %v4047_v1 = vadd.f32 1.0, %v974_v58  ;;  %v937_v8 = vmul.f32 %v4043_v59, %v4026_v32  ;;  %v1011_v10 = vadd.f32 0.112945676, %v1010_v4  ;;  %v1000_v13 = vadd.f32 0.05243302, %v999_v2  ;;  %v532_v17 = vpop.f32.mrf.mxu0 }
 0x164   :  { %v1048_v14 = vmul.f32 %v1047_v5, %v4039_v56  ;;  %v1037_v27 = vmul.f32 %v1036_v11, %v4039_v56  ;;  %v947_v49 = vand.u32 2147483648, %v4026_v32  ;;  %v4084_v0 = vmul.f32 0.5, %v4021_v26  ;;  %v621_v46 = vpop.f32.mrf.mxu1 }
 0x165   :  { %3628 = vrcp.f32 %v4047_v1  ;;  %v1012_v16 = vmul.f32 %v1011_v10, %v4017_v21  ;;  %v938_v18 = vsub.f32 1.0, %v937_v8  ;;  %v1001_v30 = vmul.f32 %v1000_v13, %v4017_v21 }
 0x166   :  { %v1049_v22 = vadd.f32 0.014752088, %v1048_v14  ;;  %v964_v40 = vadd.f32 1.1283791, %v963_v20  ;;  %vm941_vm0 = vweird.f32 %v4026_v32  ;;  %v1038_v45 = vadd.f32 0.0036580483, %v1037_v27 }
 0x167   :  { %v781_v23 = vpop.f32.mrf.mxu2  ;;  %v1013_v25 = vadd.f32 0.4994258, %v1012_v16  ;;  %v939_v39 = vmul.f32 %v4043_v59, %v938_v18  ;;  %v1073_v26 = vmul.f32 %v4072_v34, %v4072_v34  ;;  %vm4097_vm1 = vcmp.eq.f32.partialorder %v945_v29, 8.507059e+37 }
 0x168   :  { %v1050_v60 = vmul.f32 %v1049_v22, %v4039_v56  ;;  %v4088_v38 = vadd.f32 %v3972_v31, %v781_v23  ;;  %v948_v48 = vor.u32 1.1754944e-38, %v947_v49  ;;  %v1002_v50 = vadd.f32 0.18741608, %v1001_v30 }
 0x169   :  { %v1014_v42 = vmul.f32 %v1013_v25, %v4017_v21  ;;  %v620_v54 = vadd.f32 %v619_v6, %v531_v37  ;;  %v4104_v55 = vmin.f32 %v1073_v26, 16.0  ;;  %v533_v57 = vadd.f32 %v3949_v44, %v532_v17 }
 0x16a   :  { %v1051_v43 = vadd.f32 0.112945676, %v1050_v60  ;;  %v4108_v58 = vmul.f32 0.70710677, %v4088_v38  ;;  %v940_v61 = vadd.f32 %v4043_v59, %v939_v39  ;;  %vm942_vm2 = vweird.f32 %v4043_v59 }
 0x16b   :  { %v4074_v28 = vpop.eup %3628  ;;  %v4101_v51 = vadd.f32 1.0, %v1014_v42  ;;  %v4113_v62 = vmul.f32 %v964_v40, %v3992_v53  ;;  %v1039_v2 = vmul.f32 %v1038_v45, %v4039_v56  ;;  %v1075_v4 = vmul.f32 2.1237322e-06, %v4104_v55  ;;  %v4118_v5 = vpop.f32.mrf.mxu0  ;;  %vm4127_vm3 = vmor %vm941_vm0, %vm942_vm2 }
 0x16c   :  { %v977_v35 = vmul.f32 %v4074_v28, %v4047_v1  ;;  %v1052_v52 = vmul.f32 %v1051_v43, %v4039_v56  ;;  %v985_v6 = vand.u32 2147483647, %v4047_v1  ;;  %v1003_v8 = vmul.f32 %v1002_v50, %v4017_v21  ;;  %v624_v39 = vpop.f32.mrf.mxu1 }
 0x16d   :  { %3630 = vrcp.f32 %v4101_v51  ;;  %v1086_v9 = vmul.f32 3.8918573e-05, %v4104_v55  ;;  %v1113_v53 = vmul.f32 %v4108_v58, %v4108_v58  ;;  %vm981_vm4 = vweird.f32 %v4047_v1 }
 0x16e   :  { %v978_v63 = vsub.f32 1.0, %v977_v35  ;;  %v1053_v3 = vadd.f32 0.4994258, %v1052_v52  ;;  %v987_v11 = vand.u32 2147483648, %v4047_v1  ;;  %v1076_v14 = vadd.f32 0.00028619796, %v1075_v4 }
 0x16f   :  { %v622_v15 = vadd.f32 %v621_v46, %v533_v57  ;;  %v944_v21 = vsel %vm4127_vm3, %v4043_v59, %v940_v61  ;;  %v666_v16 = vmax.f32 %v620_v54, 0.0  ;;  %v1087_v17 = vadd.f32 0.001143296, %v1086_v9  ;;  %v784_v57 = vpop.f32.mrf.mxu2 }
 0x170   :  { %v1054_v13 = vmul.f32 %v1053_v3, %v4039_v56  ;;  %v4137_v18 = vmin.f32 %v1113_v53, 16.0  ;;  %v979_v32 = vmul.f32 %v4074_v28, %v978_v63  ;;  %v1040_v20 = vadd.f32 0.05243302, %v1039_v2 }
 0x171   :  { %v1077_v23 = vmul.f32 %v1076_v14, %v4104_v55  ;;  %v1004_v27 = vadd.f32 1.1283791, %v1003_v8  ;;  %v1088_v29 = vmul.f32 %v1087_v17, %v4104_v55  ;;  %v949_v30 = vsel %vm4097_vm1, %v948_v48, %v944_v21 }
 0x172   :  { %v4140_v22 = vadd.f32 1.0, %v1054_v13  ;;  %v1115_v49 = vmul.f32 2.1237322e-06, %v4137_v18  ;;  %v1126_v59 = vmul.f32 3.8918573e-05, %v4137_v18  ;;  %v988_v60 = vor.u32 1.1754944e-38, %v987_v11 }
 0x173   :  { %v4143_v25 = vpop.eup %3630  ;;  %v667_v37 = vmax.f32 %v622_v15, 0.0  ;;  %vm982_vm5 = vweird.f32 %v4074_v28  ;;  %vm4152_vm6 = vcmp.eq.f32.partialorder %v985_v6, 8.507059e+37  ;;  %v4159_v43 = vmul.f32 0.5, %v4056_v12  ;;  %v537_v3 = vpop.f32.mrf.mxu0 }
 0x174   :  { %3632 = vrcp.f32 %v4140_v22  ;;  %v1017_v42 = vmul.f32 %v4143_v25, %v4101_v51  ;;  %v1078_v35 = vadd.f32 0.0036580483, %v1077_v23  ;;  %v980_v45 = vadd.f32 %v4074_v28, %v979_v32  ;;  %vm4177_vm7 = vmor %vm981_vm4, %vm982_vm5 }
 0x175   :  { %v1041_v26 = vmul.f32 %v1040_v20, %v4039_v56  ;;  %v1089_v46 = vadd.f32 0.014752088, %v1088_v29  ;;  %v1116_v47 = vadd.f32 0.00028619796, %v1115_v49  ;;  %v950_v48 = vmul.f32 %v949_v30, %v4081_v33 }
 0x176   :  { %v4165_v50 = vmul.f32 %v1004_v27, %v4008_v7  ;;  %v1079_v52 = vmul.f32 %v1078_v35, %v4104_v55  ;;  %v1127_v54 = vadd.f32 0.001143296, %v1126_v59  ;;  %v4170_v12 = vmul.f32 0.5, %v4088_v38 }
 0x177   :  { %v1090_v61 = vmul.f32 %v1089_v46, %v4104_v55  ;;  %v1117_v63 = vmul.f32 %v1116_v47, %v4137_v18  ;;  %v687_v2 = vpack.c.bf16 %v667_v37, %v666_v16  ;;  %v1018_v33 = vsub.f32 1.0, %v1017_v42  ;;  %v626_v37 = vpop.f32.mrf.mxu1 }
 0x178   :  { %v1027_v4 = vand.u32 2147483648, %v4101_v51  ;;  %v1080_v6 = vadd.f32 0.05243302, %v1079_v52  ;;  %v1128_v8 = vmul.f32 %v1127_v54, %v4137_v18  ;;  %v984_v9 = vsel %vm4177_vm7, %v4074_v28, %v980_v45 }
 0x179   :  { %v1042_v53 = vadd.f32 0.18741608, %v1041_v26  ;;  %v1091_v10 = vadd.f32 0.112945676, %v1090_v61  ;;  %823 = vmatmul.bf16.gmra.mxu2 %v687_v2  ;;  %v4189_v1 = vadd.f32 %v3972_v31, %v784_v57  ;;  %vm1021_vm8 = vweird.f32 %v4101_v51 }
 0x17a   :  { %v4183_v38 = vpop.eup %3632  ;;  %v1118_v13 = vadd.f32 0.0036580483, %v1117_v63  ;;  %v1129_v14 = vadd.f32 0.014752088, %v1128_v8  ;;  %v538_v15 = vadd.f32 %v3949_v44, %v537_v3  ;;  %v1025_v21 = vand.u32 2147483647, %v4101_v51 }
 0x17b   :  { %v1057_v11 = vmul.f32 %v4183_v38, %v4140_v22  ;;  %v1092_v16 = vmul.f32 %v1091_v10, %v4104_v55  ;;  %v536_v28 = vadd.f32 %v3949_v44, %v4118_v5  ;;  %v3491_v17 = vclamps-f32 %v950_v48, 1.0 }
 0x17c   :  { %v1019_v32 = vmul.f32 %v4143_v25, %v1018_v33  ;;  %v1028_v20 = vor.u32 1.1754944e-38, %v1027_v4  ;;  %v1081_v23 = vmul.f32 %v1080_v6, %v4104_v55  ;;  %v1130_v27 = vmul.f32 %v1129_v14, %v4137_v18 }
 0x17d   :  { %v989_v29 = vsel %vm4152_vm6, %v988_v60, %v984_v9  ;;  %v1043_v49 = vmul.f32 %v1042_v53, %v4039_v56  ;;  %v1093_v59 = vadd.f32 0.4994258, %v1092_v16  ;;  %v4206_v30 = vmul.f32 0.70710677, %v4189_v1  ;;  %v786_v9 = vpop.f32.mrf.mxu2 }
 0x17e   :  { %v1058_v42 = vsub.f32 1.0, %v1057_v11  ;;  %v1119_v5 = vmul.f32 %v1118_v13, %v4137_v18  ;;  %v1131_v35 = vadd.f32 0.112945676, %v1130_v27  ;;  %v627_v45 = vadd.f32 %v626_v37, %v538_v15 }
 0x17f   :  { %v1094_v26 = vmul.f32 %v1093_v59, %v4104_v55  ;;  %v625_v46 = vadd.f32 %v624_v39, %v536_v28  ;;  %v1153_v47 = vmul.f32 %v4206_v30, %v4206_v30  ;;  %v2193_v40 = vadd.f32 1.0, %v3491_v17 }
 0x180   :  { %v1020_v60 = vadd.f32 %v4143_v25, %v1019_v32  ;;  %vm1022_vm9 = vweird.f32 %v4143_v25  ;;  %vm4214_vm10 = vcmp.eq.f32.partialorder %v1025_v21, 8.507059e+37  ;;  %v1082_v48 = vadd.f32 0.18741608, %v1081_v23 }
 0x181   :  { %v1132_v52 = vmul.f32 %v1131_v35, %v4137_v18  ;;  %v4220_v54 = vmul.f32 %v989_v29, %v4113_v62  ;;  %v4222_v57 = vadd.f32 1.0, %v1094_v26  ;;  %v4224_v39 = vmin.f32 %v1153_v47, 16.0  ;;  %vm4232_vm11 = vmor %vm1021_vm8, %vm1022_vm9 }
 0x182   :  { %v669_v61 = vmax.f32 %v627_v45, 0.0  ;;  %v1059_v63 = vmul.f32 %v4183_v38, %v1058_v42  ;;  %v1120_v2 = vadd.f32 0.05243302, %v1119_v5  ;;  %v4228_v7 = vmul.f32 %v2193_v40, %v4060_v41  ;;  %v540_v5 = vpop.f32.mrf.mxu0 }
 0x183   :  { %v1133_v3 = vadd.f32 0.4994258, %v1132_v52  ;;  %v1044_v62 = vadd.f32 1.1283791, %v1043_v49  ;;  %v1067_v4 = vand.u32 2147483648, %v4140_v22  ;;  %3634 = vrcp.f32 %v4222_v57 }
 0x184   :  { %v668_v6 = vmax.f32 %v625_v46, 0.0  ;;  %v1024_v8 = vsel %vm4232_vm11, %v4143_v25, %v1020_v60  ;;  %vm1062_vm12 = vweird.f32 %v4183_v38  ;;  %v1083_v41 = vmul.f32 %v1082_v48, %v4104_v55 }
 0x185   :  { %v1134_v51 = vmul.f32 %v1133_v3, %v4137_v18  ;;  %v1155_v53 = vmul.f32 2.1237322e-06, %v4224_v39  ;;  %v1166_v10 = vmul.f32 3.8918573e-05, %v4224_v39  ;;  %v1060_v13 = vadd.f32 %v4183_v38, %v1059_v63  ;;  %v789_v33 = vpop.f32.mrf.mxu2 }
 0x186   :  { %v688_v11 = vpack.c.bf16 %v669_v61, %v668_v6  ;;  %v1121_v14 = vmul.f32 %v1120_v2, %v4137_v18  ;;  %v2258_v25 = vsel %vm2257_vm13, %v4228_v7, 0.0  ;;  %v4253_v16 = vadd.f32 %v3972_v31, %v786_v9 }
 0x187   :  { %v4248_v15 = vadd.f32 1.0, %v1134_v51  ;;  %v1156_v21 = vadd.f32 0.00028619796, %v1155_v53  ;;  %v1167_v55 = vadd.f32 0.001143296, %v1166_v10  ;;  %2259 = vadd.xlane.f32.xlu0 %v2258_v25  ;;  %v2354_v28 = vmul.f32 %v4228_v7, %v4228_v7 }
 0x188   :  { %v1045_v17 = vmul.f32 %v1044_v62, %v4030_v36  ;;  %vm1061_vm14 = vweird.f32 %v4140_v22  ;;  %v1065_v32 = vand.u32 2147483647, %v4140_v22  ;;  %v1029_v27 = vsel %vm4214_vm10, %v1028_v20, %v1024_v8 }
 0x189   :  { %3636 = vrcp.f32 %v4248_v15  ;;  %v4261_v23 = vpop.eup %3634  ;;  %vm4267_vm15 = vmor %vm1061_vm14, %vm1062_vm12  ;;  %v1084_v49 = vadd.f32 1.1283791, %v1083_v41  ;;  %v1157_v36 = vmul.f32 %v1156_v21, %v4224_v39  ;;  %v1168_v59 = vmul.f32 %v1167_v55, %v4224_v39  ;;  %828 = vmatmul.bf16.gmra.mxu2 %v688_v11  ;;  %v629_v41 = vpop.f32.mrf.mxu1 }
 0x18a   :  { %v1064_v22 = vsel %vm4267_vm15, %v4183_v38, %v1060_v13  ;;  %v1097_v37 = vmul.f32 %v4261_v23, %v4222_v57  ;;  %v1122_v20 = vadd.f32 0.18741608, %v1121_v14  ;;  %v4279_v42 = vmul.f32 0.70710677, %v4253_v16 }
 0x18b   :  { %v1068_v35 = vor.u32 1.1754944e-38, %v1067_v4  ;;  %v1158_v45 = vadd.f32 0.0036580483, %v1157_v36  ;;  %v1169_v26 = vadd.f32 0.014752088, %v1168_v59  ;;  %v2386_v46 = vsel %vm2257_vm13, %v2354_v28, 0.0 }
 0x18c   :  { %vm1066_vm0 = vcmp.eq.f32.partialorder %v1065_v32, 8.507059e+37  ;;  %v4283_v47 = vmul.f32 0.5, %v4189_v1  ;;  %v1193_v38 = vmul.f32 %v4279_v42, %v4279_v42  ;;  %2387 = vadd.xlane.f32.xlu1 %v2386_v46  ;;  %v3492_v40 = vclamps-f32 %v4220_v54, 1.0 }
 0x18d   :  { %v4289_v60 = vmul.f32 %v1029_v27, %v4165_v50  ;;  %v1069_v56 = vsel %vm1066_vm0, %v1068_v35, %v1064_v22  ;;  %v1098_v48 = vsub.f32 1.0, %v1097_v37  ;;  %v1170_v52 = vmul.f32 %v1169_v26, %v4224_v39 }
 0x18e   :  { %v4295_v63 = vmul.f32 %v1084_v49, %v4072_v34  ;;  %v1123_v1 = vmul.f32 %v1122_v20, %v4137_v18  ;;  %v4298_v2 = vmin.f32 %v1193_v38, 16.0  ;;  %v2194_v3 = vadd.f32 1.0, %v3492_v40  ;;  %v542_v49 = vpop.f32.mrf.mxu0 }
 0x18f   :  { %v4292_v61 = vpop.eup %3636  ;;  %vm1101_vm1 = vweird.f32 %v4222_v57  ;;  %v1105_v50 = vand.u32 2147483647, %v4222_v57  ;;  %v1107_v54 = vand.u32 2147483648, %v4222_v57  ;;  %v1159_v62 = vmul.f32 %v1158_v45, %v4224_v39 }
 0x190   :  { %v1171_v4 = vadd.f32 0.112945676, %v1170_v52  ;;  %v4304_v6 = vmul.f32 %v1069_v56, %v1045_v17  ;;  %v1137_v34 = vmul.f32 %v4292_v61, %v4248_v15  ;;  %v1195_v18 = vmul.f32 2.1237322e-06, %v4298_v2 }
 0x191   :  { %v1206_v8 = vmul.f32 3.8918573e-05, %v4298_v2  ;;  %v1099_v51 = vmul.f32 %v4261_v23, %v1098_v48  ;;  %v4313_v53 = vmul.f32 %v2194_v3, %v4064_v19  ;;  %v4316_v10 = vadd.f32 %v3972_v31, %v789_v33 }
 0x192   :  { %v1172_v9 = vmul.f32 %v1171_v4, %v4224_v39  ;;  %v1124_v11 = vadd.f32 1.1283791, %v1123_v1  ;;  %v1196_v13 = vadd.f32 0.00028619796, %v1195_v18  ;;  %v541_v25 = vadd.f32 %v3949_v44, %v540_v5 }
 0x193   :  { %v1207_v14 = vadd.f32 0.001143296, %v1206_v8  ;;  %vm4319_vm2 = vcmp.eq.f32.partialorder %v1105_v50, 8.507059e+37  ;;  %v1108_v55 = vor.u32 1.1754944e-38, %v1107_v54  ;;  %v1160_v28 = vadd.f32 0.05243302, %v1159_v62  ;;  %v631_v50 = vpop.f32.mrf.mxu1 }
 0x194   :  { %v1173_v17 = vadd.f32 0.4994258, %v1172_v9  ;;  %v1138_v32 = vsub.f32 1.0, %v1137_v34  ;;  %v1197_v27 = vmul.f32 %v1196_v13, %v4298_v2  ;;  %v2261_v29 = vsel %vm2257_vm13, %v4313_v53, 0.0  ;;  %v791_v34 = vpop.f32.mrf.mxu2 }
 0x195   :  { %v1208_v19 = vmul.f32 %v1207_v14, %v4298_v2  ;;  %v1100_v36 = vadd.f32 %v4261_v23, %v1099_v51  ;;  %vm1102_vm3 = vweird.f32 %v4261_v23  ;;  %2262 = vadd.xlane.f32.xlu0 %v2261_v29  ;;  %v4331_v22 = vmul.f32 0.70710677, %v4316_v10 }
 0x196   :  { %v1174_v59 = vmul.f32 %v1173_v17, %v4224_v39  ;;  %v4334_v37 = vmul.f32 %v1124_v11, %v4108_v58  ;;  %v1198_v20 = vadd.f32 0.0036580483, %v1197_v27  ;;  %v630_v35 = vadd.f32 %v629_v41, %v541_v25  ;;  %vm4345_vm4 = vmor %vm1101_vm1, %vm1102_vm3 }
 0x197   :  { %v1209_v5 = vadd.f32 0.014752088, %v1208_v19  ;;  %v1233_v26 = vmul.f32 %v4331_v22, %v4331_v22  ;;  %v2355_v46 = vmul.f32 %v4313_v53, %v4313_v53  ;;  %v543_v38 = vadd.f32 %v3949_v44, %v542_v49 }
 0x198   :  { %v4336_v45 = vadd.f32 1.0, %v1174_v59  ;;  %v1139_v58 = vmul.f32 %v4292_v61, %v1138_v32  ;;  %vm1141_vm5 = vweird.f32 %v4248_v15  ;;  %v1161_v56 = vmul.f32 %v1160_v28, %v4224_v39 }
 0x199   :  { %v1210_v48 = vmul.f32 %v1209_v5, %v4298_v2  ;;  %v1104_v52 = vsel %vm4345_vm4, %v4261_v23, %v1100_v36  ;;  %v1145_v44 = vand.u32 2147483647, %v4248_v15  ;;  %v1147_v57 = vand.u32 2147483648, %v4248_v15 }
 0x19a   :  { %3638 = vrcp.f32 %v4336_v45  ;;  %vm1142_vm6 = vweird.f32 %v4292_v61  ;;  %v4361_v1 = vmul.f32 0.5, %v4253_v16  ;;  %v1199_v3 = vmul.f32 %v1198_v20, %v4298_v2 }
 0x19b   :  { %v670_v33 = vmax.f32 %v630_v35, 0.0  ;;  %v1211_v54 = vadd.f32 0.112945676, %v1210_v48  ;;  %v4364_v62 = vmin.f32 %v1233_v26, 16.0  ;;  %v2389_v23 = vsel %vm2257_vm13, %v2355_v46, 0.0  ;;  %vm4384_vm7 = vmor %vm1141_vm5, %vm1142_vm6 }
 0x19c   :  { %v632_v4 = vadd.f32 %v631_v50, %v543_v38  ;;  %v1109_v18 = vsel %vm4319_vm2, %v1108_v55, %v1104_v52  ;;  %v1140_v8 = vadd.f32 %v4292_v61, %v1139_v58  ;;  %v1162_v41 = vadd.f32 0.18741608, %v1161_v56  ;;  %2390 = vadd.xlane.f32.xlu1 %v2389_v23 }
 0x19d   :  { %v3493_v16 = vclamps-f32 %v4289_v60, 1.0  ;;  %v1212_v51 = vmul.f32 %v1211_v54, %v4298_v2  ;;  %v1235_v9 = vmul.f32 2.1237322e-06, %v4364_v62  ;;  %v1246_v11 = vmul.f32 3.8918573e-05, %v4364_v62 }
 0x19e   :  { %v671_v13 = vmax.f32 %v632_v4, 0.0  ;;  %v1148_v14 = vor.u32 1.1754944e-38, %v1147_v57  ;;  %v1200_v25 = vadd.f32 0.05243302, %v1199_v3  ;;  %v4375_v17 = vadd.f32 %v3972_v31, %v791_v34 }
 0x19f   :  { %v2195_v28 = vadd.f32 1.0, %v3493_v16  ;;  %v1213_v55 = vadd.f32 0.4994258, %v1212_v51  ;;  %v1236_v32 = vadd.f32 0.00028619796, %v1235_v9  ;;  %v1110_v60 = vmul.f32 %v1109_v18, %v4295_v63 }
 0x1a0   :  { %v4377_v21 = vpop.eup %3638  ;;  %v1247_v27 = vadd.f32 0.001143296, %v1246_v11  ;;  %v689_v19 = vpack.c.bf16 %v671_v13, %v670_v33  ;;  %v1163_v49 = vmul.f32 %v1162_v41, %v4224_v39  ;;  %v1144_v63 = vsel %vm4384_vm7, %v4292_v61, %v1140_v8 }
 0x1a1   :  { %v1177_v36 = vmul.f32 %v4377_v21, %v4336_v45  ;;  %v4392_v59 = vmul.f32 %v2195_v28, %v4068_v24  ;;  %v1214_v20 = vmul.f32 %v1213_v55, %v4298_v2  ;;  %v1237_v15 = vmul.f32 %v1236_v32, %v4364_v62  ;;  %v545_v55 = vpop.f32.mrf.mxu0 }
 0x1a2   :  { %v1248_v5 = vmul.f32 %v1247_v27, %v4364_v62  ;;  %833 = vmatmul.bf16.gmra.mxu2 %v689_v19  ;;  %v1201_v39 = vmul.f32 %v1200_v25, %v4298_v2  ;;  %v4404_v24 = vmul.f32 0.70710677, %v4375_v17  ;;  %vm1146_vm8 = vcmp.eq.f32.partialorder %v1145_v44, 8.507059e+37  ;;  %v794_v44 = vpop.f32.mrf.mxu2 }
 0x1a3   :  { %v1178_v35 = vsub.f32 1.0, %v1177_v36  ;;  %v2264_v26 = vsel %vm2257_vm13, %v4392_v59, 0.0  ;;  %v4406_v46 = vadd.f32 1.0, %v1214_v20  ;;  %v1238_v38 = vadd.f32 0.0036580483, %v1237_v15 }
 0x1a4   :  { %v1249_v61 = vadd.f32 0.014752088, %v1248_v5  ;;  %2265 = vadd.xlane.f32.xlu2 %v2264_v26  ;;  %v2356_v40 = vmul.f32 %v4392_v59, %v4392_v59  ;;  %v4412_v56 = vmul.f32 0.5, %v4316_v10  ;;  %v1273_v48 = vmul.f32 %v4404_v24, %v4404_v24  ;;  %v634_v26 = vpop.f32.mrf.mxu1 }
 0x1a5   :  { %v1179_v58 = vmul.f32 %v4377_v21, %v1178_v35  ;;  %v3495_v52 = vclamps-f32 %v1110_v60, 1.0  ;;  %v1149_v57 = vsel %vm1146_vm8, %v1148_v14, %v1144_v63  ;;  %v1164_v3 = vadd.f32 1.1283791, %v1163_v49 }
 0x1a6   :  { %3640 = vrcp.f32 %v4406_v46  ;;  %v1202_v33 = vadd.f32 0.18741608, %v1201_v39  ;;  %v1239_v50 = vmul.f32 %v1238_v38, %v4364_v62  ;;  %v1250_v54 = vmul.f32 %v1249_v61, %v4364_v62 }
 0x1a7   :  { %v4419_v23 = vmin.f32 %v1273_v48, 16.0  ;;  %vm1182_vm9 = vweird.f32 %v4377_v21  ;;  %v1185_v10 = vand.u32 2147483647, %v4336_v45  ;;  %v1187_v4 = vand.u32 2147483648, %v4336_v45 }
 0x1a8   :  { %v2392_v34 = vsel %vm2257_vm13, %v2356_v40, 0.0  ;;  %v1180_v18 = vadd.f32 %v4377_v21, %v1179_v58  ;;  %v1240_v8 = vadd.f32 0.05243302, %v1239_v50  ;;  %v1251_v41 = vadd.f32 0.112945676, %v1250_v54 }
 0x1a9   :  { %v1275_v16 = vmul.f32 2.1237322e-06, %v4419_v23  ;;  %2393 = vadd.xlane.f32.xlu0 %v2392_v34  ;;  %v2197_v51 = vadd.f32 1.0, %v3495_v52  ;;  %v1286_v9 = vmul.f32 3.8918573e-05, %v4419_v23  ;;  %v3494_v11 = vclamps-f32 %v4304_v6, 1.0 }
 0x1aa   :  { %v4430_v13 = vadd.f32 %v3972_v31, %v794_v44  ;;  %vm1181_vm10 = vweird.f32 %v4336_v45  ;;  %v1203_v14 = vmul.f32 %v1202_v33, %v4298_v2  ;;  %v1252_v25 = vmul.f32 %v1251_v41, %v4364_v62 }
 0x1ab   :  { %v1276_v28 = vadd.f32 0.00028619796, %v1275_v16  ;;  %v4438_v27 = vmul.f32 %v1149_v57, %v4334_v37  ;;  %vm4442_vm11 = vmor %vm1181_vm10, %vm1182_vm9  ;;  %v1287_v19 = vadd.f32 0.001143296, %v1286_v9  ;;  %v2196_v60 = vadd.f32 1.0, %v3494_v11  ;;  %v547_v11 = vpop.f32.mrf.mxu0 }
 0x1ac   :  { %v4435_v32 = vpop.eup %3640  ;;  %v4447_v45 = vmul.f32 0.70710677, %v4430_v13  ;;  %v1184_v2 = vsel %vm4442_vm11, %v4377_v21, %v1180_v18  ;;  %vm4452_vm12 = vcmp.eq.f32.partialorder %v1185_v10, 8.507059e+37  ;;  %v1188_v37 = vor.u32 1.1754944e-38, %v1187_v4  ;;  %v4467_v21 = vld [vmem:[%s6619_s3] ss:$0 sm:$0xff] }
 0x1ad   :  { %v1241_v49 = vmul.f32 %v1240_v8, %v4364_v62  ;;  %v1253_v36 = vadd.f32 0.4994258, %v1252_v25  ;;  %v1277_v63 = vmul.f32 %v1276_v28, %v4419_v23  ;;  %v1288_v20 = vmul.f32 %v1287_v19, %v4419_v23 }
 0x1ae   :  { %v4460_v15 = vmul.f32 %v2196_v60, %v4084_v0  ;;  %v1204_v5 = vadd.f32 1.1283791, %v1203_v14  ;;  %v1217_v35 = vmul.f32 %v4435_v32, %v4406_v46  ;;  %v546_v39 = vadd.f32 %v4467_v21, %v545_v55 }
 0x1af   :  { %v1313_v38 = vmul.f32 %v4447_v45, %v4447_v45  ;;  %v1254_v61 = vmul.f32 %v1253_v36, %v4364_v62  ;;  %v1278_v40 = vadd.f32 0.0036580483, %v1277_v63  ;;  %v1289_v0 = vadd.f32 0.014752088, %v1288_v20  ;;  %v636_v20 = vpop.f32.mrf.mxu1 }
 0x1b0   :  { %v2267_v58 = vsel %vm2257_vm13, %v4460_v15, 0.0  ;;  %v4476_v48 = vmul.f32 %v2197_v51, %v4159_v43  ;;  %v1165_v52 = vmul.f32 %v1164_v3, %v4206_v30  ;;  %v1189_v57 = vsel %vm4452_vm12, %v1188_v37, %v1184_v2 }
 0x1b1   :  { %2268 = vadd.xlane.f32.xlu2 %v2267_v58  ;;  %v4481_v33 = vmin.f32 %v1313_v38, 16.0  ;;  %v1242_v50 = vadd.f32 0.18741608, %v1241_v49  ;;  %v4483_v54 = vadd.f32 1.0, %v1254_v61  ;;  %v1279_v44 = vmul.f32 %v1278_v40, %v4419_v23 }
 0x1b2   :  { %v1290_v10 = vmul.f32 %v1289_v0, %v4419_v23  ;;  %v1218_v4 = vsub.f32 1.0, %v1217_v35  ;;  %v4488_v34 = vmul.f32 0.5, %v4375_v17  ;;  %v4493_v3 = vmul.f32 %v1204_v5, %v4279_v42  ;;  %v796_v42 = vpop.f32.mrf.mxu2 }
 0x1b3   :  { %v1315_v43 = vmul.f32 2.1237322e-06, %v4481_v33  ;;  %v1326_v30 = vmul.f32 3.8918573e-05, %v4481_v33  ;;  %3642 = vrcp.f32 %v4483_v54  ;;  %v635_v18 = vadd.f32 %v634_v26, %v546_v39 }
 0x1b4   :  { %v2357_v8 = vmul.f32 %v4460_v15, %v4460_v15  ;;  %v1190_v41 = vmul.f32 %v1189_v57, %v1165_v52  ;;  %v1280_v16 = vadd.f32 0.05243302, %v1279_v44  ;;  %v1291_v51 = vadd.f32 0.112945676, %v1290_v10 }
 0x1b5   :  { %v1316_v9 = vadd.f32 0.00028619796, %v1315_v43  ;;  %vm1221_vm14 = vweird.f32 %v4406_v46  ;;  %v1225_v17 = vand.u32 2147483647, %v4406_v46  ;;  %v1227_v14 = vand.u32 2147483648, %v4406_v46 }
 0x1b6   :  { %v1327_v25 = vadd.f32 0.001143296, %v1326_v30  ;;  %v1219_v28 = vmul.f32 %v4435_v32, %v1218_v4  ;;  %v1243_v55 = vmul.f32 %v1242_v50, %v4364_v62  ;;  %v1292_v6 = vmul.f32 %v1291_v51, %v4419_v23 }
 0x1b7   :  { %v1317_v19 = vmul.f32 %v1316_v9, %v4481_v33  ;;  %v2395_v2 = vsel %vm2257_vm13, %v2357_v8, 0.0  ;;  %v548_v29 = vadd.f32 %v4467_v21, %v547_v11  ;;  %v2270_v37 = vsel %vm2257_vm13, %v4476_v48, 0.0 }
 0x1b8   :  { %v1328_v60 = vmul.f32 %v1327_v25, %v4481_v33  ;;  %v3497_v49 = vclamps-f32 %v1190_v41, 1.0  ;;  %v1281_v36 = vmul.f32 %v1280_v16, %v4419_v23  ;;  %v1293_v63 = vadd.f32 0.4994258, %v1292_v6  ;;  %2396 = vadd.xlane.f32.xlu1 %v2395_v2 }
 0x1b9   :  { %2271 = vadd.xlane.f32.xlu2 %v2270_v37  ;;  %v4512_v62 = vadd.f32 %v3972_v31, %v796_v42  ;;  %v4514_v5 = vpop.eup %3642  ;;  %v672_v35 = vmax.f32 %v635_v18, 0.0  ;;  %v637_v26 = vadd.f32 %v636_v20, %v548_v29  ;;  %v2358_v38 = vmul.f32 %v4476_v48, %v4476_v48 }
 0x1ba   :  { %v1329_v39 = vadd.f32 0.014752088, %v1328_v60  ;;  %vm1222_vm15 = vweird.f32 %v4435_v32  ;;  %v1244_v61 = vadd.f32 1.1283791, %v1243_v55  ;;  %v1257_v40 = vmul.f32 %v4514_v5, %v4483_v54  ;;  %v799_v60 = vpop.f32.mrf.mxu2 }
 0x1bb   :  { %v1294_v0 = vmul.f32 %v1293_v63, %v4419_v23  ;;  %v1220_v58 = vadd.f32 %v4435_v32, %v1219_v28  ;;  %v1318_v31 = vadd.f32 0.0036580483, %v1317_v19  ;;  %v673_v57 = vmax.f32 %v637_v26, 0.0  ;;  %vm4534_vm0 = vmor %vm1221_vm14, %vm1222_vm15 }
 0x1bc   :  { %v1330_v52 = vmul.f32 %v1329_v39, %v4481_v33  ;;  %v2199_v50 = vadd.f32 1.0, %v3497_v49  ;;  %v1282_v44 = vadd.f32 0.18741608, %v1281_v36  ;;  %v4527_v4 = vmul.f32 0.70710677, %v4512_v62 }
 0x1bd   :  { %v4524_v10 = vadd.f32 1.0, %v1294_v0  ;;  %v1258_v43 = vsub.f32 1.0, %v1257_v40  ;;  %v690_v18 = vpack.c.bf16 %v673_v57, %v672_v35  ;;  %v2398_v8 = vsel %vm2257_vm13, %v2358_v38, 0.0  ;;  %v4590_v40 = vld [vmem:[%s6621_s5] ss:$0 sm:$0xff] }
 0x1be   :  { %v1331_v30 = vadd.f32 0.112945676, %v1330_v52  ;;  %vm4538_vm1 = vcmp.eq.f32.partialorder %v1225_v17, 8.507059e+37  ;;  %v1228_v51 = vor.u32 1.1754944e-38, %v1227_v14  ;;  %v4544_v9 = vmul.f32 0.5, %v4430_v13  ;;  %v550_v17 = vpop.f32.mrf.mxu0 }
 0x1bf   :  { %3644 = vrcp.f32 %v4524_v10  ;;  %v1224_v11 = vsel %vm4534_vm0, %v4435_v32, %v1220_v58  ;;  %v1265_v46 = vand.u32 2147483647, %v4483_v54  ;;  %v1319_v25 = vmul.f32 %v1318_v31, %v4481_v33  ;;  %838 = vmatmul.bf16.gmra.mxu2 %v690_v18 }
 0x1c0   :  { %v1332_v42 = vmul.f32 %v1331_v30, %v4481_v33  ;;  %v4553_v28 = vmul.f32 %v2199_v50, %v4283_v47  ;;  %v1283_v14 = vmul.f32 %v1282_v44, %v4419_v23  ;;  %v1353_v13 = vmul.f32 %v4527_v4, %v4527_v4  ;;  %2399 = vadd.xlane.f32.xlu1 %v2398_v8 }
 0x1c1   :  { %v3496_v55 = vclamps-f32 %v4438_v27, 1.0  ;;  %v4560_v32 = vmul.f32 %v1244_v61, %v4331_v22  ;;  %v1259_v6 = vmul.f32 %v4514_v5, %v1258_v43  ;;  %vm1261_vm2 = vweird.f32 %v4483_v54  ;;  %v639_v61 = vpop.f32.mrf.mxu1 }
 0x1c2   :  { %v1333_v19 = vadd.f32 0.4994258, %v1332_v42  ;;  %v1229_v47 = vsel %vm4538_vm1, %v1228_v51, %v1224_v11  ;;  %v1267_v23 = vand.u32 2147483648, %v4483_v54  ;;  %v4567_v2 = vmin.f32 %v1353_v13, 16.0  ;;  %v801_v13 = vpop.f32.mrf.mxu2 }
 0x1c3   :  { %v2198_v29 = vadd.f32 1.0, %v3496_v55  ;;  %vm1262_vm3 = vweird.f32 %v4514_v5  ;;  %vm4570_vm4 = vcmp.eq.f32.partialorder %v1265_v46, 8.507059e+37  ;;  %v1320_v22 = vadd.f32 0.05243302, %v1319_v25 }
 0x1c4   :  { %v1334_v37 = vmul.f32 %v1333_v19, %v4481_v33  ;;  %v1284_v36 = vadd.f32 1.1283791, %v1283_v14  ;;  %v1355_v63 = vmul.f32 2.1237322e-06, %v4567_v2  ;;  %v1366_v20 = vmul.f32 3.8918573e-05, %v4567_v2  ;;  %vm4608_vm5 = vmor %vm1261_vm2, %vm1262_vm3 }
 0x1c5   :  { %v4575_v49 = vpop.eup %3644  ;;  %v4580_v35 = vmul.f32 %v2198_v29, %v4170_v12  ;;  %v1260_v39 = vadd.f32 %v4514_v5, %v1259_v6  ;;  %v4593_v0 = vadd.f32 %v4590_v40, %v799_v60  ;;  %v551_v12 = vadd.f32 %v4467_v21, %v550_v17 }
 0x1c6   :  { %v1297_v26 = vmul.f32 %v4575_v49, %v4524_v10  ;;  %v4585_v38 = vadd.f32 1.0, %v1334_v37  ;;  %v1356_v58 = vadd.f32 0.00028619796, %v1355_v63  ;;  %v1367_v31 = vadd.f32 0.001143296, %v1366_v20  ;;  %v552_v11 = vpop.f32.mrf.mxu0 }
 0x1c7   :  { %v2273_v52 = vsel %vm2257_vm13, %v4580_v35, 0.0  ;;  %v1305_v50 = vand.u32 2147483647, %v4524_v10  ;;  %v1321_v44 = vmul.f32 %v1320_v22, %v4481_v33  ;;  %v4602_v43 = vmul.f32 %v1229_v47, %v4493_v3 }
 0x1c8   :  { %v1298_v57 = vsub.f32 1.0, %v1297_v26  ;;  %3646 = vrcp.f32 %v4585_v38  ;;  %2274 = vadd.xlane.f32.xlu0 %v2273_v52  ;;  %v1268_v18 = vor.u32 1.1754944e-38, %v1267_v23  ;;  %v4613_v8 = vmul.f32 %v1284_v36, %v4404_v24 }
 0x1c9   :  { %v4616_v41 = vmul.f32 0.5, %v4512_v62  ;;  %v1264_v3 = vsel %vm4608_vm5, %v4514_v5, %v1260_v39  ;;  %v1368_v51 = vmul.f32 %v1367_v31, %v4567_v2  ;;  %v4624_v54 = vmul.f32 0.70710677, %v4593_v0 }
 0x1ca   :  { %v1299_v16 = vmul.f32 %v4575_v49, %v1298_v57  ;;  %vm1301_vm6 = vweird.f32 %v4524_v10  ;;  %v1307_v24 = vand.u32 2147483648, %v4524_v10  ;;  %v1357_v46 = vmul.f32 %v1356_v58, %v4567_v2 }
 0x1cb   :  { %v640_v62 = vadd.f32 %v639_v61, %v551_v12  ;;  %vm4629_vm7 = vcmp.eq.f32.partialorder %v1305_v50, 8.507059e+37  ;;  %v1322_v5 = vadd.f32 0.18741608, %v1321_v44  ;;  %v1369_v42 = vadd.f32 0.014752088, %v1368_v51  ;;  %v641_v61 = vpop.f32.mrf.mxu1 }
 0x1cc   :  { %v1393_v17 = vmul.f32 %v4624_v54, %v4624_v54  ;;  %v2359_v14 = vmul.f32 %v4580_v35, %v4580_v35  ;;  %v1269_v55 = vsel %vm4570_vm4, %v1268_v18, %v1264_v3  ;;  %vm1302_vm8 = vweird.f32 %v4575_v49 }
 0x1cd   :  { %v553_v6 = vadd.f32 %v4467_v21, %v552_v11  ;;  %v2276_v19 = vsel %vm2257_vm13, %v4553_v28, 0.0  ;;  %v1300_v47 = vadd.f32 %v4575_v49, %v1299_v16  ;;  %v1370_v23 = vmul.f32 %v1369_v42, %v4567_v2  ;;  %vm4662_vm9 = vmor %vm1301_vm6, %vm1302_vm8 }
 0x1ce   :  { %v4643_v60 = vpop.eup %3646  ;;  %v4647_v29 = vmin.f32 %v1393_v17, 16.0  ;;  %v2401_v22 = vsel %vm2257_vm13, %v2359_v14, 0.0  ;;  %v1308_v37 = vor.u32 1.1754944e-38, %v1307_v24  ;;  %v1358_v36 = vadd.f32 0.0036580483, %v1357_v46 }
 0x1cf   :  { %v1337_v27 = vmul.f32 %v4643_v60, %v4585_v38  ;;  %2402 = vadd.xlane.f32.xlu2 %v2401_v22  ;;  %v4653_v21 = vadd.f32 %v4590_v40, %v801_v13  ;;  %v1270_v63 = vmul.f32 %v1269_v55, %v4560_v32  ;;  %v1371_v20 = vadd.f32 0.112945676, %v1370_v23  ;;  %v804_v13 = vpop.f32.mrf.mxu2 }
 0x1d0   :  { %v1395_v39 = vmul.f32 2.1237322e-06, %v4647_v29  ;;  %v1406_v26 = vmul.f32 3.8918573e-05, %v4647_v29  ;;  %2277 = vadd.xlane.f32.xlu0 %v2276_v19  ;;  %v1323_v31 = vmul.f32 %v1322_v5, %v4481_v33  ;;  %v674_v52 = vmax.f32 %v640_v62, 0.0 }
 0x1d1   :  { %v1338_v12 = vsub.f32 1.0, %v1337_v27  ;;  %v642_v32 = vadd.f32 %v641_v61, %v553_v6  ;;  %v1304_v57 = vsel %vm4662_vm9, %v4575_v49, %v1300_v47  ;;  %v1372_v50 = vmul.f32 %v1371_v20, %v4567_v2 }
 0x1d2   :  { %v1396_v44 = vadd.f32 0.00028619796, %v1395_v39  ;;  %v1407_v30 = vadd.f32 0.001143296, %v1406_v26  ;;  %v1359_v10 = vmul.f32 %v1358_v36, %v4567_v2  ;;  %v4674_v16 = vmul.f32 0.70710677, %v4653_v21 }
 0x1d3   :  { %v1339_v18 = vmul.f32 %v4643_v60, %v1338_v12  ;;  %v675_v3 = vmax.f32 %v642_v32, 0.0  ;;  %v3499_v33 = vclamps-f32 %v1270_v63, 1.0  ;;  %v1373_v51 = vadd.f32 0.4994258, %v1372_v50 }
 0x1d4   :  { %v1397_v11 = vmul.f32 %v1396_v44, %v4647_v29  ;;  %v1408_v24 = vmul.f32 %v1407_v30, %v4647_v29  ;;  %v1309_v49 = vsel %vm4629_vm7, %v1308_v37, %v1304_v57  ;;  %v1347_v46 = vand.u32 2147483648, %v4585_v38 }
 0x1d5   :  { %v691_v62 = vpack.c.bf16 %v675_v3, %v674_v52  ;;  %v1433_v5 = vmul.f32 %v4674_v16, %v4674_v16  ;;  %vm1342_vm10 = vweird.f32 %v4643_v60  ;;  %v1374_v42 = vmul.f32 %v1373_v51, %v4567_v2 }
 0x1d6   :  { %v1398_v17 = vadd.f32 0.0036580483, %v1397_v11  ;;  %v1409_v14 = vadd.f32 0.014752088, %v1408_v24  ;;  %v1340_v55 = vadd.f32 %v4643_v60, %v1339_v18  ;;  %v1360_v6 = vadd.f32 0.05243302, %v1359_v10 }
 0x1d7   :  { %v4686_v19 = vmin.f32 %v1433_v5, 16.0  ;;  %v2360_v25 = vmul.f32 %v4553_v28, %v4553_v28  ;;  %843 = vmatmul.bf16.gmra.mxu2 %v691_v62  ;;  %vm1341_vm11 = vweird.f32 %v4585_v38  ;;  %v4691_v47 = vadd.f32 1.0, %v1374_v42  ;;  %v806_v5 = vpop.f32.mrf.mxu2 }
 0x1d8   :  { %v1399_v23 = vmul.f32 %v1398_v17, %v4647_v29  ;;  %v1410_v22 = vmul.f32 %v1409_v14, %v4647_v29  ;;  %v1310_v37 = vmul.f32 %v1309_v49, %v4613_v8  ;;  %v1345_v27 = vand.u32 2147483647, %v4585_v38  ;;  %vm4701_vm12 = vmor %vm1341_vm11, %vm1342_vm10 }
 0x1d9   :  { %v1435_v36 = vmul.f32 2.1237322e-06, %v4686_v19  ;;  %v1446_v63 = vmul.f32 3.8918573e-05, %v4686_v19  ;;  %v2201_v20 = vadd.f32 1.0, %v3499_v33  ;;  %v1348_v61 = vor.u32 1.1754944e-38, %v1347_v46 }
 0x1da   :  { %v1324_v39 = vadd.f32 1.1283791, %v1323_v31  ;;  %3648 = vrcp.f32 %v4691_v47  ;;  %v1344_v8 = vsel %vm4701_vm12, %v4643_v60, %v1340_v55  ;;  %v1361_v38 = vmul.f32 %v1360_v6, %v4567_v2 }
 0x1db   :  { %v1411_v58 = vadd.f32 0.112945676, %v1410_v22  ;;  %v2404_v12 = vsel %vm2257_vm13, %v2360_v25, 0.0  ;;  %v1400_v52 = vadd.f32 0.05243302, %v1399_v23  ;;  %v3500_v57 = vclamps-f32 %v1310_v37, 1.0 }
 0x1dc   :  { %v1436_v31 = vadd.f32 0.00028619796, %v1435_v36  ;;  %v1447_v32 = vadd.f32 0.001143296, %v1446_v63  ;;  %2405 = vadd.xlane.f32.xlu2 %v2404_v12  ;;  %vm1346_vm14 = vcmp.eq.f32.partialorder %v1345_v27, 8.507059e+37  ;;  %v3498_v44 = vclamps-f32 %v4602_v43, 1.0 }
 0x1dd   :  { %v1412_v50 = vmul.f32 %v1411_v58, %v4647_v29  ;;  %v1349_v30 = vsel %vm1346_vm14, %v1348_v61, %v1344_v8  ;;  %v4716_v10 = vadd.f32 %v4590_v40, %v804_v13  ;;  %v1325_v3 = vmul.f32 %v1324_v39, %v4447_v45 }
 0x1de   :  { %v1437_v18 = vmul.f32 %v1436_v31, %v4686_v19  ;;  %v1448_v60 = vmul.f32 %v1447_v32, %v4686_v19  ;;  %v1362_v33 = vadd.f32 0.18741608, %v1361_v38  ;;  %v2200_v11 = vadd.f32 1.0, %v3498_v44 }
 0x1df   :  { %v1413_v51 = vadd.f32 0.4994258, %v1412_v50  ;;  %v4722_v49 = vmul.f32 %v2201_v20, %v4412_v56  ;;  %v1401_v43 = vmul.f32 %v1400_v52, %v4647_v29  ;;  %v2202_v42 = vadd.f32 1.0, %v3500_v57 }
 0x1e0   :  { %v4719_v24 = vpop.eup %3648  ;;  %v1438_v46 = vadd.f32 0.0036580483, %v1437_v18  ;;  %v1449_v62 = vadd.f32 0.014752088, %v1448_v60  ;;  %v1350_v17 = vmul.f32 %v1349_v30, %v1325_v3  ;;  %v4731_v6 = vmul.f32 %v2200_v11, %v4361_v1 }
 0x1e1   :  { %v1377_v14 = vmul.f32 %v4719_v24, %v4691_v47  ;;  %v1414_v45 = vmul.f32 %v1413_v51, %v4647_v29  ;;  %v4734_v56 = vmul.f32 0.70710677, %v4716_v10  ;;  %v1363_v25 = vmul.f32 %v1362_v33, %v4567_v2 }
 0x1e2   :  { %v1439_v13 = vmul.f32 %v1438_v46, %v4686_v19  ;;  %v1450_v55 = vmul.f32 %v1449_v62, %v4686_v19  ;;  %v4740_v37 = vadd.f32 %v4590_v40, %v806_v5  ;;  %v1402_v27 = vadd.f32 0.18741608, %v1401_v43 }
 0x1e3   :  { %v1378_v23 = vsub.f32 1.0, %v1377_v14  ;;  %v4737_v22 = vadd.f32 1.0, %v1414_v45  ;;  %v2279_v63 = vsel %vm2257_vm13, %v4731_v6, 0.0  ;;  %v1473_v1 = vmul.f32 %v4734_v56, %v4734_v56 }
 0x1e4   :  { %v1451_v36 = vadd.f32 0.112945676, %v1450_v55  ;;  %v4747_v20 = vmul.f32 %v2202_v42, %v4488_v34  ;;  %v1440_v2 = vadd.f32 0.05243302, %v1439_v13  ;;  %2280 = vadd.xlane.f32.xlu1 %v2279_v63  ;;  %v3501_v26 = vclamps-f32 %v1350_v17, 1.0  ;;  %v809_v55 = vpop.f32.mrf.mxu2 }
 0x1e5   :  { %v1379_v39 = vmul.f32 %v4719_v24, %v1378_v23  ;;  %3650 = vrcp.f32 %v4737_v22  ;;  %vm1382_vm15 = vweird.f32 %v4719_v24  ;;  %v1385_v61 = vand.u32 2147483647, %v4691_v47 }
 0x1e6   :  { %v1452_v8 = vmul.f32 %v1451_v36, %v4686_v19  ;;  %v4755_v58 = vmin.f32 %v1473_v1, 16.0  ;;  %v2361_v34 = vmul.f32 %v4731_v6, %v4731_v6  ;;  %v4760_v12 = vmul.f32 0.70710677, %v4740_v37 }
 0x1e7   :  { %v1380_v38 = vadd.f32 %v4719_v24, %v1379_v39  ;;  %vm1381_vm0 = vweird.f32 %v4691_v47  ;;  %v1387_v52 = vand.u32 2147483648, %v4691_v47  ;;  %v1403_v31 = vmul.f32 %v1402_v27, %v4647_v29 }
 0x1e8   :  { %v1453_v32 = vadd.f32 0.4994258, %v1452_v8  ;;  %v1441_v57 = vmul.f32 %v1440_v2, %v4686_v19  ;;  %v1475_v50 = vmul.f32 2.1237322e-06, %v4755_v58  ;;  %v1486_v44 = vmul.f32 3.8918573e-05, %v4755_v58  ;;  %vm4771_vm1 = vmor %vm1381_vm0, %vm1382_vm15 }
 0x1e9   :  { %v2407_v30 = vsel %vm2257_vm13, %v2361_v34, 0.0  ;;  %v1364_v18 = vadd.f32 1.1283791, %v1363_v25  ;;  %v2282_v29 = vsel %vm2257_vm13, %v4722_v49, 0.0  ;;  %v1513_v3 = vmul.f32 %v4760_v12, %v4760_v12 }
 0x1ea   :  { %v1454_v47 = vmul.f32 %v1453_v32, %v4686_v19  ;;  %2408 = vadd.xlane.f32.xlu0 %v2407_v30  ;;  %v2203_v51 = vadd.f32 1.0, %v3501_v26  ;;  %v1384_v11 = vsel %vm4771_vm1, %v4719_v24, %v1380_v38  ;;  %vm1386_vm2 = vcmp.eq.f32.partialorder %v1385_v61, 8.507059e+37 }
 0x1eb   :  { %v3651_v33 = vpop.eup %3650  ;;  %v1487_v43 = vadd.f32 0.001143296, %v1486_v44  ;;  %v1388_v46 = vor.u32 1.1754944e-38, %v1387_v52  ;;  %v1476_v42 = vadd.f32 0.00028619796, %v1475_v50  ;;  %v4787_v13 = vmin.f32 %v1513_v3, 16.0 }
 0x1ec   :  { %v1417_v62 = vmul.f32 %v3651_v33, %v4737_v22  ;;  %v4784_v5 = vadd.f32 1.0, %v1454_v47  ;;  %v1404_v17 = vadd.f32 1.1283791, %v1403_v31  ;;  %v1442_v14 = vadd.f32 0.18741608, %v1441_v57  ;;  %2283 = vadd.xlane.f32.xlu1 %v2282_v29 }
 0x1ed   :  { %v1488_v45 = vmul.f32 %v1487_v43, %v4755_v58  ;;  %v1365_v25 = vmul.f32 %v1364_v18, %v4527_v4  ;;  %v1389_v23 = vsel %vm1386_vm2, %v1388_v46, %v1384_v11  ;;  %v4792_v27 = vmul.f32 %v2203_v51, %v4544_v9 }
 0x1ee   :  { %v1418_v24 = vsub.f32 1.0, %v1417_v62  ;;  %3652 = vrcp.f32 %v4784_v5  ;;  %vm1422_vm3 = vweird.f32 %v3651_v33  ;;  %v1425_v36 = vand.u32 2147483647, %v4737_v22 }
 0x1ef   :  { %6676 = vst [vmem:[#allocation12_spill] sm:$0xff] %v4792_v27  ;;  %v2362_v63 = vmul.f32 %v4722_v49, %v4722_v49  ;;  %v1477_v39 = vmul.f32 %v1476_v42, %v4755_v58  ;;  %v1489_v2 = vadd.f32 0.014752088, %v1488_v45  ;;  %v1526_v26 = vmul.f32 3.8918573e-05, %v4787_v13 }
 0x1f0   :  { %v1419_v1 = vmul.f32 %v3651_v33, %v1418_v24  ;;  %v1390_v4 = vmul.f32 %v1389_v23, %v1365_v25  ;;  %v1405_v61 = vmul.f32 %v1404_v17, %v4624_v54  ;;  %v1427_v8 = vand.u32 2147483648, %v4737_v22  ;;  %v811_v17 = vpop.f32.mrf.mxu2 }
 0x1f1   :  { %v1443_v9 = vmul.f32 %v1442_v14, %v4686_v19  ;;  %vm1421_vm4 = vweird.f32 %v4737_v22  ;;  %v1490_v34 = vmul.f32 %v1489_v2, %v4755_v58  ;;  %v1527_v52 = vadd.f32 0.001143296, %v1526_v26 }
 0x1f2   :  { %v1420_v38 = vadd.f32 %v3651_v33, %v1419_v1  ;;  %vm4805_vm5 = vmor %vm1421_vm4, %vm1422_vm3  ;;  %vm4809_vm6 = vcmp.eq.f32.partialorder %v1425_v36, 8.507059e+37  ;;  %v2410_v54 = vsel %vm2257_vm13, %v2362_v63, 0.0  ;;  %v2285_v19 = vsel %vm2257_vm13, %v4747_v20, 0.0 }
 0x1f3   :  { %v4817_v57 = vadd.f32 %v4590_v40, %v809_v55  ;;  %v1478_v44 = vadd.f32 0.0036580483, %v1477_v39  ;;  %v1491_v30 = vadd.f32 0.112945676, %v1490_v34  ;;  %v1528_v18 = vmul.f32 %v1527_v52, %v4787_v13  ;;  %2411 = vadd.xlane.f32.xlu0 %v2410_v54  ;;  %2286 = vadd.xlane.f32.xlu2 %v2285_v19 }
 0x1f4   :  { %v3653_v22 = vpop.eup %3652  ;;  %v1424_v50 = vsel %vm4805_vm5, %v3651_v33, %v1420_v38  ;;  %v3502_v60 = vclamps-f32 %v1390_v4, 1.0  ;;  %v1428_v47 = vor.u32 1.1754944e-38, %v1427_v8  ;;  %v1444_v29 = vadd.f32 1.1283791, %v1443_v9 }
 0x1f5   :  { %v1457_v3 = vmul.f32 %v3653_v22, %v4784_v5  ;;  %vm1461_vm7 = vweird.f32 %v4784_v5  ;;  %v1492_v51 = vmul.f32 %v1491_v30, %v4755_v58  ;;  %v1515_v11 = vmul.f32 2.1237322e-06, %v4787_v13 }
 0x1f6   :  { %v1529_v43 = vadd.f32 0.014752088, %v1528_v18  ;;  %v1429_v33 = vsel %vm4809_vm6, %v1428_v47, %v1424_v50  ;;  %v1465_v62 = vand.u32 2147483647, %v4784_v5  ;;  %v4830_v42 = vmul.f32 0.70710677, %v4817_v57 }
 0x1f7   :  { %v1458_v46 = vsub.f32 1.0, %v1457_v3  ;;  %v1467_v14 = vand.u32 2147483648, %v4784_v5  ;;  %v1479_v45 = vmul.f32 %v1478_v44, %v4755_v58  ;;  %v1493_v55 = vadd.f32 0.4994258, %v1492_v51 }
 0x1f8   :  { %v1530_v25 = vmul.f32 %v1529_v43, %v4787_v13  ;;  %vm1462_vm8 = vweird.f32 %v3653_v22  ;;  %v1553_v24 = vmul.f32 %v4830_v42, %v4830_v42  ;;  %v2363_v36 = vmul.f32 %v4747_v20, %v4747_v20  ;;  %v814_v3 = vpop.f32.mrf.mxu2 }
 0x1f9   :  { %v1459_v23 = vmul.f32 %v3653_v22, %v1458_v46  ;;  %v1430_v63 = vmul.f32 %v1429_v33, %v1405_v61  ;;  %v1494_v1 = vmul.f32 %v1493_v55, %v4755_v58  ;;  %v1516_v39 = vadd.f32 0.00028619796, %v1515_v11  ;;  %vm1463_vm9 = vmor %vm1461_vm7, %vm1462_vm8 }
 0x1fa   :  { %v1531_v2 = vadd.f32 0.112945676, %v1530_v25  ;;  %v2204_v26 = vadd.f32 1.0, %v3502_v60  ;;  %v4840_v8 = vmin.f32 %v1553_v24, 16.0  ;;  %v2413_v9 = vsel %vm2257_vm13, %v2363_v36, 0.0 }
 0x1fb   :  { %v1460_v4 = vadd.f32 %v3653_v22, %v1459_v23  ;;  %v1445_v38 = vmul.f32 %v1444_v29, %v4674_v16  ;;  %v1468_v34 = vor.u32 1.1754944e-38, %v1467_v14  ;;  %v4846_v52 = vadd.f32 1.0, %v1494_v1  ;;  %2414 = vadd.xlane.f32.xlu1 %v2413_v9 }
 0x1fc   :  { %v1532_v61 = vmul.f32 %v1531_v2, %v4787_v13  ;;  %vm1466_vm10 = vcmp.eq.f32.partialorder %v1465_v62, 8.507059e+37  ;;  %v1480_v32 = vadd.f32 0.05243302, %v1479_v45  ;;  %v1566_v54 = vmul.f32 3.8918573e-05, %v4840_v8 }
 0x1fd   :  { %v1464_v31 = vsel %vm1463_vm9, %v3653_v22, %v1460_v4  ;;  %v3503_v19 = vclamps-f32 %v1430_v63, 1.0  ;;  %3654 = vrcp.f32 %v4846_v52  ;;  %v1517_v16 = vmul.f32 %v1516_v39, %v4787_v13 }
 0x1fe   :  { %v1469_v50 = vsel %vm1466_vm10, %v1468_v34, %v1464_v31  ;;  %v4853_v5 = vmul.f32 %v2204_v26, %v4616_v41  ;;  %v1533_v30 = vadd.f32 0.4994258, %v1532_v61  ;;  %v1567_v18 = vadd.f32 0.001143296, %v1566_v54 }
 0x1ff   :  { %v1470_v44 = vmul.f32 %v1469_v50, %v1445_v38  ;;  %v2288_v60 = vsel %vm2257_vm13, %v4792_v27, 0.0  ;;  %v1481_v47 = vmul.f32 %v1480_v32, %v4755_v58  ;;  %v2205_v51 = vadd.f32 1.0, %v3503_v19 }
 0x200   :  { %6681 = vst [vmem:[#allocation13_spill] sm:$0xff] %v4853_v5  ;;  %v1534_v29 = vmul.f32 %v1533_v30, %v4787_v13  ;;  %2289 = vadd.xlane.f32.xlu2 %v2288_v60  ;;  %v1518_v11 = vadd.f32 0.0036580483, %v1517_v16  ;;  %v1568_v43 = vmul.f32 %v1567_v18, %v4840_v8  ;;  %v2364_v41 = vmul.f32 %v4792_v27, %v4792_v27  ;;  %v816_v18 = vpop.f32.mrf.mxu2 }
 0x201   :  { %v3504_v22 = vclamps-f32 %v1470_v44, 1.0  ;;  %v861_v33 = vmul.f32 0.5, %v4593_v0  ;;  %v1555_v46 = vmul.f32 2.1237322e-06, %v4840_v8  ;;  %v4865_v62 = vadd.f32 %v4590_v40, %v811_v17 }
 0x202   :  { %v2291_v14 = vsel %vm2257_vm13, %v4853_v5, 0.0  ;;  %v4871_v25 = vadd.f32 1.0, %v1534_v29  ;;  %v1569_v23 = vadd.f32 0.014752088, %v1568_v43  ;;  %v2416_v24 = vsel %vm2257_vm13, %v2364_v41, 0.0 }
 0x203   :  { %v4869_v45 = vpop.eup %3654  ;;  %v2206_v55 = vadd.f32 1.0, %v3504_v22  ;;  %2292 = vadd.xlane.f32.xlu0 %v2291_v14  ;;  %v1482_v36 = vadd.f32 0.18741608, %v1481_v47  ;;  %2417 = vadd.xlane.f32.xlu1 %v2416_v24  ;;  %v4876_v63 = vmul.f32 %v2205_v51, %v861_v33  ;;  %v862_v17 = vmul.f32 0.5, %v4653_v21 }
 0x204   :  { %v1497_v0 = vmul.f32 %v4869_v45, %v4846_v52  ;;  %v1519_v1 = vmul.f32 %v1518_v11, %v4787_v13  ;;  %v1556_v2 = vadd.f32 0.00028619796, %v1555_v46  ;;  %v1570_v26 = vmul.f32 %v1569_v23, %v4840_v8 }
 0x205   :  { %6682 = vst [vmem:[#allocation14_spill] sm:$0xff] %v4876_v63  ;;  %v4882_v4 = vmul.f32 0.70710677, %v4865_v62  ;;  %v4884_v9 = vmul.f32 %v2206_v55, %v862_v17  ;;  %3656 = vrcp.f32 %v4871_v25  ;;  %v4888_v38 = vadd.f32 %v4590_v40, %v814_v3 }
 0x206   :  { %v1498_v39 = vsub.f32 1.0, %v1497_v0  ;;  %v2365_v34 = vmul.f32 %v4853_v5, %v4853_v5  ;;  %v1483_v21 = vmul.f32 %v1482_v36, %v4755_v58  ;;  %v1571_v31 = vadd.f32 0.112945676, %v1570_v26 }
 0x207   :  { %6683 = vst [vmem:[#allocation15_spill] sm:$0xff] %v4884_v9  ;;  %v1593_v32 = vmul.f32 %v4882_v4, %v4882_v4  ;;  %v1520_v54 = vadd.f32 0.05243302, %v1519_v1  ;;  %v4897_v19 = vmul.f32 0.70710677, %v4888_v38  ;;  %v2294_v16 = vsel %vm2257_vm13, %v4876_v63, 0.0 }
 0x208   :  { %v1499_v61 = vmul.f32 %v4869_v45, %v1498_v39  ;;  %v2419_v50 = vsel %vm2257_vm13, %v2365_v34, 0.0  ;;  %v1557_v44 = vmul.f32 %v1556_v2, %v4840_v8  ;;  %v1572_v30 = vmul.f32 %v1571_v31, %v4840_v8 }
 0x209   :  { %v4904_v58 = vmin.f32 %v1593_v32, 16.0  ;;  %2420 = vadd.xlane.f32.xlu2 %v2419_v50  ;;  %v1633_v60 = vmul.f32 %v4897_v19, %v4897_v19  ;;  %v2297_v22 = vsel %vm2257_vm13, %v4884_v9, 0.0  ;;  %v1484_v47 = vadd.f32 1.1283791, %v1483_v21 }
 0x20a   :  { %v1500_v29 = vadd.f32 %v4869_v45, %v1499_v61  ;;  %vm1502_vm11 = vweird.f32 %v4869_v45  ;;  %v1507_v51 = vand.u32 2147483648, %v4846_v52  ;;  %v1521_v11 = vmul.f32 %v1520_v54, %v4787_v13 }
 0x20b   :  { %2295 = vadd.xlane.f32.xlu0 %v2294_v16  ;;  %2298 = vadd.xlane.f32.xlu1 %v2297_v22  ;;  %v4912_v3 = vpop.eup %3656  ;;  %v1573_v43 = vadd.f32 0.4994258, %v1572_v30  ;;  %v1606_v41 = vmul.f32 3.8918573e-05, %v4904_v58  ;;  %vm1501_vm12 = vweird.f32 %v4846_v52  ;;  %v1505_v33 = vand.u32 2147483647, %v4846_v52 }
 0x20c   :  { %v1558_v46 = vadd.f32 0.0036580483, %v1557_v44  ;;  %v4919_v14 = vmin.f32 %v1633_v60, 16.0  ;;  %vm1503_vm14 = vmor %vm1501_vm12, %vm1502_vm11  ;;  %v1595_v23 = vmul.f32 2.1237322e-06, %v4904_v58  ;;  %v1537_v0 = vmul.f32 %v4912_v3, %v4871_v25 }
 0x20d   :  { %v1574_v55 = vmul.f32 %v1573_v43, %v4840_v8  ;;  %v1607_v24 = vadd.f32 0.001143296, %v1606_v41  ;;  %v1504_v36 = vsel %vm1503_vm14, %v4869_v45, %v1500_v29  ;;  %v1508_v17 = vor.u32 1.1754944e-38, %v1507_v51 }
 0x20e   :  { %v1522_v1 = vadd.f32 0.18741608, %v1521_v11  ;;  %v1485_v2 = vmul.f32 %v1484_v47, %v4734_v56  ;;  %vm1506_vm15 = vcmp.eq.f32.partialorder %v1505_v33, 8.507059e+37  ;;  %v1559_v26 = vmul.f32 %v1558_v46, %v4840_v8  ;;  %v819_v56 = vpop.f32.mrf.mxu2 }
 0x20f   :  { %v4926_v39 = vadd.f32 1.0, %v1574_v55  ;;  %v1608_v52 = vmul.f32 %v1607_v24, %v4904_v58  ;;  %v1646_v34 = vmul.f32 3.8918573e-05, %v4919_v14  ;;  %v1509_v21 = vsel %vm1506_vm15, %v1508_v17, %v1504_v36 }
 0x210   :  { %v1596_v61 = vadd.f32 0.00028619796, %v1595_v23  ;;  %v4933_v45 = vadd.f32 %v4590_v40, %v816_v18  ;;  %v2366_v31 = vmul.f32 %v4876_v63, %v4876_v63  ;;  %v1538_v32 = vsub.f32 1.0, %v1537_v0 }
 0x211   :  { %3658 = vrcp.f32 %v4926_v39  ;;  %v1609_v54 = vadd.f32 0.014752088, %v1608_v52  ;;  %v1635_v50 = vmul.f32 2.1237322e-06, %v4919_v14  ;;  %v1523_v16 = vmul.f32 %v1522_v1, %v4787_v13 }
 0x212   :  { %v1510_v44 = vmul.f32 %v1509_v21, %v1485_v2  ;;  %v1560_v30 = vadd.f32 0.05243302, %v1559_v26  ;;  %v1647_v22 = vadd.f32 0.001143296, %v1646_v34  ;;  %v1597_v18 = vmul.f32 %v1596_v61, %v4904_v58 }
 0x213   :  { %v1610_v60 = vmul.f32 %v1609_v54, %v4904_v58  ;;  %v4943_v47 = vmul.f32 0.70710677, %v4933_v45  ;;  %v2422_v29 = vsel %vm2257_vm13, %v2366_v31, 0.0  ;;  %v4947_v51 = vadd.f32 %v4590_v40, %v819_v56 }
 0x214   :  { %v1539_v11 = vmul.f32 %v4912_v3, %v1538_v32  ;;  %v1636_v41 = vadd.f32 0.00028619796, %v1635_v50  ;;  %v1648_v13 = vmul.f32 %v1647_v22, %v4919_v14  ;;  %2423 = vadd.xlane.f32.xlu2 %v2422_v29  ;;  %v863_v33 = vmul.f32 0.5, %v4716_v10 }
 0x215   :  { %v1611_v43 = vadd.f32 0.112945676, %v1610_v60  ;;  %v1524_v46 = vadd.f32 1.1283791, %v1523_v16  ;;  %v1673_v55 = vmul.f32 %v4943_v47, %v4943_v47  ;;  %v4955_v23 = vmul.f32 0.70710677, %v4947_v51 }
 0x216   :  { %v3505_v36 = vclamps-f32 %v1510_v44, 1.0  ;;  %vm1541_vm0 = vweird.f32 %v4871_v25  ;;  %v1547_v0 = vand.u32 2147483648, %v4871_v25  ;;  %v1561_v17 = vmul.f32 %v1560_v30, %v4840_v8 }
 0x217   :  { %v4957_v24 = vpop.eup %3658  ;;  %v1598_v1 = vadd.f32 0.0036580483, %v1597_v18  ;;  %v1612_v52 = vmul.f32 %v1611_v43, %v4904_v58  ;;  %v1649_v10 = vadd.f32 0.014752088, %v1648_v13  ;;  %v4963_v2 = vmin.f32 %v1673_v55, 16.0 }
 0x218   :  { %v1540_v26 = vadd.f32 %v4912_v3, %v1539_v11  ;;  %vm1542_vm1 = vweird.f32 %v4912_v3  ;;  %v1637_v34 = vmul.f32 %v1636_v41, %v4919_v14  ;;  %v1713_v21 = vmul.f32 %v4955_v23, %v4955_v23 }
 0x219   :  { %v1577_v61 = vmul.f32 %v4957_v24, %v4926_v39  ;;  %v1613_v31 = vadd.f32 0.4994258, %v1612_v52  ;;  %v1650_v32 = vmul.f32 %v1649_v10, %v4919_v14  ;;  %v1675_v54 = vmul.f32 2.1237322e-06, %v4963_v2  ;;  %vm4978_vm2 = vmor %vm1541_vm0, %vm1542_vm1 }
 0x21a   :  { %v2207_v50 = vadd.f32 1.0, %v3505_v36  ;;  %v1545_v56 = vand.u32 2147483647, %v4871_v25  ;;  %v1548_v16 = vor.u32 1.1754944e-38, %v1547_v0  ;;  %v1686_v44 = vmul.f32 3.8918573e-05, %v4963_v2 }
 0x21b   :  { %v1599_v60 = vmul.f32 %v1598_v1, %v4904_v58  ;;  %v1614_v22 = vmul.f32 %v1613_v31, %v4904_v58  ;;  %v1651_v18 = vadd.f32 0.112945676, %v1650_v32  ;;  %v4984_v29 = vmin.f32 %v1713_v21, 16.0 }
 0x21c   :  { %v1544_v11 = vsel %vm4978_vm2, %v4912_v3, %v1540_v26  ;;  %v1638_v43 = vadd.f32 0.0036580483, %v1637_v34  ;;  %v1676_v41 = vadd.f32 0.00028619796, %v1675_v54  ;;  %v1687_v13 = vadd.f32 0.001143296, %v1686_v44 }
 0x21d   :  { %v1562_v55 = vadd.f32 0.18741608, %v1561_v17  ;;  %v1578_v25 = vsub.f32 1.0, %v1577_v61  ;;  %v4989_v36 = vadd.f32 1.0, %v1614_v22  ;;  %v1652_v0 = vmul.f32 %v1651_v18, %v4919_v14 }
 0x21e   :  { %v4993_v1 = vmul.f32 0.5, %v4740_v37  ;;  %v1525_v52 = vmul.f32 %v1524_v46, %v4760_v12  ;;  %vm1546_vm3 = vcmp.eq.f32.partialorder %v1545_v56, 8.507059e+37  ;;  %v1688_v10 = vmul.f32 %v1687_v13, %v4963_v2 }
 0x21f   :  { %v1549_v21 = vsel %vm1546_vm3, %v1548_v16, %v1544_v11  ;;  %v1600_v31 = vadd.f32 0.05243302, %v1599_v60  ;;  %3660 = vrcp.f32 %v4989_v36  ;;  %v1715_v3 = vmul.f32 2.1237322e-06, %v4984_v29 }
 0x220   :  { %v4999_v17 = vmul.f32 %v2207_v50, %v863_v33  ;;  %v1639_v26 = vmul.f32 %v1638_v43, %v4919_v14  ;;  %v1653_v34 = vadd.f32 0.4994258, %v1652_v0  ;;  %v1677_v61 = vmul.f32 %v1676_v41, %v4963_v2 }
 0x221   :  { %v5004_v37 = vmul.f32 0.5, %v4817_v57  ;;  %v1563_v12 = vmul.f32 %v1562_v55, %v4840_v8  ;;  %v1579_v46 = vmul.f32 %v4957_v24, %v1578_v25  ;;  %v1689_v32 = vadd.f32 0.014752088, %v1688_v10 }
 0x222   :  { %6686 = vst [vmem:[#allocation16_spill] sm:$0xff] %v4999_v17  ;;  %v1550_v54 = vmul.f32 %v1549_v21, %v1525_v52  ;;  %vm1582_vm4 = vweird.f32 %v4957_v24  ;;  %v1585_v56 = vand.u32 2147483647, %v4926_v39  ;;  %v1654_v33 = vmul.f32 %v1653_v34, %v4919_v14 }
 0x223   :  { %v1601_v50 = vmul.f32 %v1600_v31, %v4904_v58  ;;  %v1690_v16 = vmul.f32 %v1689_v32, %v4963_v2  ;;  %v1716_v44 = vadd.f32 0.00028619796, %v1715_v3  ;;  %v1726_v57 = vmul.f32 3.8918573e-05, %v4984_v29 }
 0x224   :  { %v1640_v30 = vadd.f32 0.05243302, %v1639_v26  ;;  %v5014_v60 = vadd.f32 1.0, %v1654_v33  ;;  %v1678_v8 = vadd.f32 0.0036580483, %v1677_v61  ;;  %v2300_v22 = vsel %vm2257_vm13, %v4999_v17, 0.0  ;;  %v821_v61 = vpop.f32.mrf.mxu2 }
 0x225   :  { %v5018_v18 = vpop.eup %3660  ;;  %v1580_v11 = vadd.f32 %v4957_v24, %v1579_v46  ;;  %v1691_v43 = vadd.f32 0.112945676, %v1690_v16  ;;  %v1727_v41 = vadd.f32 0.001143296, %v1726_v57  ;;  %v2367_v13 = vmul.f32 %v4884_v9, %v4884_v9  ;;  %2301 = vadd.xlane.f32.xlu1 %v2300_v22 }
 0x226   :  { %v1587_v55 = vand.u32 2147483648, %v4926_v39  ;;  %v5025_v25 = vmul.f32 0.5, %v4865_v62  ;;  %v1617_v0 = vmul.f32 %v5018_v18, %v4989_v36  ;;  %3662 = vrcp.f32 %v5014_v60 }
 0x227   :  { %v3506_v52 = vclamps-f32 %v1550_v54, 1.0  ;;  %vm1581_vm5 = vweird.f32 %v4926_v39  ;;  %v1602_v10 = vadd.f32 0.18741608, %v1601_v50  ;;  %v1717_v21 = vmul.f32 %v1716_v44, %v4984_v29 }
 0x228   :  { %v1564_v31 = vadd.f32 1.1283791, %v1563_v12  ;;  %vm5034_vm6 = vmor %vm1581_vm5, %vm1582_vm4  ;;  %v1679_v62 = vmul.f32 %v1678_v8, %v4963_v2  ;;  %v1692_v26 = vmul.f32 %v1691_v43, %v4963_v2  ;;  %v1728_v34 = vmul.f32 %v1727_v41, %v4984_v29 }
 0x229   :  { %v1584_v39 = vsel %vm5034_vm6, %v4957_v24, %v1580_v11  ;;  %vm1586_vm7 = vcmp.eq.f32.partialorder %v1585_v56, 8.507059e+37  ;;  %v1641_v12 = vmul.f32 %v1640_v30, %v4919_v14  ;;  %v2425_v46 = vsel %vm2257_vm13, %v2367_v13, 0.0 }
 0x22a   :  { %v1588_v32 = vor.u32 1.1754944e-38, %v1587_v55  ;;  %v1618_v54 = vsub.f32 1.0, %v1617_v0  ;;  %v1693_v33 = vadd.f32 0.4994258, %v1692_v26  ;;  %v1729_v50 = vadd.f32 0.014752088, %v1728_v34  ;;  %2426 = vadd.xlane.f32.xlu0 %v2425_v46 }
 0x22b   :  { %v2208_v16 = vadd.f32 1.0, %v3506_v52  ;;  %v1603_v44 = vmul.f32 %v1602_v10, %v4904_v58  ;;  %v1718_v57 = vadd.f32 0.0036580483, %v1717_v21  ;;  %v5048_v8 = vadd.f32 %v4590_v40, %v821_v61 }
 0x22c   :  { %v5050_v22 = vpop.eup %3662  ;;  %v1589_v24 = vsel %vm1586_vm7, %v1588_v32, %v1584_v39  ;;  %v1680_v56 = vadd.f32 0.05243302, %v1679_v62  ;;  %v1694_v30 = vmul.f32 %v1693_v33, %v4963_v2  ;;  %v1730_v11 = vmul.f32 %v1729_v50, %v4984_v29 }
 0x22d   :  { %v1565_v43 = vmul.f32 %v1564_v31, %v4830_v42  ;;  %v5056_v41 = vmul.f32 0.5, %v4888_v38  ;;  %v1642_v13 = vadd.f32 0.18741608, %v1641_v12  ;;  %v1657_v58 = vmul.f32 %v5050_v22, %v5014_v60 }
 0x22e   :  { %v1619_v40 = vmul.f32 %v5018_v18, %v1618_v54  ;;  %v5061_v55 = vadd.f32 1.0, %v1694_v30  ;;  %v1731_v0 = vadd.f32 0.112945676, %v1730_v11  ;;  %v2368_v52 = vmul.f32 %v4999_v17, %v4999_v17 }
 0x22f   :  { %v1590_v10 = vmul.f32 %v1589_v24, %v1565_v43  ;;  %v5066_v21 = vmul.f32 0.5, %v4933_v45  ;;  %v1719_v42 = vmul.f32 %v1718_v57, %v4984_v29  ;;  %v5070_v38 = vmul.f32 0.70710677, %v5048_v8 }
 0x230   :  { %v5073_v31 = vmul.f32 %v2208_v16, %v4993_v1  ;;  %v1604_v3 = vadd.f32 1.1283791, %v1603_v44  ;;  %v1681_v62 = vmul.f32 %v1680_v56, %v4963_v2  ;;  %3664 = vrcp.f32 %v5061_v55 }
 0x231   :  { %v1625_v26 = vand.u32 2147483647, %v4989_v36  ;;  %v1643_v34 = vmul.f32 %v1642_v13, %v4919_v14  ;;  %v1658_v61 = vsub.f32 1.0, %v1657_v58  ;;  %v1732_v45 = vmul.f32 %v1731_v0, %v4984_v29  ;;  %v2260_v13 = vpop.xlane.xlu0 %2259 }
 0x232   :  { %6689 = vst [vmem:[#allocation17_spill] sm:$0xff] %v5073_v31  ;;  %v1620_v39 = vadd.f32 %v5018_v18, %v1619_v40  ;;  %vm1622_vm8 = vweird.f32 %v5018_v18  ;;  %v1753_v1 = vmul.f32 %v5070_v38, %v5070_v38  ;;  %v2428_v12 = vsel %vm2257_vm13, %v2368_v52, 0.0  ;;  %v824_v52 = vpop.f32.mrf.mxu2 }
 0x233   :  { %v3507_v46 = vclamps-f32 %v1590_v10, 1.0  ;;  %v1627_v32 = vand.u32 2147483648, %v4989_v36  ;;  %v1720_v54 = vadd.f32 0.05243302, %v1719_v42  ;;  %v1733_v33 = vadd.f32 0.4994258, %v1732_v45  ;;  %2429 = vadd.xlane.f32.xlu0 %v2428_v12 }
 0x234   :  { %vm1621_vm9 = vweird.f32 %v4989_v36  ;;  %v1682_v14 = vadd.f32 0.18741608, %v1681_v62  ;;  %v5088_v50 = vmul.f32 0.5, %v4947_v51  ;;  %v5090_v16 = vmin.f32 %v1753_v1, 16.0  ;;  %v2388_v1 = vpop.xlane.xlu1 %2387 }
 0x235   :  { %v1605_v44 = vmul.f32 %v1604_v3, %v4882_v4  ;;  %vm5093_vm10 = vmor %vm1621_vm9, %vm1622_vm8  ;;  %v1659_v24 = vmul.f32 %v5050_v22, %v1658_v61  ;;  %v1734_v56 = vmul.f32 %v1733_v33, %v4984_v29  ;;  %v2303_v30 = vsel %vm2257_vm13, %v5073_v31, 0.0 }
 0x236   :  { %v5101_v36 = vpop.eup %3664  ;;  %v1624_v51 = vsel %vm5093_vm10, %v5018_v18, %v1620_v39  ;;  %v1644_v11 = vadd.f32 1.1283791, %v1643_v34  ;;  %v1755_v4 = vmul.f32 2.1237322e-06, %v5090_v16  ;;  %v1766_v43 = vmul.f32 3.8918573e-05, %v5090_v16  ;;  %2304 = vadd.xlane.f32.xlu2 %v2303_v30 }
 0x237   :  { %v2209_v58 = vadd.f32 1.0, %v3507_v46  ;;  %vm1626_vm11 = vcmp.eq.f32.partialorder %v1625_v26, 8.507059e+37  ;;  %v1628_v40 = vor.u32 1.1754944e-38, %v1627_v32  ;;  %v1721_v0 = vmul.f32 %v1720_v54, %v4984_v29 }
 0x238   :  { %v1665_v10 = vand.u32 2147483647, %v5014_v60  ;;  %v1683_v42 = vmul.f32 %v1682_v14, %v4963_v2  ;;  %v5111_v3 = vadd.f32 1.0, %v1734_v56  ;;  %v1767_v18 = vadd.f32 0.001143296, %v1766_v43 }
 0x239   :  { %v1629_v62 = vsel %vm1626_vm11, %v1628_v40, %v1624_v51  ;;  %v1660_v34 = vadd.f32 %v5050_v22, %v1659_v24  ;;  %vm1662_vm12 = vweird.f32 %v5050_v22  ;;  %v1697_v61 = vmul.f32 %v5101_v36, %v5061_v55  ;;  %v5122_v2 = vld [vmem:[%s6621_s5] ss:$0 sm:$0xff] }
 0x23a   :  { %v1645_v26 = vmul.f32 %v1644_v11, %v4897_v19  ;;  %v1756_v45 = vadd.f32 0.00028619796, %v1755_v4  ;;  %v1768_v39 = vmul.f32 %v1767_v18, %v5090_v16  ;;  %v5125_v12 = vadd.f32 %v5122_v2, %v824_v52 }
 0x23b   :  { %v5128_v46 = vmul.f32 %v2209_v58, %v5004_v37  ;;  %vm1661_vm14 = vweird.f32 %v5014_v60  ;;  %v1667_v32 = vand.u32 2147483648, %v5014_v60  ;;  %v1722_v19 = vadd.f32 0.18741608, %v1721_v0 }
 0x23c   :  { %v1630_v54 = vmul.f32 %v1629_v62, %v1605_v44  ;;  %vm5132_vm15 = vmor %vm1661_vm14, %vm1662_vm12  ;;  %3666 = vrcp.f32 %v5111_v3  ;;  %v1769_v14 = vadd.f32 0.014752088, %v1768_v39  ;;  %v5137_v57 = vmul.f32 0.015625, %v2260_v13 }
 0x23d   :  { %6692 = vst [vmem:[#allocation18_spill] sm:$0xff] %v5128_v46  ;;  %v1664_v37 = vsel %vm5132_vm15, %v5050_v22, %v1660_v34  ;;  %vm5142_vm0 = vcmp.eq.f32.partialorder %v1665_v10, 8.507059e+37  ;;  %v1684_v60 = vadd.f32 1.1283791, %v1683_v42  ;;  %v1698_v56 = vsub.f32 1.0, %v1697_v61  ;;  %v3614_v22 = vld [vmem:[%s6622_s6 + $0x18] sm:$0xff]  ;;  %v2263_v42 = vpop.xlane.xlu0 %2262 }
 0x23e   :  { %v1757_v44 = vmul.f32 %v1756_v45, %v5090_v16  ;;  %v1770_v30 = vmul.f32 %v1769_v14, %v5090_v16  ;;  %v5149_v51 = vmul.f32 0.70710677, %v5125_v12  ;;  %v2369_v11 = vmul.f32 %v5073_v31, %v5073_v31  ;;  %3130 = vmatpush.bf16.msra.mxu3 %v3614_v22  ;;  %v3613_v22 = vld [vmem:[%s6622_s6 + $0x10] sm:$0xff] }
 0x23f   :  { %v1668_v4 = vor.u32 1.1754944e-38, %v1667_v32  ;;  %v1705_v43 = vand.u32 2147483647, %v5061_v55  ;;  %v1723_v13 = vmul.f32 %v1722_v19, %v4984_v29  ;;  %v2306_v58 = vsel %vm2257_vm13, %v5128_v46, 0.0 }
 0x240   :  { %v3508_v40 = vclamps-f32 %v1630_v54, 1.0  ;;  %v1707_v0 = vand.u32 2147483648, %v5061_v55  ;;  %v2546_v52 = vmul.f32 %v5137_v57, %v5137_v57  ;;  %v2514_v10 = vmul.f32 0.015625, %v2388_v1  ;;  %2307 = vadd.xlane.f32.xlu2 %v2306_v58 }
 0x241   :  { %v1669_v18 = vsel %vm5142_vm0, %v1668_v4, %v1664_v37  ;;  %v1771_v62 = vadd.f32 0.112945676, %v1770_v30  ;;  %v1793_v29 = vmul.f32 %v5149_v51, %v5149_v51  ;;  %v2431_v34 = vsel %vm2257_vm13, %v2369_v11, 0.0 }
 0x242   :  { %v5168_v61 = vpop.eup %3666  ;;  %v5171_v45 = vmul.f32 %v1684_v60, %v4943_v47  ;;  %v1699_v39 = vmul.f32 %v5101_v36, %v1698_v56  ;;  %v5175_v1 = vmul.f32 0.5, %v5048_v8  ;;  %v1758_v32 = vadd.f32 0.0036580483, %v1757_v44  ;;  %2432 = vadd.xlane.f32.xlu1 %v2431_v34  ;;  %v2391_v60 = vpop.xlane.xlu1 %2390  ;;  %3131 = vmatpush.bf16.msra.mxu3 %v3613_v22 }
 0x243   :  { %vm1701_vm1 = vweird.f32 %v5061_v55  ;;  %v1772_v19 = vmul.f32 %v1771_v62, %v5090_v16  ;;  %v5179_v54 = vmin.f32 %v1793_v29, 16.0  ;;  %v5181_v33 = vmul.f32 0.015625, %v2263_v42 }
 0x244   :  { %v2210_v14 = vadd.f32 1.0, %v3508_v40  ;;  %v1670_v37 = vmul.f32 %v1669_v18, %v1645_v26  ;;  %v1708_v24 = vor.u32 1.1754944e-38, %v1707_v0  ;;  %v1724_v47 = vadd.f32 1.1283791, %v1723_v13  ;;  %v826_v13 = vpop.f32.mrf.mxu2 }
 0x245   :  { %vm5183_vm2 = vcmp.eq.f32.partialorder %v1705_v43, 8.507059e+37  ;;  %v1737_v8 = vmul.f32 %v5168_v61, %v5111_v3  ;;  %v1773_v44 = vadd.f32 0.4994258, %v1772_v19  ;;  %v2578_v30 = vsub.f32 %v2514_v10, %v2546_v52 }
 0x246   :  { %v1795_v11 = vmul.f32 2.1237322e-06, %v5179_v54  ;;  %v1700_v26 = vadd.f32 %v5101_v36, %v1699_v39  ;;  %vm1702_vm3 = vweird.f32 %v5101_v36  ;;  %v1759_v4 = vmul.f32 %v1758_v32, %v5090_v16 }
 0x247   :  { %v1806_v43 = vmul.f32 3.8918573e-05, %v5179_v54  ;;  %v1774_v58 = vmul.f32 %v1773_v44, %v5090_v16  ;;  %v2547_v0 = vmul.f32 %v5181_v33, %v5181_v33  ;;  %v2515_v52 = vmul.f32 0.015625, %v2391_v60  ;;  %vm5219_vm4 = vmor %vm1701_vm1, %vm1702_vm3 }
 0x248   :  { %v1796_v40 = vadd.f32 0.00028619796, %v1795_v11  ;;  %v3509_v10 = vclamps-f32 %v1670_v37, 1.0  ;;  %v5201_v42 = vmul.f32 %v1724_v47, %v4955_v23  ;;  %v1738_v29 = vsub.f32 1.0, %v1737_v8  ;;  %v3612_v11 = vld [vmem:[%s6622_s6 + $0x8] sm:$0xff] }
 0x249   :  { %v1807_v62 = vadd.f32 0.001143296, %v1806_v43  ;;  %v5205_v34 = vadd.f32 1.0, %v1774_v58  ;;  %v5207_v39 = vadd.f32 1e-05, %v2578_v30  ;;  %v5210_v32 = vadd.f32 %v5122_v2, %v826_v13  ;;  %3132 = vmatpush.bf16.msra.mxu3 %v3612_v11 }
 0x24a   :  { %v5213_v19 = vmul.f32 %v2210_v14, %v5025_v25  ;;  %v1745_v37 = vand.u32 2147483647, %v5111_v3  ;;  %v1760_v47 = vadd.f32 0.05243302, %v1759_v4  ;;  %v1704_v8 = vsel %vm5219_vm4, %v5101_v36, %v1700_v26  ;;  %v2266_v4 = vpop.xlane.xlu2 %2265 }
 0x24b   :  { %v1808_v60 = vmul.f32 %v1807_v62, %v5179_v54  ;;  %3668 = vrcp.f32 %v5205_v34  ;;  %v1797_v25 = vmul.f32 %v1796_v40, %v5179_v54  ;;  %v2579_v14 = vsub.f32 %v2515_v52, %v2547_v0 }
 0x24c   :  { %6699 = vst [vmem:[#allocation19_spill] sm:$0xff] %v5213_v19  ;;  %v2211_v44 = vadd.f32 1.0, %v3509_v10  ;;  %vm1741_vm5 = vweird.f32 %v5111_v3  ;;  %v1747_v55 = vand.u32 2147483648, %v5111_v3  ;;  %v1739_v22 = vmul.f32 %v5168_v61, %v1738_v29  ;;  %v829_v11 = vpop.f32.mrf.mxu2 }
 0x24d   :  { %v1809_v30 = vadd.f32 0.014752088, %v1808_v60  ;;  %3670 = vrsqrt.f32 %v5207_v39  ;;  %v5238_v36 = vmul.f32 0.5, %v5125_v12  ;;  %v5241_v26 = vmul.f32 0.70710677, %v5210_v32 }
 0x24e   :  { %v1709_v43 = vsel %vm5183_vm2, %v1708_v24, %v1704_v8  ;;  %v1761_v13 = vmul.f32 %v1760_v47, %v5090_v16  ;;  %v2370_v40 = vmul.f32 %v5128_v46, %v5128_v46  ;;  %vm5249_vm6 = vcmp.eq.f32.partialorder %v1745_v37, 8.507059e+37 }
 0x24f   :  { %v1810_v58 = vmul.f32 %v1809_v30, %v5179_v54  ;;  %v1798_v12 = vadd.f32 0.0036580483, %v1797_v25  ;;  %v5253_v52 = vadd.f32 1e-05, %v2579_v14  ;;  %v1833_v10 = vmul.f32 %v5241_v26, %v5241_v26  ;;  %v2394_v25 = vpop.xlane.xlu0 %2393 }
 0x250   :  { %v2309_v24 = vsel %vm2257_vm13, %v5213_v19, 0.0  ;;  %v5260_v56 = vmul.f32 %v2211_v44, %v5056_v41  ;;  %v1748_v62 = vor.u32 1.1754944e-38, %v1747_v55  ;;  %v5262_v23 = vmul.f32 0.015625, %v2266_v4  ;;  %v3611_v41 = vld [vmem:[%s6622_s6] sm:$0xff] }
 0x251   :  { %v1811_v29 = vadd.f32 0.112945676, %v1810_v58  ;;  %2310 = vadd.xlane.f32.xlu0 %v2309_v24  ;;  %v5264_v37 = vpop.eup %3668  ;;  %v1740_v47 = vadd.f32 %v5168_v61, %v1739_v22  ;;  %vm1742_vm7 = vweird.f32 %v5168_v61  ;;  %v5268_v60 = vmin.f32 %v1833_v10, 16.0  ;;  %3133 = vmatpush.bf16.msra.mxu3 %v3611_v41 }
 0x252   :  { %6704 = vst [vmem:[#allocation20_spill] sm:$0xff] %v5260_v56  ;;  %v2434_v8 = vsel %vm2257_vm13, %v2370_v40, 0.0  ;;  %v1710_v14 = vmul.f32 %v1709_v43, %v5171_v45  ;;  %v1762_v44 = vadd.f32 0.18741608, %v1761_v13  ;;  %v1777_v55 = vmul.f32 %v5264_v37, %v5205_v34  ;;  %vm5288_vm8 = vmor %vm1741_vm5, %vm1742_vm7 }
 0x253   :  { %v1812_v30 = vmul.f32 %v1811_v29, %v5179_v54  ;;  %2435 = vadd.xlane.f32.xlu1 %v2434_v8  ;;  %v5278_v22 = vpop.eup %3670  ;;  %v1799_v4 = vmul.f32 %v1798_v12, %v5179_v54  ;;  %3672 = vrsqrt.f32 %v5253_v52  ;;  %v1835_v58 = vmul.f32 2.1237322e-06, %v5268_v60 }
 0x254   :  { %v1846_v40 = vmul.f32 3.8918573e-05, %v5268_v60  ;;  %v1778_v43 = vsub.f32 1.0, %v1777_v55  ;;  %v2548_v12 = vmul.f32 %v5262_v23, %v5262_v23  ;;  %v2516_v10 = vmul.f32 0.015625, %v2394_v25 }
 0x255   :  { %v1813_v13 = vadd.f32 0.4994258, %v1812_v30  ;;  %v1744_v24 = vsel %vm5288_vm8, %v5168_v61, %v1740_v47  ;;  %v1836_v29 = vadd.f32 0.00028619796, %v1835_v58  ;;  %v5298_v41 = vadd.f32 %v5122_v2, %v829_v11 }
 0x256   :  { %v1847_v8 = vadd.f32 0.001143296, %v1846_v40  ;;  %v3510_v3 = vclamps-f32 %v1710_v14, 1.0  ;;  %v1779_v18 = vmul.f32 %v5264_v37, %v1778_v43  ;;  %v2675_v55 = vmul.f32 %v5278_v22, %v5207_v39 }
 0x257   :  { %v1814_v30 = vmul.f32 %v1813_v13, %v5179_v54  ;;  %v1763_v46 = vmul.f32 %v1762_v44, %v5090_v16  ;;  %v1837_v61 = vmul.f32 %v1836_v29, %v5268_v60  ;;  %v1749_v11 = vsel %vm5249_vm6, %v1748_v62, %v1744_v24 }
 0x258   :  { %v1848_v47 = vmul.f32 %v1847_v8, %v5268_v60  ;;  %v1800_v14 = vadd.f32 0.05243302, %v1799_v4  ;;  %v2580_v40 = vsub.f32 %v2516_v10, %v2548_v12  ;;  %v1780_v43 = vadd.f32 %v5264_v37, %v1779_v18 }
 0x259   :  { %v5311_v58 = vadd.f32 1.0, %v1814_v30  ;;  %v5313_v45 = vpop.eup %3672  ;;  %vm1782_vm9 = vweird.f32 %v5264_v37  ;;  %v5318_v44 = vmul.f32 0.70710677, %v5298_v41  ;;  %v2212_v13 = vadd.f32 1.0, %v3510_v3 }
 0x25a   :  { %v1849_v16 = vadd.f32 0.014752088, %v1848_v47  ;;  %v2676_v29 = vmul.f32 %v5278_v22, %v2675_v55  ;;  %v1838_v0 = vadd.f32 0.0036580483, %v1837_v61  ;;  %v1750_v62 = vmul.f32 %v1749_v11, %v5201_v42 }
 0x25b   :  { %3674 = vrcp.f32 %v5311_v58  ;;  %vm1781_vm10 = vweird.f32 %v5205_v34  ;;  %v1785_v4 = vand.u32 2147483647, %v5205_v34  ;;  %v1787_v18 = vand.u32 2147483648, %v5205_v34 }
 0x25c   :  { %vm5326_vm11 = vmor %vm1781_vm10, %vm1782_vm9  ;;  %v1850_v10 = vmul.f32 %v1849_v16, %v5268_v60  ;;  %v5331_v24 = vadd.f32 1e-05, %v2580_v40  ;;  %v1873_v8 = vmul.f32 %v5318_v44, %v5318_v44  ;;  %v2371_v42 = vmul.f32 %v5213_v19, %v5213_v19 }
 0x25d   :  { %v1764_v3 = vadd.f32 1.1283791, %v1763_v46  ;;  %v1784_v55 = vsel %vm5326_vm11, %v5264_v37, %v1780_v43  ;;  %v1801_v34 = vmul.f32 %v1800_v14, %v5179_v54  ;;  %v2685_v30 = vmul.f32 %v5313_v45, %v5253_v52 }
 0x25e   :  { %v1839_v61 = vmul.f32 %v1838_v0, %v5268_v60  ;;  %v1851_v47 = vadd.f32 0.112945676, %v1850_v10  ;;  %v5344_v11 = vmin.f32 %v1873_v8, 16.0  ;;  %v2437_v40 = vsel %vm2257_vm13, %v2371_v42, 0.0 }
 0x25f   :  { %v3511_v16 = vclamps-f32 %v1750_v62, 1.0  ;;  %vm1786_vm12 = vcmp.eq.f32.partialorder %v1785_v4, 8.507059e+37  ;;  %v1788_v25 = vor.u32 1.1754944e-38, %v1787_v18  ;;  %v5347_v46 = vmul.f32 0.5, %v2676_v29  ;;  %2438 = vadd.xlane.f32.xlu2 %v2437_v40  ;;  %v2269_v40 = vpop.xlane.xlu2 %2268 }
 0x260   :  { %v1852_v37 = vmul.f32 %v1851_v47, %v5268_v60  ;;  %3676 = vrsqrt.f32 %v5331_v24  ;;  %v1875_v14 = vmul.f32 2.1237322e-06, %v5344_v11  ;;  %v1886_v43 = vmul.f32 3.8918573e-05, %v5344_v11 }
 0x261   :  { %v5349_v12 = vpop.eup %3674  ;;  %v1789_v0 = vsel %vm1786_vm12, %v1788_v25, %v1784_v55  ;;  %v1802_v10 = vadd.f32 0.18741608, %v1801_v34  ;;  %v2686_v4 = vmul.f32 %v5313_v45, %v2685_v30  ;;  %v1765_v29 = vmul.f32 %v1764_v3, %v5070_v38 }
 0x262   :  { %v1817_v62 = vmul.f32 %v5349_v12, %v5311_v58  ;;  %v1840_v18 = vadd.f32 0.05243302, %v1839_v61  ;;  %v1853_v8 = vadd.f32 0.4994258, %v1852_v37  ;;  %v1887_v42 = vadd.f32 0.001143296, %v1886_v43 }
 0x263   :  { %v5360_v47 = vmul.f32 %v2212_v13, %v5066_v21  ;;  %v2213_v19 = vadd.f32 1.0, %v3511_v16  ;;  %v1876_v31 = vadd.f32 0.00028619796, %v1875_v14  ;;  %v1790_v63 = vmul.f32 %v1789_v0, %v1765_v29  ;;  %v831_v13 = vpop.f32.mrf.mxu2  ;;  %v2397_v0 = vpop.xlane.xlu1 %2396 }
 0x264   :  { %v1818_v17 = vsub.f32 1.0, %v1817_v62  ;;  %v1854_v55 = vmul.f32 %v1853_v8, %v5268_v60  ;;  %v1888_v34 = vmul.f32 %v1887_v42, %v5344_v11  ;;  %v5365_v30 = vmul.f32 0.5, %v2686_v4 }
 0x265   :  { %6709 = vst [vmem:[#allocation21_spill] sm:$0xff] %v5360_v47  ;;  %v5368_v38 = vmul.f32 0.5, %v5210_v32  ;;  %v5370_v3 = vmul.f32 0.015625, %v2269_v40  ;;  %v2312_v21 = vsel %vm2257_vm13, %v5260_v56, 0.0  ;;  %v1803_v16 = vmul.f32 %v1802_v10, %v5179_v54 }
 0x266   :  { %v5374_v61 = vpop.eup %3676  ;;  %v1841_v37 = vmul.f32 %v1840_v18, %v5268_v60  ;;  %v5378_v14 = vadd.f32 1.0, %v1854_v55  ;;  %v1889_v43 = vadd.f32 0.014752088, %v1888_v34  ;;  %2313 = vadd.xlane.f32.xlu0 %v2312_v21  ;;  %v5381_v32 = vmul.f32 %v2213_v19, %v5088_v50 }
 0x267   :  { %v1819_v62 = vmul.f32 %v5349_v12, %v1818_v17  ;;  %v1877_v29 = vmul.f32 %v1876_v31, %v5344_v11  ;;  %v3512_v8 = vclamps-f32 %v1790_v63, 1.0  ;;  %v5389_v54 = vadd.f32 %v5122_v2, %v831_v13 }
 0x268   :  { %3678 = vrcp.f32 %v5378_v14  ;;  %v2372_v10 = vmul.f32 %v5260_v56, %v5260_v56  ;;  %v2695_v50 = vmul.f32 %v5374_v61, %v5331_v24  ;;  %v1890_v19 = vmul.f32 %v1889_v43, %v5344_v11 }
 0x269   :  { %v2549_v17 = vmul.f32 %v5370_v3, %v5370_v3  ;;  %v2517_v18 = vmul.f32 0.015625, %v2397_v0  ;;  %v1804_v42 = vadd.f32 1.1283791, %v1803_v16  ;;  %vm1821_vm14 = vweird.f32 %v5311_v58 }
 0x26a   :  { %v1842_v31 = vadd.f32 0.18741608, %v1841_v37  ;;  %v1820_v40 = vadd.f32 %v5349_v12, %v1819_v62  ;;  %vm1822_vm15 = vweird.f32 %v5349_v12  ;;  %v1878_v55 = vadd.f32 0.0036580483, %v1877_v29  ;;  %v2272_v62 = vpop.xlane.xlu2 %2271 }
 0x26b   :  { %v1891_v34 = vadd.f32 0.112945676, %v1890_v19  ;;  %v1825_v21 = vand.u32 2147483647, %v5311_v58  ;;  %v1827_v13 = vand.u32 2147483648, %v5311_v58  ;;  %v2440_v16 = vsel %vm2257_vm13, %v2372_v10, 0.0  ;;  %vm5414_vm0 = vmor %vm1821_vm14, %vm1822_vm15 }
 0x26c   :  { %v5405_v43 = vmul.f32 0.70710677, %v5389_v54  ;;  %v2214_v0 = vadd.f32 1.0, %v3512_v8  ;;  %v2696_v4 = vmul.f32 %v5374_v61, %v2695_v50  ;;  %v2581_v63 = vsub.f32 %v2517_v18, %v2549_v17  ;;  %2441 = vadd.xlane.f32.xlu2 %v2440_v16 }
 0x26d   :  { %v1892_v37 = vmul.f32 %v1891_v34, %v5344_v11  ;;  %v1843_v19 = vmul.f32 %v1842_v31, %v5268_v60  ;;  %v5420_v10 = vmul.f32 0.5, %v5298_v41  ;;  %v2315_v50 = vsel %vm2257_vm13, %v5360_v47, 0.0 }
 0x26e   :  { %v5410_v25 = vpop.eup %3678  ;;  %v1913_v8 = vmul.f32 %v5405_v43, %v5405_v43  ;;  %v1805_v17 = vmul.f32 %v1804_v42, %v5149_v51  ;;  %v1824_v58 = vsel %vm5414_vm0, %v5349_v12, %v1820_v40  ;;  %v1879_v60 = vmul.f32 %v1878_v55, %v5344_v11  ;;  %2316 = vadd.xlane.f32.xlu1 %v2315_v50  ;;  %v2400_v42 = vpop.xlane.xlu1 %2399 }
 0x26f   :  { %v1857_v18 = vmul.f32 %v5410_v25, %v5378_v14  ;;  %v1828_v41 = vor.u32 1.1754944e-38, %v1827_v13  ;;  %v1893_v31 = vadd.f32 0.4994258, %v1892_v37  ;;  %v5435_v16 = vmul.f32 0.015625, %v2272_v62 }
 0x270   :  { %v5433_v34 = vmin.f32 %v1913_v8, 16.0  ;;  %v5438_v56 = vmul.f32 %v2214_v0, %v5175_v1  ;;  %vm2681_vm1 = vweird.f32 %v5278_v22  ;;  %vm1826_vm2 = vcmp.eq.f32.partialorder %v1825_v21, 8.507059e+37 }
 0x271   :  { %v5441_v51 = vmul.f32 0.5, %v2696_v4  ;;  %v5443_v12 = vadd.f32 1e-05, %v2581_v63  ;;  %v1829_v40 = vsel %vm1826_vm2, %v1828_v41, %v1824_v58  ;;  %vm2691_vm3 = vweird.f32 %v5313_v45  ;;  %v834_v63 = vpop.f32.mrf.mxu2 }
 0x272   :  { %v1844_v55 = vadd.f32 1.1283791, %v1843_v19  ;;  %v1894_v13 = vmul.f32 %v1893_v31, %v5344_v11  ;;  %v1915_v37 = vmul.f32 2.1237322e-06, %v5433_v34  ;;  %vm2680_vm4 = vweird.f32 %v5207_v39  ;;  %v2403_v5 = vpop.xlane.xlu2 %2402 }
 0x273   :  { %v1858_v1 = vsub.f32 1.0, %v1857_v18  ;;  %v1880_v0 = vadd.f32 0.05243302, %v1879_v60  ;;  %v1926_v4 = vmul.f32 3.8918573e-05, %v5433_v34  ;;  %vm2690_vm5 = vweird.f32 %v5253_v52  ;;  %vm5498_vm9 = vmor %vm2680_vm4, %vm2681_vm1 }
 0x274   :  { %v5453_v62 = vadd.f32 1.0, %v1894_v13  ;;  %v1916_v29 = vadd.f32 0.00028619796, %v1915_v37  ;;  %v2550_v19 = vmul.f32 %v5435_v16, %v5435_v16  ;;  %v2518_v8 = vmul.f32 0.015625, %v2400_v42  ;;  %vm5513_vm10 = vmor %vm2690_vm5, %vm2691_vm3 }
 0x275   :  { %v1830_v50 = vmul.f32 %v1829_v40, %v1805_v17  ;;  %v1865_v58 = vand.u32 2147483647, %v5378_v14  ;;  %3680 = vrsqrt.f32 %v5443_v12  ;;  %v1927_v18 = vadd.f32 0.001143296, %v1926_v4 }
 0x276   :  { %3682 = vrcp.f32 %v5453_v62  ;;  %v5462_v41 = vadd.f32 %v5122_v2, %v834_v63  ;;  %v2373_v31 = vmul.f32 %v5360_v47, %v5360_v47  ;;  %v1859_v13 = vmul.f32 %v5410_v25, %v1858_v1 }
 0x277   :  { %v1881_v42 = vmul.f32 %v1880_v0, %v5344_v11  ;;  %v1917_v17 = vmul.f32 %v1916_v29, %v5433_v34  ;;  %v1928_v40 = vmul.f32 %v1927_v18, %v5433_v34  ;;  %v1845_v37 = vmul.f32 %v1844_v55, %v5241_v26 }
 0x278   :  { %vm1861_vm6 = vweird.f32 %v5378_v14  ;;  %v1867_v4 = vand.u32 2147483648, %v5378_v14  ;;  %v2582_v21 = vsub.f32 %v2518_v8, %v2550_v19  ;;  %v3513_v63 = vclamps-f32 %v1830_v50, 1.0 }
 0x279   :  { %vm5473_vm7 = vcmp.eq.f32.partialorder %v1865_v58, 8.507059e+37  ;;  %v1918_v47 = vadd.f32 0.0036580483, %v1917_v17  ;;  %v1929_v1 = vadd.f32 0.014752088, %v1928_v40  ;;  %v2443_v29 = vsel %vm2257_vm13, %v2373_v31, 0.0  ;;  %v836_v27 = vpop.f32.mrf.mxu2 }
 0x27a   :  { %v5478_v0 = vmul.f32 0.70710677, %v5462_v41  ;;  %v6714_v18 = vsub.f32 1.5, %v5347_v46  ;;  %v6715_v55 = vsub.f32 1.5, %v5365_v30  ;;  %v1860_v50 = vadd.f32 %v5410_v25, %v1859_v13  ;;  %2444 = vadd.xlane.f32.xlu0 %v2443_v29 }
 0x27b   :  { %v5487_v8 = vpop.eup %3680  ;;  %vm1862_vm8 = vweird.f32 %v5410_v25  ;;  %v1882_v58 = vadd.f32 0.18741608, %v1881_v42  ;;  %v1930_v17 = vmul.f32 %v1929_v1, %v5433_v34  ;;  %v1868_v30 = vor.u32 1.1754944e-38, %v1867_v4 }
 0x27c   :  { %v2679_v26 = vmul.f32 %v5278_v22, %v6714_v18  ;;  %v2689_v19 = vmul.f32 %v5313_v45, %v6715_v55  ;;  %v5492_v40 = vpop.eup %3682  ;;  %v5503_v31 = vmul.f32 0.5, %v5389_v54  ;;  %v5505_v13 = vadd.f32 1e-05, %v2582_v21  ;;  %vm5526_vm11 = vmor %vm1861_vm6, %vm1862_vm8 }
 0x27d   :  { %v1953_v42 = vmul.f32 %v5478_v0, %v5478_v0  ;;  %v2215_v1 = vadd.f32 1.0, %v3513_v63  ;;  %v1897_v4 = vmul.f32 %v5492_v40, %v5453_v62  ;;  %v1919_v54 = vmul.f32 %v1918_v47, %v5433_v34 }
 0x27e   :  { %v1931_v52 = vadd.f32 0.112945676, %v1930_v17  ;;  %v2683_v18 = vsel %vm5498_vm9, %v5278_v22, %v2679_v26  ;;  %v2693_v47 = vsel %vm5513_vm10, %v5313_v45, %v2689_v19  ;;  %v1864_v55 = vsel %vm5526_vm11, %v5410_v25, %v1860_v50 }
 0x27f   :  { %v5530_v29 = vmin.f32 %v1953_v42, 16.0  ;;  %v1883_v14 = vmul.f32 %v1882_v58, %v5344_v11  ;;  %v1898_v21 = vsub.f32 1.0, %v1897_v4  ;;  %v2705_v17 = vmul.f32 %v5487_v8, %v5443_v12  ;;  %v2275_v42 = vpop.xlane.xlu0 %2274 }
 0x280   :  { %v1932_v9 = vmul.f32 %v1931_v52, %v5433_v34  ;;  %3684 = vrsqrt.f32 %v5505_v13  ;;  %v5549_v45 = vmul.f32 %v2215_v1, %v5238_v36  ;;  %v1920_v19 = vadd.f32 0.05243302, %v1919_v54 }
 0x281   :  { %v1955_v22 = vmul.f32 2.1237322e-06, %v5530_v29  ;;  %v1966_v26 = vmul.f32 3.8918573e-05, %v5530_v29  ;;  %v6722_v11 = vsub.f32 %v4228_v7, %v5137_v57  ;;  %v6723_v50 = vsub.f32 %v4313_v53, %v5181_v33 }
 0x282   :  { %v1869_v46 = vsel %vm5473_vm7, %v1868_v30, %v1864_v55  ;;  %v1933_v39 = vadd.f32 0.4994258, %v1932_v9  ;;  %v5559_v63 = vmul.f32 0.015625, %v2275_v42  ;;  %v1884_v52 = vadd.f32 1.1283791, %v1883_v14 }
 0x283   :  { %v2994_v25 = vmul.f32 %v2683_v18, %v6722_v11  ;;  %v2995_v58 = vmul.f32 %v2693_v47, %v6723_v50  ;;  %v1956_v4 = vadd.f32 0.00028619796, %v1955_v22  ;;  %v1899_v36 = vmul.f32 %v5492_v40, %v1898_v21 }
 0x284   :  { %v1967_v1 = vadd.f32 0.001143296, %v1966_v26  ;;  %v2706_v7 = vmul.f32 %v5487_v8, %v2705_v17  ;;  %v1934_v57 = vmul.f32 %v1933_v39, %v5433_v34  ;;  %v2318_v33 = vsel %vm2257_vm13, %v5381_v32, 0.0 }
 0x285   :  { %v3026_v54 = vpack.c.bf16 %v2995_v58, %v2994_v25  ;;  %v1957_v53 = vmul.f32 %v1956_v4, %v5530_v29  ;;  %v1870_v9 = vmul.f32 %v1869_v46, %v1845_v37  ;;  %v1921_v60 = vmul.f32 %v1920_v19, %v5433_v34  ;;  %2319 = vadd.xlane.f32.xlu1 %v2318_v33 }
 0x286   :  { %v5569_v30 = vmul.f32 0.5, %v5462_v41  ;;  %v1968_v21 = vmul.f32 %v1967_v1, %v5530_v29  ;;  %v5573_v18 = vpop.eup %3684  ;;  %vm1902_vm12 = vweird.f32 %v5492_v40  ;;  %v5576_v47 = vadd.f32 1.0, %v1934_v57 }
 0x287   :  { %3539 = vmatmul.msk.bf16.vlgmr.msra.gmra.mxu3 %vm2257_vm13, %v3026_v54  ;;  %v2551_v55 = vmul.f32 %v5559_v63, %v5559_v63  ;;  %v5581_v37 = vadd.f32 %v5122_v2, %v836_v27  ;;  %v1900_v41 = vadd.f32 %v5492_v40, %v1899_v36  ;;  %v1958_v14 = vadd.f32 0.0036580483, %v1957_v53  ;;  %v2278_v50 = vpop.xlane.xlu0 %2277 }
 0x288   :  { %v1969_v17 = vadd.f32 0.014752088, %v1968_v21  ;;  %v2519_v42 = vmul.f32 0.015625, %v2403_v5  ;;  %v1885_v22 = vmul.f32 %v1884_v52, %v5318_v44  ;;  %vm1901_vm14 = vweird.f32 %v5453_v62 }
 0x289   :  { %v1907_v26 = vand.u32 2147483648, %v5453_v62  ;;  %3686 = vrcp.f32 %v5576_v47  ;;  %v1905_v19 = vand.u32 2147483647, %v5453_v62  ;;  %v1922_v11 = vadd.f32 0.18741608, %v1921_v60  ;;  %vm5594_vm15 = vmor %vm1901_vm14, %vm1902_vm12 }
 0x28a   :  { %v2715_v27 = vmul.f32 %v5573_v18, %v5505_v13  ;;  %v1970_v25 = vmul.f32 %v1969_v17, %v5530_v29  ;;  %v3514_v58 = vclamps-f32 %v1870_v9, 1.0  ;;  %v5598_v44 = vmul.f32 0.5, %v2706_v7 }
 0x28b   :  { %v5601_v46 = vmul.f32 0.70710677, %v5581_v37  ;;  %v2374_v62 = vmul.f32 %v5381_v32, %v5381_v32  ;;  %v1904_v39 = vsel %vm5594_vm15, %v5492_v40, %v1900_v41  ;;  %v1959_v4 = vmul.f32 %v1958_v14, %v5530_v29  ;;  %v2406_v40 = vpop.xlane.xlu2 %2405 }
 0x28c   :  { %v1971_v52 = vadd.f32 0.112945676, %v1970_v25  ;;  %v2583_v36 = vsub.f32 %v2519_v42, %v2551_v55  ;;  %v1908_v1 = vor.u32 1.1754944e-38, %v1907_v26  ;;  %v5612_v57 = vmul.f32 0.015625, %v2278_v50 }
 0x28d   :  { %v1993_v54 = vmul.f32 %v5601_v46, %v5601_v46  ;;  %v2446_v7 = vsel %vm2257_vm13, %v2374_v62, 0.0  ;;  %vm1906_vm0 = vcmp.eq.f32.partialorder %v1905_v19, 8.507059e+37  ;;  %v1923_v53 = vmul.f32 %v1922_v11, %v5433_v34 }
 0x28e   :  { %v2716_v33 = vmul.f32 %v5573_v18, %v2715_v27  ;;  %v1972_v9 = vmul.f32 %v1971_v52, %v5530_v29  ;;  %2447 = vadd.xlane.f32.xlu0 %v2446_v7  ;;  %v2216_v21 = vadd.f32 1.0, %v3514_v58  ;;  %v1909_v55 = vsel %vm1906_vm0, %v1908_v1, %v1904_v39  ;;  %v839_v1 = vpop.f32.mrf.mxu2 }
 0x28f   :  { %v5617_v60 = vpop.eup %3686  ;;  %v5619_v41 = vmin.f32 %v1993_v54, 16.0  ;;  %v2321_v14 = vsel %vm2257_vm13, %v5438_v56, 0.0  ;;  %v1960_v42 = vadd.f32 0.05243302, %v1959_v4  ;;  %v5625_v26 = vadd.f32 1e-05, %v2583_v36 }
 0x290   :  { %v1937_v17 = vmul.f32 %v5617_v60, %v5576_v47  ;;  %v1973_v34 = vadd.f32 0.4994258, %v1972_v9  ;;  %2322 = vadd.xlane.f32.xlu2 %v2321_v14  ;;  %vm2701_vm1 = vweird.f32 %v5374_v61  ;;  %v2552_v27 = vmul.f32 %v5612_v57, %v5612_v57 }
 0x291   :  { %v1995_v19 = vmul.f32 2.1237322e-06, %v5619_v41  ;;  %v2006_v11 = vmul.f32 3.8918573e-05, %v5619_v41  ;;  %v2520_v25 = vmul.f32 0.015625, %v2406_v40  ;;  %vm2711_vm2 = vweird.f32 %v5487_v8 }
 0x292   :  { %v1924_v50 = vadd.f32 1.1283791, %v1923_v53  ;;  %v1938_v58 = vsub.f32 1.0, %v1937_v17  ;;  %v5633_v5 = vmul.f32 0.5, %v2716_v33  ;;  %v1974_v62 = vmul.f32 %v1973_v34, %v5530_v29 }
 0x293   :  { %vm2700_vm3 = vweird.f32 %v5331_v24  ;;  %v1910_v39 = vmul.f32 %v1909_v55, %v1885_v22  ;;  %v1945_v4 = vand.u32 2147483647, %v5576_v47  ;;  %v1996_v52 = vadd.f32 0.00028619796, %v1995_v19 }
 0x294   :  { %v2007_v36 = vadd.f32 0.001143296, %v2006_v11  ;;  %vm2710_vm4 = vweird.f32 %v5443_v12  ;;  %v1939_v54 = vmul.f32 %v5617_v60, %v1938_v58  ;;  %v1961_v7 = vmul.f32 %v1960_v42, %v5530_v29  ;;  %vm5692_vm9 = vmor %vm2700_vm3, %vm2701_vm1 }
 0x295   :  { %v5641_v53 = vadd.f32 1.0, %v1974_v62  ;;  %3688 = vrsqrt.f32 %v5625_v26  ;;  %v1947_v33 = vand.u32 2147483648, %v5576_v47  ;;  %v1997_v9 = vmul.f32 %v1996_v52, %v5619_v41  ;;  %vm5704_vm10 = vmor %vm2710_vm4, %vm2711_vm2 }
 0x296   :  { %v2008_v22 = vmul.f32 %v2007_v36, %v5619_v41  ;;  %v2584_v40 = vsub.f32 %v2520_v25, %v2552_v27  ;;  %v1940_v55 = vadd.f32 %v5617_v60, %v1939_v54  ;;  %vm1942_vm5 = vweird.f32 %v5617_v60 }
 0x297   :  { %3690 = vrcp.f32 %v5641_v53  ;;  %v5651_v14 = vadd.f32 %v5122_v2, %v839_v1  ;;  %v5654_v17 = vmul.f32 %v2216_v21, %v5368_v38  ;;  %v3515_v42 = vclamps-f32 %v1910_v39, 1.0  ;;  %v2281_v2 = vpop.xlane.xlu1 %2280 }
 0x298   :  { %v2708_v34 = vsub.f32 1.5, %v5598_v44  ;;  %v2375_v19 = vmul.f32 %v5438_v56, %v5438_v56  ;;  %vm1941_vm6 = vweird.f32 %v5576_v47  ;;  %v1962_v11 = vadd.f32 0.18741608, %v1961_v7 }
 0x299   :  { %v1998_v27 = vadd.f32 0.0036580483, %v1997_v9  ;;  %v2009_v25 = vadd.f32 0.014752088, %v2008_v22  ;;  %v1925_v58 = vmul.f32 %v1924_v50, %v5405_v43  ;;  %vm5661_vm7 = vmor %vm1941_vm6, %vm1942_vm5  ;;  %vm5665_vm8 = vcmp.eq.f32.partialorder %v1945_v4, 8.507059e+37 }
 0x29a   :  { %v2718_v38 = vsub.f32 1.5, %v5633_v5  ;;  %v5670_v44 = vadd.f32 1e-05, %v2584_v40  ;;  %v1944_v47 = vsel %vm5661_vm7, %v5617_v60, %v1940_v55  ;;  %v1948_v39 = vor.u32 1.1754944e-38, %v1947_v33 }
 0x29b   :  { %v5672_v21 = vpop.eup %3688  ;;  %v2010_v43 = vmul.f32 %v2009_v25, %v5619_v41  ;;  %v5679_v50 = vmul.f32 0.70710677, %v5651_v14  ;;  %v2217_v4 = vadd.f32 1.0, %v3515_v42  ;;  %v2449_v52 = vsel %vm2257_vm13, %v2375_v19, 0.0 }
 0x29c   :  { %v6730_v36 = vsub.f32 1.5, %v5441_v51  ;;  %v2709_v54 = vmul.f32 %v5487_v8, %v2708_v34  ;;  %v1963_v33 = vmul.f32 %v1962_v11, %v5530_v29  ;;  %v1999_v9 = vmul.f32 %v1998_v27, %v5619_v41  ;;  %2450 = vadd.xlane.f32.xlu1 %v2449_v52 }
 0x29d   :  { %v5686_v7 = vpop.eup %3690  ;;  %v2011_v22 = vadd.f32 0.112945676, %v2010_v43  ;;  %v2033_v51 = vmul.f32 %v5679_v50, %v5679_v50  ;;  %v1949_v24 = vsel %vm5665_vm8, %v1948_v39, %v1944_v47  ;;  %v2725_v55 = vmul.f32 %v5672_v21, %v5625_v26 }
 0x29e   :  { %v2699_v1 = vmul.f32 %v5374_v61, %v6730_v36  ;;  %v1977_v29 = vmul.f32 %v5686_v7, %v5641_v53  ;;  %3692 = vrsqrt.f32 %v5670_v44  ;;  %v2713_v19 = vsel %vm5704_vm10, %v5487_v8, %v2709_v54 }
 0x29f   :  { %v2012_v42 = vmul.f32 %v2011_v22, %v5619_v41  ;;  %v5716_v34 = vmin.f32 %v2033_v51, 16.0  ;;  %v5725_v11 = vmul.f32 %v2217_v4, %v5420_v10  ;;  %v2615_v25 = vsub.f32 %v4580_v35, %v5559_v63 }
 0x2a0   :  { %v2703_v12 = vsel %vm5692_vm9, %v5374_v61, %v2699_v1  ;;  %v1978_v27 = vsub.f32 1.0, %v1977_v29  ;;  %v5730_v62 = vmul.f32 0.5, %v5581_v37  ;;  %v1950_v47 = vmul.f32 %v1949_v24, %v1925_v58 }
 0x2a1   :  { %v2000_v39 = vadd.f32 0.05243302, %v1999_v9  ;;  %v2013_v43 = vadd.f32 0.4994258, %v2012_v42  ;;  %v2035_v61 = vmul.f32 2.1237322e-06, %v5716_v34  ;;  %v6735_v10 = vsub.f32 %v4392_v59, %v5262_v23  ;;  %v2409_v9 = vpop.xlane.xlu0 %2408  ;;  %v841_v42 = vpop.f32.mrf.mxu2 }
 0x2a2   :  { %v1979_v52 = vmul.f32 %v5686_v7, %v1978_v27  ;;  %v2046_v8 = vmul.f32 3.8918573e-05, %v5716_v34  ;;  %v6736_v36 = vsub.f32 %v4460_v15, %v5370_v3  ;;  %v1964_v37 = vadd.f32 1.1283791, %v1963_v33 }
 0x2a3   :  { %v2996_v4 = vmul.f32 %v2703_v12, %v6735_v10  ;;  %v2726_v54 = vmul.f32 %v5672_v21, %v2725_v55  ;;  %v2014_v58 = vmul.f32 %v2013_v43, %v5619_v41  ;;  %v2036_v60 = vadd.f32 0.00028619796, %v2035_v61 }
 0x2a4   :  { %v2997_v1 = vmul.f32 %v2713_v19, %v6736_v36  ;;  %v5743_v22 = vpop.eup %3692  ;;  %v1980_v51 = vadd.f32 %v5686_v7, %v1979_v52  ;;  %vm1982_vm11 = vweird.f32 %v5686_v7  ;;  %v2047_v40 = vadd.f32 0.001143296, %v2046_v8 }
 0x2a5   :  { %vm1981_vm12 = vweird.f32 %v5641_v53  ;;  %v1987_v15 = vand.u32 2147483648, %v5641_v53  ;;  %v5749_v23 = vadd.f32 1.0, %v2014_v58  ;;  %v2037_v3 = vmul.f32 %v2036_v60, %v5716_v34 }
 0x2a6   :  { %v3027_v59 = vpack.c.bf16 %v2997_v1, %v2996_v4  ;;  %v3516_v33 = vclamps-f32 %v1950_v47, 1.0  ;;  %v1985_v24 = vand.u32 2147483647, %v5641_v53  ;;  %v2001_v29 = vmul.f32 %v2000_v39, %v5619_v41  ;;  %vm5756_vm14 = vmor %vm1981_vm12, %vm1982_vm11  ;;  %v5780_v4 = vld [vmem:[%s6621_s5] ss:$0 sm:$0xff] }
 0x2a7   :  { %v2048_v55 = vmul.f32 %v2047_v40, %v5716_v34  ;;  %3694 = vrcp.f32 %v5749_v23  ;;  %v2616_v19 = vsub.f32 %v4553_v28, %v5612_v57  ;;  %v2735_v27 = vmul.f32 %v5743_v22, %v5670_v44 }
 0x2a8   :  { %3540 = vmatmul.msk.bf16.gmra.mxu3 %vm2257_vm13, %v3027_v59  ;;  %v5766_v53 = vmul.f32 0.5, %v5651_v14  ;;  %v1984_v47 = vsel %vm5756_vm14, %v5686_v7, %v1980_v51  ;;  %v5771_v39 = vmul.f32 0.5, %v2726_v54  ;;  %v2038_v43 = vadd.f32 0.0036580483, %v2037_v3 }
 0x2a9   :  { %v5773_v61 = vmul.f32 0.015625, %v2281_v2  ;;  %v1988_v52 = vor.u32 1.1754944e-38, %v1987_v15  ;;  %v2049_v8 = vadd.f32 0.014752088, %v2048_v55  ;;  %v2324_v10 = vsel %vm2257_vm13, %v5549_v45, 0.0  ;;  %v2284_v2 = vpop.xlane.xlu1 %2283  ;;  %v2412_v55 = vpop.xlane.xlu0 %2411 }
 0x2aa   :  { %v5783_v14 = vadd.f32 %v5780_v4, %v841_v42  ;;  %v2218_v36 = vadd.f32 1.0, %v3516_v33  ;;  %v1965_v7 = vmul.f32 %v1964_v37, %v5478_v0  ;;  %vm1986_vm15 = vcmp.eq.f32.partialorder %v1985_v24, 8.507059e+37  ;;  %2325 = vadd.xlane.f32.xlu2 %v2324_v10 }
 0x2ab   :  { %v2002_v1 = vadd.f32 0.18741608, %v2001_v29  ;;  %v1989_v54 = vsel %vm1986_vm15, %v1988_v52, %v1984_v47  ;;  %v2736_v58 = vmul.f32 %v5743_v22, %v2735_v27  ;;  %v2050_v60 = vmul.f32 %v2049_v8, %v5716_v34 }
 0x2ac   :  { %v5789_v51 = vmul.f32 0.70710677, %v5783_v14  ;;  %v2039_v40 = vmul.f32 %v2038_v43, %v5716_v34  ;;  %v2553_v59 = vmul.f32 %v5773_v61, %v5773_v61  ;;  %v2521_v15 = vmul.f32 0.015625, %v2409_v9 }
 0x2ad   :  { %v2376_v0 = vmul.f32 %v5549_v45, %v5549_v45  ;;  %v5796_v37 = vpop.eup %3694  ;;  %v2728_v3 = vsub.f32 1.5, %v5771_v39  ;;  %v2051_v33 = vadd.f32 0.112945676, %v2050_v60  ;;  %v5801_v29 = vmul.f32 0.015625, %v2284_v2  ;;  %v2287_v39 = vpop.xlane.xlu2 %2286 }
 0x2ae   :  { %v2073_v24 = vmul.f32 %v5789_v51, %v5789_v51  ;;  %v5804_v42 = vmul.f32 %v2218_v36, %v5503_v31  ;;  %v1990_v12 = vmul.f32 %v1989_v54, %v1965_v7  ;;  %v2003_v9 = vmul.f32 %v2002_v1, %v5619_v41  ;;  %v844_v36 = vpop.f32.mrf.mxu2 }
 0x2af   :  { %v2017_v27 = vmul.f32 %v5796_v37, %v5749_v23  ;;  %v5809_v47 = vmul.f32 0.5, %v2736_v58  ;;  %v2052_v43 = vmul.f32 %v2051_v33, %v5716_v34  ;;  %v2452_v8 = vsel %vm2257_vm13, %v2376_v0, 0.0 }
 0x2b0   :  { %v5812_v52 = vmin.f32 %v2073_v24, 16.0  ;;  %v2040_v2 = vadd.f32 0.05243302, %v2039_v40  ;;  %v2585_v60 = vsub.f32 %v2521_v15, %v2553_v59  ;;  %2453 = vadd.xlane.f32.xlu1 %v2452_v8  ;;  %v2522_v31 = vmul.f32 0.015625, %v2412_v55 }
 0x2b1   :  { %v2018_v10 = vsub.f32 1.0, %v2017_v27  ;;  %v2053_v7 = vadd.f32 0.4994258, %v2052_v43  ;;  %v2554_v54 = vmul.f32 %v5801_v29, %v5801_v29  ;;  %vm2721_vm0 = vweird.f32 %v5573_v18 }
 0x2b2   :  { %v2075_v41 = vmul.f32 2.1237322e-06, %v5812_v52  ;;  %v2086_v1 = vmul.f32 3.8918573e-05, %v5812_v52  ;;  %v3517_v58 = vclamps-f32 %v1990_v12, 1.0  ;;  %v2327_v40 = vsel %vm2257_vm13, %v5654_v17, 0.0 }
 0x2b3   :  { %v2004_v33 = vadd.f32 1.1283791, %v2003_v9  ;;  %v2019_v0 = vmul.f32 %v5796_v37, %v2018_v10  ;;  %vm2731_vm1 = vweird.f32 %v5672_v21  ;;  %v2054_v59 = vmul.f32 %v2053_v7, %v5716_v34  ;;  %2328 = vadd.xlane.f32.xlu0 %v2327_v40 }
 0x2b4   :  { %v2076_v15 = vadd.f32 0.00028619796, %v2075_v41  ;;  %v2087_v24 = vadd.f32 0.001143296, %v2086_v1  ;;  %v845_v55 = vadd.f32 %v5780_v4, %v844_v36  ;;  %vm2720_vm2 = vweird.f32 %v5505_v13 }
 0x2b5   :  { %v2025_v27 = vand.u32 2147483647, %v5749_v23  ;;  %v2027_v12 = vand.u32 2147483648, %v5749_v23  ;;  %v2041_v9 = vmul.f32 %v2040_v2, %v5716_v34  ;;  %v5830_v43 = vadd.f32 1e-05, %v2585_v60  ;;  %vm5888_vm8 = vmor %vm2720_vm2, %vm2721_vm0 }
 0x2b6   :  { %vm2730_vm3 = vweird.f32 %v5625_v26  ;;  %v5833_v8 = vadd.f32 1.0, %v2054_v59  ;;  %v2077_v10 = vmul.f32 %v2076_v15, %v5812_v52  ;;  %v2088_v7 = vmul.f32 %v2087_v24, %v5812_v52 }
 0x2b7   :  { %v2586_v41 = vsub.f32 %v2522_v31, %v2554_v54  ;;  %v2219_v36 = vadd.f32 1.0, %v3517_v58  ;;  %v2020_v1 = vadd.f32 %v5796_v37, %v2019_v0  ;;  %vm2022_vm4 = vweird.f32 %v5796_v37  ;;  %vm5902_vm9 = vmor %vm2730_vm3, %vm2731_vm1 }
 0x2b8   :  { %v2005_v2 = vmul.f32 %v2004_v33, %v5601_v46  ;;  %v2738_v60 = vsub.f32 1.5, %v5809_v47  ;;  %3696 = vrcp.f32 %v5833_v8  ;;  %v5844_v59 = vmul.f32 0.70710677, %v845_v55 }
 0x2b9   :  { %vm2021_vm5 = vweird.f32 %v5749_v23  ;;  %v2042_v15 = vadd.f32 0.18741608, %v2041_v9  ;;  %3698 = vrsqrt.f32 %v5830_v43  ;;  %v2078_v31 = vadd.f32 0.0036580483, %v2077_v10 }
 0x2ba   :  { %vm5848_vm6 = vmor %vm2021_vm5, %vm2022_vm4  ;;  %vm5852_vm7 = vcmp.eq.f32.partialorder %v2025_v27, 8.507059e+37  ;;  %v2028_v46 = vor.u32 1.1754944e-38, %v2027_v12  ;;  %v2089_v33 = vadd.f32 0.014752088, %v2088_v7  ;;  %v5856_v0 = vadd.f32 1e-05, %v2586_v41 }
 0x2bb   :  { %v5859_v24 = vmul.f32 %v2219_v36, %v5569_v30  ;;  %v2024_v23 = vsel %vm5848_vm6, %v5796_v37, %v2020_v1  ;;  %v5865_v9 = vmul.f32 0.5, %v5783_v14  ;;  %v2079_v10 = vmul.f32 %v2078_v31, %v5812_v52 }
 0x2bc   :  { %v2090_v27 = vmul.f32 %v2089_v33, %v5812_v52  ;;  %v2113_v12 = vmul.f32 %v5844_v59, %v5844_v59  ;;  %v2377_v7 = vmul.f32 %v5654_v17, %v5654_v17  ;;  %v2719_v30 = vmul.f32 %v5573_v18, %v2718_v38 }
 0x2bd   :  { %v2043_v41 = vmul.f32 %v2042_v15, %v5716_v34  ;;  %v2080_v37 = vadd.f32 0.05243302, %v2079_v10  ;;  %v2729_v36 = vmul.f32 %v5672_v21, %v2728_v3  ;;  %3700 = vrsqrt.f32 %v5856_v0 }
 0x2be   :  { %v5882_v1 = vpop.eup %3696  ;;  %v2091_v38 = vadd.f32 0.112945676, %v2090_v27  ;;  %v5893_v34 = vmin.f32 %v2113_v12, 16.0  ;;  %v2455_v15 = vsel %vm2257_vm13, %v2377_v7, 0.0  ;;  %v2029_v3 = vsel %vm5852_vm7, %v2028_v46, %v2024_v23 }
 0x2bf   :  { %v5896_v31 = vpop.eup %3698  ;;  %v2057_v54 = vmul.f32 %v5882_v1, %v5833_v8  ;;  %v5910_v33 = vmul.f32 0.5, %v845_v55  ;;  %2456 = vadd.xlane.f32.xlu2 %v2455_v15  ;;  %v2723_v10 = vsel %vm5888_vm8, %v5573_v18, %v2719_v30  ;;  %v2733_v58 = vsel %vm5902_vm9, %v5672_v21, %v2729_v36 }
 0x2c0   :  { %v2092_v27 = vmul.f32 %v2091_v38, %v5812_v52  ;;  %v2115_v26 = vmul.f32 2.1237322e-06, %v5893_v34  ;;  %v2126_v12 = vmul.f32 3.8918573e-05, %v5893_v34  ;;  %v2044_v46 = vadd.f32 1.1283791, %v2043_v41 }
 0x2c1   :  { %v2058_v23 = vsub.f32 1.0, %v2057_v54  ;;  %v2081_v55 = vmul.f32 %v2080_v37, %v5812_v52  ;;  %v5922_v7 = vmul.f32 0.015625, %v2287_v39  ;;  %v2745_v5 = vmul.f32 %v5896_v31, %v5830_v43 }
 0x2c2   :  { %v2093_v18 = vadd.f32 0.4994258, %v2092_v27  ;;  %v2116_v30 = vadd.f32 0.00028619796, %v2115_v26  ;;  %v2127_v38 = vadd.f32 0.001143296, %v2126_v12  ;;  %v2030_v15 = vmul.f32 %v2029_v3, %v2005_v2  ;;  %v2415_v3 = vpop.xlane.xlu1 %2414  ;;  %v846_v26 = vpop.f32.mrf.mxu2 }
 0x2c3   :  { %v2059_v14 = vmul.f32 %v5882_v1, %v2058_v23  ;;  %v6747_v40 = vsub.f32 %v4476_v48, %v5435_v16  ;;  %v2999_v21 = vmul.f32 %v2733_v58, %v2615_v25  ;;  %v5933_v41 = vpop.eup %3700  ;;  %v2067_v37 = vand.u32 2147483648, %v5833_v8 }
 0x2c4   :  { %v2094_v36 = vmul.f32 %v2093_v18, %v5812_v52  ;;  %v2117_v39 = vmul.f32 %v2116_v30, %v5893_v34  ;;  %v2128_v2 = vmul.f32 %v2127_v38, %v5893_v34  ;;  %vm2062_vm10 = vweird.f32 %v5882_v1 }
 0x2c5   :  { %v2998_v13 = vmul.f32 %v2723_v10, %v6747_v40  ;;  %v2060_v54 = vadd.f32 %v5882_v1, %v2059_v14  ;;  %v2082_v48 = vadd.f32 0.18741608, %v2081_v55  ;;  %v2555_v25 = vmul.f32 %v5922_v7, %v5922_v7 }
 0x2c6   :  { %v5941_v40 = vadd.f32 1.0, %v2094_v36  ;;  %v2118_v35 = vadd.f32 0.0036580483, %v2117_v39  ;;  %v2129_v63 = vadd.f32 0.014752088, %v2128_v2  ;;  %vm2061_vm11 = vweird.f32 %v5833_v8 }
 0x2c7   :  { %v3028_v16 = vpack.c.bf16 %v2999_v21, %v2998_v13  ;;  %v2065_v10 = vand.u32 2147483647, %v5833_v8  ;;  %v2755_v27 = vmul.f32 %v5933_v41, %v5856_v0  ;;  %v2523_v14 = vmul.f32 0.015625, %v2415_v3  ;;  %vm5953_vm12 = vmor %vm2061_vm11, %vm2062_vm10 }
 0x2c8   :  { %v3518_v12 = vclamps-f32 %v2030_v15, 1.0  ;;  %v2045_v58 = vmul.f32 %v2044_v46, %v5679_v50  ;;  %v2746_v55 = vmul.f32 %v5896_v31, %v2745_v5  ;;  %3702 = vrcp.f32 %v5941_v40  ;;  %v2290_v5 = vpop.xlane.xlu2 %2289 }
 0x2c9   :  { %3541 = vmatmul.msk.bf16.gmra.mxu3 %vm2257_vm13, %v3028_v16  ;;  %v2064_v8 = vsel %vm5953_vm12, %v5882_v1, %v2060_v54  ;;  %v2068_v18 = vor.u32 1.1754944e-38, %v2067_v37  ;;  %v2119_v30 = vmul.f32 %v2118_v35, %v5893_v34  ;;  %v2130_v38 = vmul.f32 %v2129_v63, %v5893_v34 }
 0x2ca   :  { %v2083_v50 = vmul.f32 %v2082_v48, %v5812_v52  ;;  %v2587_v46 = vsub.f32 %v2523_v14, %v2555_v25  ;;  %v2330_v15 = vsel %vm2257_vm13, %v5725_v11, 0.0  ;;  %v5968_v13 = vadd.f32 %v5780_v4, %v846_v26 }
 0x2cb   :  { %vm2066_vm14 = vcmp.eq.f32.partialorder %v2065_v10, 8.507059e+37  ;;  %v2756_v21 = vmul.f32 %v5933_v41, %v2755_v27  ;;  %v2120_v36 = vadd.f32 0.05243302, %v2119_v30  ;;  %v2131_v1 = vadd.f32 0.112945676, %v2130_v38  ;;  %2331 = vadd.xlane.f32.xlu0 %v2330_v15  ;;  %v2418_v27 = vpop.xlane.xlu1 %2417 }
 0x2cc   :  { %v2069_v37 = vsel %vm2066_vm14, %v2068_v18, %v2064_v8  ;;  %v5971_v39 = vadd.f32 1e-05, %v2587_v46  ;;  %v5974_v2 = vmul.f32 0.70710677, %v5968_v13  ;;  %v2378_v52 = vmul.f32 %v5725_v11, %v5725_v11  ;;  %v2293_v46 = vpop.xlane.xlu0 %2292 }
 0x2cd   :  { %v5978_v3 = vmul.f32 0.5, %v2746_v55  ;;  %v2121_v4 = vmul.f32 %v2120_v36, %v5893_v34  ;;  %v2132_v54 = vmul.f32 %v2131_v1, %v5893_v34  ;;  %v5982_v48 = vmul.f32 0.015625, %v2290_v5 }
 0x2ce   :  { %v5984_v16 = vpop.eup %3702  ;;  %v2220_v35 = vadd.f32 1.0, %v3518_v12  ;;  %v2084_v63 = vadd.f32 1.1283791, %v2083_v50  ;;  %v2153_v25 = vmul.f32 %v5974_v2, %v5974_v2  ;;  %v2458_v10 = vsel %vm2257_vm13, %v2378_v52, 0.0 }
 0x2cf   :  { %vm2741_vm15 = vweird.f32 %v5743_v22  ;;  %v2070_v14 = vmul.f32 %v2069_v37, %v2045_v58  ;;  %v2097_v26 = vmul.f32 %v5984_v16, %v5941_v40  ;;  %v5992_v23 = vmul.f32 0.5, %v2756_v21  ;;  %2459 = vadd.xlane.f32.xlu2 %v2458_v10 }
 0x2d0   :  { %v2122_v55 = vadd.f32 0.18741608, %v2121_v4  ;;  %vm2751_vm0 = vweird.f32 %v5896_v31  ;;  %v2133_v12 = vadd.f32 0.4994258, %v2132_v54  ;;  %3704 = vrsqrt.f32 %v5971_v39 }
 0x2d1   :  { %v5996_v8 = vmin.f32 %v2153_v25, 16.0  ;;  %v2556_v18 = vmul.f32 %v5982_v48, %v5982_v48  ;;  %vm2740_vm1 = vweird.f32 %v5670_v44  ;;  %v2098_v58 = vsub.f32 1.0, %v2097_v26 }
 0x2d2   :  { %v2123_v30 = vmul.f32 %v2122_v55, %v5893_v34  ;;  %v2524_v38 = vmul.f32 0.015625, %v2418_v27  ;;  %v2333_v50 = vsel %vm2257_vm13, %v5804_v42, 0.0  ;;  %vm2750_vm2 = vweird.f32 %v5830_v43  ;;  %vm6052_vm7 = vmor %vm2740_vm1, %vm2741_vm15 }
 0x2d3   :  { %v2134_v15 = vmul.f32 %v2133_v12, %v5893_v34  ;;  %v2155_v5 = vmul.f32 2.1237322e-06, %v5996_v8  ;;  %v2166_v21 = vmul.f32 3.8918573e-05, %v5996_v8  ;;  %2334 = vadd.xlane.f32.xlu1 %v2333_v50  ;;  %v2379_v36 = vmul.f32 %v5804_v42, %v5804_v42  ;;  %v2421_v50 = vpop.xlane.xlu2 %2420  ;;  %vm6067_vm8 = vmor %vm2750_vm2, %vm2751_vm0 }
 0x2d4   :  { %v2099_v1 = vmul.f32 %v5984_v16, %v2098_v58  ;;  %v2105_v37 = vand.u32 2147483647, %v5941_v40  ;;  %v2107_v52 = vand.u32 2147483648, %v5941_v40  ;;  %v2588_v4 = vsub.f32 %v2524_v38, %v2556_v18 }
 0x2d5   :  { %v6013_v54 = vadd.f32 1.0, %v2134_v15  ;;  %v2156_v25 = vadd.f32 0.00028619796, %v2155_v5  ;;  %v2167_v10 = vadd.f32 0.001143296, %v2166_v21  ;;  %v2461_v34 = vsel %vm2257_vm13, %v2379_v36, 0.0  ;;  %v2299_v21 = vpop.xlane.xlu1 %2298 }
 0x2d6   :  { %v6017_v27 = vmul.f32 %v2220_v35, %v5730_v62  ;;  %v2748_v26 = vsub.f32 1.5, %v5978_v3  ;;  %v2100_v55 = vadd.f32 %v5984_v16, %v2099_v1  ;;  %vm2102_vm3 = vweird.f32 %v5984_v16  ;;  %2462 = vadd.xlane.f32.xlu0 %v2461_v34  ;;  %v6022_v12 = vpop.eup %3704 }
 0x2d7   :  { %v3519_v58 = vclamps-f32 %v2070_v14, 1.0  ;;  %v2085_v18 = vmul.f32 %v2084_v63, %v5789_v51  ;;  %v2124_v38 = vadd.f32 1.1283791, %v2123_v30  ;;  %3706 = vrcp.f32 %v6013_v54 }
 0x2d8   :  { %vm2101_vm4 = vweird.f32 %v5941_v40  ;;  %v2157_v62 = vmul.f32 %v2156_v25, %v5996_v8  ;;  %v2168_v3 = vmul.f32 %v2167_v10, %v5996_v8  ;;  %v2739_v35 = vmul.f32 %v5743_v22, %v2738_v60  ;;  %v2296_v25 = vpop.xlane.xlu0 %2295 }
 0x2d9   :  { %vm6032_vm5 = vmor %vm2101_vm4, %vm2102_vm3  ;;  %vm6036_vm6 = vcmp.eq.f32.partialorder %v2105_v37, 8.507059e+37  ;;  %v2108_v63 = vor.u32 1.1754944e-38, %v2107_v52  ;;  %v2758_v14 = vsub.f32 1.5, %v5992_v23  ;;  %v6041_v40 = vadd.f32 1e-05, %v2588_v4 }
 0x2da   :  { %v2104_v30 = vsel %vm6032_vm5, %v5984_v16, %v2100_v55  ;;  %v2765_v47 = vmul.f32 %v6022_v12, %v5971_v39  ;;  %v2158_v60 = vadd.f32 0.0036580483, %v2157_v62  ;;  %v2169_v5 = vadd.f32 0.014752088, %v2168_v3 }
 0x2db   :  { %v6056_v36 = vadd.f32 1.0, %v3519_v58  ;;  %v6059_v1 = vmul.f32 %v2124_v38, %v5844_v59  ;;  %3708 = vrsqrt.f32 %v6041_v40  ;;  %v2749_v16 = vmul.f32 %v5896_v31, %v2748_v26 }
 0x2dc   :  { %vm2141_vm9 = vweird.f32 %v6013_v54  ;;  %v2145_v44 = vand.u32 2147483647, %v6013_v54  ;;  %v2159_v52 = vmul.f32 %v2158_v60, %v5996_v8  ;;  %v2170_v59 = vmul.f32 %v2169_v5, %v5996_v8 }
 0x2dd   :  { %v2743_v4 = vsel %vm6052_vm7, %v5743_v22, %v2739_v35  ;;  %v3707_v10 = vpop.eup %3706  ;;  %v2109_v43 = vsel %vm6036_vm6, %v2108_v63, %v2104_v30  ;;  %v2753_v34 = vsel %vm6067_vm8, %v5896_v31, %v2749_v16  ;;  %v6083_v26 = vmul.f32 0.015625, %v2293_v46 }
 0x2de   :  { %v2525_v55 = vmul.f32 0.015625, %v2421_v50  ;;  %v2137_v58 = vmul.f32 %v3707_v10, %v6013_v54  ;;  %v2147_v38 = vand.u32 2147483648, %v6013_v54  ;;  %v2766_v62 = vmul.f32 %v6022_v12, %v2765_v47 }
 0x2df   :  { %v2160_v3 = vadd.f32 0.05243302, %v2159_v52  ;;  %v2171_v22 = vadd.f32 0.112945676, %v2170_v59  ;;  %v3000_v35 = vmul.f32 %v2743_v4, %v2616_v19  ;;  %v6758_v15 = vsub.f32 %v4731_v6, %v5773_v61  ;;  %v2424_v61 = vpop.xlane.xlu2 %2423 }
 0x2e0   :  { %v2557_v31 = vmul.f32 %v6083_v26, %v6083_v26  ;;  %v2110_v46 = vmul.f32 %v2109_v43, %v2085_v18  ;;  %vm2761_vm10 = vweird.f32 %v5933_v41  ;;  %v2138_v50 = vsub.f32 1.0, %v2137_v58  ;;  %v2427_v58 = vpop.xlane.xlu0 %2426 }
 0x2e1   :  { %v3001_v51 = vmul.f32 %v2753_v34, %v6758_v15  ;;  %v2161_v63 = vmul.f32 %v2160_v3, %v5996_v8  ;;  %v2336_v30 = vsel %vm2257_vm13, %v5859_v24, 0.0  ;;  %v6100_v47 = vpop.eup %3708  ;;  %v2172_v28 = vmul.f32 %v2171_v22, %v5996_v8 }
 0x2e2   :  { %v2589_v19 = vsub.f32 %v2525_v55, %v2557_v31  ;;  %2337 = vadd.xlane.f32.xlu1 %v2336_v30  ;;  %v2380_v6 = vmul.f32 %v5859_v24, %v5859_v24  ;;  %vm2760_vm11 = vweird.f32 %v5856_v0  ;;  %v2139_v18 = vmul.f32 %v3707_v10, %v2138_v50 }
 0x2e3   :  { %v3029_v57 = vpack.c.bf16 %v3001_v51, %v3000_v35  ;;  %vm2142_vm12 = vweird.f32 %v3707_v10  ;;  %v2767_v60 = vmul.f32 0.5, %v2766_v62  ;;  %v2775_v5 = vmul.f32 %v6100_v47, %v6041_v40  ;;  %vm6153_vm2 = vmor %vm2760_vm11, %vm2761_vm10 }
 0x2e4   :  { %v2173_v16 = vadd.f32 0.4994258, %v2172_v28  ;;  %v6109_v37 = vadd.f32 1e-05, %v2589_v19  ;;  %v2464_v52 = vsel %vm2257_vm13, %v2380_v6, 0.0  ;;  %v6112_v59 = vmul.f32 0.015625, %v2296_v25  ;;  %vm2143_vm14 = vmor %vm2141_vm9, %vm2142_vm12 }
 0x2e5   :  { %3542 = vmatmul.msk.bf16.gmra.mxu3 %vm2257_vm13, %v3029_v57  ;;  %v3520_v4 = vclamps-f32 %v2110_v46, 1.0  ;;  %v2140_v43 = vadd.f32 %v3707_v10, %v2139_v18  ;;  %v2162_v34 = vadd.f32 0.18741608, %v2161_v63  ;;  %2465 = vadd.xlane.f32.xlu0 %v2464_v52  ;;  %v2526_v55 = vmul.f32 0.015625, %v2424_v61  ;;  %v6761_v19 = vld [vmem:[#allocation12_spill] sm:$0xff]  ;;  %v2302_v18 = vpop.xlane.xlu1 %2301 }
 0x2e6   :  { %v2148_v62 = vor.u32 1.1754944e-38, %v2147_v38  ;;  %v2174_v3 = vmul.f32 %v2173_v16, %v5996_v8  ;;  %3710 = vrsqrt.f32 %v6109_v37  ;;  %v2558_v22 = vmul.f32 %v6112_v59, %v6112_v59 }
 0x2e7   :  { %v2144_v25 = vsel %vm2143_vm14, %v3707_v10, %v2140_v43  ;;  %vm2146_vm15 = vcmp.eq.f32.partialorder %v2145_v44, 8.507059e+37  ;;  %v2768_v35 = vsub.f32 1.5, %v2767_v60  ;;  %v2776_v15 = vmul.f32 %v6100_v47, %v2775_v5  ;;  %v2305_v60 = vpop.xlane.xlu2 %2304 }
 0x2e8   :  { %v2149_v51 = vsel %vm2146_vm15, %v2148_v62, %v2144_v25  ;;  %v6122_v31 = vadd.f32 1.0, %v2174_v3  ;;  %v2590_v46 = vsub.f32 %v2526_v55, %v2558_v22  ;;  %v2339_v54 = vsel %vm2257_vm13, %v6017_v27, 0.0 }
 0x2e9   :  { %v2222_v38 = vadd.f32 1.0, %v3520_v4  ;;  %v2150_v50 = vmul.f32 %v2149_v51, %v6059_v1  ;;  %v2163_v63 = vmul.f32 %v2162_v34, %v5996_v8  ;;  %2340 = vadd.xlane.f32.xlu2 %v2339_v54  ;;  %v2381_v10 = vmul.f32 %v6017_v27, %v6017_v27  ;;  %v2430_v34 = vpop.xlane.xlu0 %2429 }
 0x2ea   :  { %v2619_v44 = vsub.f32 %v4747_v20, %v5922_v7  ;;  %vm2770_vm0 = vweird.f32 %v5971_v39  ;;  %vm2771_vm1 = vweird.f32 %v6022_v12  ;;  %3712 = vrcp.f32 %v6122_v31 }
 0x2eb   :  { %v6135_v30 = vmul.f32 0.5, %v2776_v15  ;;  %v6137_v28 = vadd.f32 1e-05, %v2590_v46  ;;  %v2467_v1 = vsel %vm2257_vm13, %v2381_v10, 0.0  ;;  %v2759_v8 = vmul.f32 %v5933_v41, %v2758_v14  ;;  %vm2772_vm3 = vmor %vm2770_vm0, %vm2771_vm1 }
 0x2ec   :  { %v6143_v57 = vpop.eup %3710  ;;  %v6147_v20 = vmul.f32 %v6056_v36, %v5766_v53  ;;  %v2620_v6 = vsub.f32 %v6761_v19, %v5982_v48  ;;  %2468 = vadd.xlane.f32.xlu1 %v2467_v1  ;;  %v2769_v23 = vmul.f32 %v6022_v12, %v2768_v35  ;;  %v6160_v14 = vmul.f32 0.015625, %v2299_v21 }
 0x2ed   :  { %v6163_v61 = vmul.f32 %v2222_v38, %v5865_v9  ;;  %v3521_v53 = vclamps-f32 %v2150_v50, 1.0  ;;  %v2164_v0 = vadd.f32 1.1283791, %v2163_v63  ;;  %v2785_v36 = vmul.f32 %v6143_v57, %v6109_v37  ;;  %v2433_v7 = vpop.xlane.xlu1 %2432 }
 0x2ee   :  { %vm2781_vm4 = vweird.f32 %v6100_v47  ;;  %vm2790_vm5 = vweird.f32 %v6109_v37  ;;  %3714 = vrsqrt.f32 %v6137_v28  ;;  %v2763_v9 = vsel %vm6153_vm2, %v5933_v41, %v2759_v8 }
 0x2ef   :  { %v2773_v5 = vsel %vm2772_vm3, %v6022_v12, %v2769_v23  ;;  %v2559_v39 = vmul.f32 %v6160_v14, %v6160_v14  ;;  %v2778_v21 = vsub.f32 1.5, %v6135_v30  ;;  %v2786_v16 = vmul.f32 %v6143_v57, %v2785_v36 }
 0x2f0   :  { %v6762_v52 = vsub.f32 %v4722_v49, %v5801_v29  ;;  %v3003_v43 = vmul.f32 %v2773_v5, %v2619_v44  ;;  %v3713_v55 = vpop.eup %3712  ;;  %vm2181_vm6 = vweird.f32 %v6122_v31  ;;  %v2527_v62 = vmul.f32 0.015625, %v2427_v58 }
 0x2f1   :  { %v2342_v41 = vsel %vm2257_vm13, %v6147_v20, 0.0  ;;  %v2382_v12 = vmul.f32 %v6147_v20, %v6147_v20  ;;  %v2223_v3 = vadd.f32 1.0, %v3521_v53  ;;  %v2177_v22 = vmul.f32 %v3713_v55, %v6122_v31 }
 0x2f2   :  { %v3002_v4 = vmul.f32 %v2763_v9, %v6762_v52  ;;  %v2787_v25 = vmul.f32 0.5, %v2786_v16  ;;  %2343 = vadd.xlane.f32.xlu2 %v2342_v41  ;;  %v2591_v49 = vsub.f32 %v2527_v62, %v2559_v39  ;;  %v6192_v15 = vmul.f32 0.015625, %v2302_v18  ;;  %v2308_v16 = vpop.xlane.xlu2 %2307 }
 0x2f3   :  { %v2470_v29 = vsel %vm2257_vm13, %v2382_v12, 0.0  ;;  %v2528_v51 = vmul.f32 0.015625, %v2430_v34  ;;  %v2178_v46 = vsub.f32 1.0, %v2177_v22  ;;  %v2345_v54 = vsel %vm2257_vm13, %v6163_v61, 0.0 }
 0x2f4   :  { %v3030_v35 = vpack.c.bf16 %v3003_v43, %v3002_v4  ;;  %v2788_v58 = vsub.f32 1.5, %v2787_v25  ;;  %v2383_v38 = vmul.f32 %v6163_v61, %v6163_v61  ;;  %v6198_v50 = vpop.eup %3714  ;;  %v2187_v63 = vand.u32 2147483648, %v6122_v31  ;;  %2471 = vadd.xlane.f32.xlu1 %v2470_v29  ;;  %2346 = vadd.xlane.f32.xlu0 %v2345_v54 }
 0x2f5   :  { %vm2791_vm7 = vweird.f32 %v6143_v57  ;;  %v6203_v10 = vadd.f32 1e-05, %v2591_v49  ;;  %v2560_v44 = vmul.f32 %v6192_v15, %v6192_v15  ;;  %v6208_v30 = vmul.f32 %v2223_v3, %v5910_v33  ;;  %v2311_v3 = vpop.xlane.xlu0 %2310 }
 0x2f6   :  { %3543 = vmatmul.msk.bf16.gmra.mxu3 %vm2257_vm13, %v3030_v35  ;;  %v2179_v1 = vmul.f32 %v3713_v55, %v2178_v46  ;;  %vm2182_vm8 = vweird.f32 %v3713_v55  ;;  %v2185_v8 = vand.u32 2147483647, %v6122_v31  ;;  %v2473_v53 = vsel %vm2257_vm13, %v2383_v38, 0.0  ;;  %vm6218_vm9 = vmor %vm2790_vm5, %vm2791_vm7 }
 0x2f7   :  { %3716 = vrsqrt.f32 %v6203_v10  ;;  %v2592_v23 = vsub.f32 %v2528_v51, %v2560_v44  ;;  %v2779_v36 = vmul.f32 %v6100_v47, %v2778_v21  ;;  %v2795_v9 = vmul.f32 %v6198_v50, %v6137_v28  ;;  %vm2183_vm10 = vmor %vm2181_vm6, %vm2182_vm8 }
 0x2f8   :  { %v2180_v18 = vadd.f32 %v3713_v55, %v2179_v1  ;;  %v2789_v5 = vmul.f32 %v6143_v57, %v2788_v58  ;;  %v6225_v39 = vmul.f32 0.015625, %v2305_v60  ;;  %v2165_v52 = vmul.f32 %v2164_v0, %v5974_v2 }
 0x2f9   :  { %v2188_v21 = vor.u32 1.1754944e-38, %v2187_v63  ;;  %vm2780_vm11 = vweird.f32 %v6041_v40  ;;  %v2529_v37 = vmul.f32 0.015625, %v2433_v7  ;;  %vm2186_vm12 = vcmp.eq.f32.partialorder %v2185_v8, 8.507059e+37  ;;  %v6767_v40 = vld [vmem:[#allocation13_spill] sm:$0xff] }
 0x2fa   :  { %v2184_v4 = vsel %vm2183_vm10, %v3713_v55, %v2180_v18  ;;  %vm6234_vm14 = vmor %vm2780_vm11, %vm2781_vm4  ;;  %2474 = vadd.xlane.f32.xlu2 %v2473_v53  ;;  %v2793_v2 = vsel %vm6218_vm9, %v6143_v57, %v2789_v5  ;;  %v2561_v31 = vmul.f32 %v6225_v39, %v6225_v39  ;;  %v2621_v60 = vsub.f32 %v6767_v40, %v6083_v26  ;;  %v2439_v1 = vpop.xlane.xlu2 %2438 }
 0x2fb   :  { %v2189_v0 = vsel %vm2186_vm12, %v2188_v21, %v2184_v4  ;;  %v6245_v34 = vadd.f32 1e-05, %v2592_v23  ;;  %v2783_v55 = vsel %vm6234_vm14, %v6100_v47, %v2779_v36  ;;  %v2796_v41 = vmul.f32 %v6198_v50, %v2795_v9 }
 0x2fc   :  { %v2190_v62 = vmul.f32 %v2189_v0, %v2165_v52  ;;  %v2593_v12 = vsub.f32 %v2529_v37, %v2561_v31  ;;  %v2348_v57 = vsel %vm2257_vm13, %v6208_v30, 0.0  ;;  %v3005_v25 = vmul.f32 %v2793_v2, %v2621_v60 }
 0x2fd   :  { %v3717_v22 = vpop.eup %3716  ;;  %v2384_v35 = vmul.f32 %v6208_v30, %v6208_v30  ;;  %v880_v26 = vmul.f32 0.5, %v5968_v13  ;;  %v3004_v47 = vmul.f32 %v2783_v55, %v2620_v6  ;;  %2349 = vadd.xlane.f32.xlu0 %v2348_v57  ;;  %3718 = vrsqrt.f32 %v6245_v34  ;;  %v2436_v13 = vpop.xlane.xlu1 %2435 }
 0x2fe   :  { %v3522_v49 = vclamps-f32 %v2190_v62, 1.0  ;;  %v2805_v29 = vmul.f32 %v3717_v22, %v6203_v10  ;;  %v6261_v51 = vadd.f32 1e-05, %v2593_v12  ;;  %v6264_v58 = vmul.f32 0.015625, %v2308_v16  ;;  %v2314_v37 = vpop.xlane.xlu0 %2313 }
 0x2ff   :  { %v2476_v46 = vsel %vm2257_vm13, %v2384_v35, 0.0  ;;  %v2797_v38 = vmul.f32 0.5, %v2796_v41  ;;  %v6266_v44 = vmul.f32 0.015625, %v2311_v3  ;;  %v3031_v8 = vpack.c.bf16 %v3005_v25, %v3004_v47  ;;  %v6769_v25 = vld [vmem:[#allocation14_spill] sm:$0xff] }
 0x300   :  { %v2224_v54 = vadd.f32 1.0, %v3522_v49  ;;  %v2806_v63 = vmul.f32 %v3717_v22, %v2805_v29  ;;  %3720 = vrsqrt.f32 %v6261_v51  ;;  %v2562_v6 = vmul.f32 %v6264_v58, %v6264_v58 }
 0x301   :  { %v2530_v7 = vmul.f32 0.015625, %v2436_v13  ;;  %v2563_v23 = vmul.f32 %v6266_v44, %v6266_v44  ;;  %v2531_v53 = vmul.f32 0.015625, %v2439_v1  ;;  %v2798_v36 = vsub.f32 1.5, %v2797_v38 }
 0x302   :  { %v6269_v48 = vmul.f32 %v2224_v54, %v880_v26  ;;  %v2807_v19 = vmul.f32 0.5, %v2806_v63  ;;  %2477 = vadd.xlane.f32.xlu2 %v2476_v46  ;;  %vm2811_vm15 = vweird.f32 %v3717_v22  ;;  %vm2801_vm0 = vweird.f32 %v6198_v50  ;;  %v2442_v46 = vpop.xlane.xlu2 %2441 }
 0x303   :  { %v6279_v5 = vpop.eup %3718  ;;  %v2595_v16 = vsub.f32 %v2531_v53, %v2563_v23  ;;  %v2594_v43 = vsub.f32 %v2530_v7, %v2562_v6  ;;  %vm2810_vm1 = vweird.f32 %v6203_v10  ;;  %v2799_v0 = vmul.f32 %v6198_v50, %v2798_v36  ;;  %v6768_v10 = vld [vmem:[#allocation15_spill] sm:$0xff]  ;;  %v6322_v7 = vld [vmem:[%s6623_s7] ss:$0 sm:$0xff]  ;;  %s3865_s7 = smov [#allocation8]  }
 0x304   :  { %v2808_v18 = vsub.f32 1.5, %v2807_v19  ;;  %v2351_v33 = vsel %vm2257_vm13, %v6269_v48, 0.0  ;;  %v2385_v9 = vmul.f32 %v6269_v48, %v6269_v48  ;;  %v2815_v2 = vmul.f32 %v6279_v5, %v6245_v34  ;;  %vm2812_vm2 = vmor %vm2810_vm1, %vm2811_vm15  ;;  %s3251_s28 = sshll.u32 %s3865_s7, 4  ;;  %s3252_s28 = int_to_ptr.vmem [resolvable:$true] %s3251_s28 }
 0x305   :  { %2352 = vadd.xlane.f32.xlu1 %v2351_v33  ;;  %v6292_v40 = vadd.f32 1e-05, %v2595_v16  ;;  %vm2800_vm3 = vweird.f32 %v6137_v28  ;;  %v2317_v62 = vpop.xlane.xlu1 %2316  ;;  %v2623_v41 = vsub.f32 %v6768_v10, %v6160_v14  ;;  %v6298_v12 = vadd.f32 1e-05, %v2594_v43 }
 0x306   :  { %3544 = vmatmul.msk.bf16.gmra.mxu3 %vm2257_vm13, %v3031_v8  ;;  %v2479_v52 = vsel %vm2257_vm13, %v2385_v9, 0.0  ;;  %v2809_v21 = vmul.f32 %v3717_v22, %v2808_v18  ;;  %v6283_v4 = vpop.eup %3720  ;;  %vm2802_vm4 = vmor %vm2800_vm3, %vm2801_vm0  ;;  %v2816_v57 = vmul.f32 %v6279_v5, %v2815_v2  ;;  %v2622_v35 = vsub.f32 %v6769_v25, %v6112_v59  ;;  %v2445_v49 = vpop.xlane.xlu0 %2444 }
 0x307   :  { %2480 = vadd.xlane.f32.xlu0 %v2479_v52  ;;  %v2825_v31 = vmul.f32 %v6283_v4, %v6261_v51  ;;  %v2803_v3 = vsel %vm2802_vm4, %v6198_v50, %v2799_v0  ;;  %3722 = vrsqrt.f32 %v6292_v40  ;;  %v6305_v28 = vmul.f32 0.015625, %v2317_v62  ;;  %v6771_v62 = vld [vmem:[#allocation16_spill] sm:$0xff] }
 0x308   :  { %v2813_v55 = vsel %vm2812_vm2, %v3717_v22, %v2809_v21  ;;  %3724 = vrsqrt.f32 %v6298_v12  ;;  %v3006_v29 = vmul.f32 %v2803_v3, %v2622_v35  ;;  %v6308_v14 = vmul.f32 0.015625, %v2314_v37 }
 0x309   :  { %v2826_v60 = vmul.f32 %v6283_v4, %v2825_v31  ;;  %v3007_v26 = vmul.f32 %v2813_v55, %v2623_v41  ;;  %v2817_v47 = vmul.f32 0.5, %v2816_v57  ;;  %v2565_v50 = vmul.f32 %v6305_v28, %v6305_v28 }
 0x30a   :  { %v2533_v38 = vmul.f32 0.015625, %v2445_v49  ;;  %v2564_v13 = vmul.f32 %v6308_v14, %v6308_v14  ;;  %v2532_v1 = vmul.f32 0.015625, %v2442_v46  ;;  %vm2831_vm5 = vweird.f32 %v6283_v4  ;;  %v3135_v18 = vpop.f32.mrf.mxu3  ;;  %v2323_v2 = vpop.xlane.xlu2 %2322 }
 0x30b   :  { %v2827_v22 = vmul.f32 0.5, %v2826_v60  ;;  %v3032_v54 = vpack.c.bf16 %v3007_v26, %v3006_v29  ;;  %v2818_v8 = vsub.f32 1.5, %v2817_v47  ;;  %vm2821_vm6 = vweird.f32 %v6279_v5 }
 0x30c   :  { %v2597_v6 = vsub.f32 %v2533_v38, %v2565_v50  ;;  %v2596_v33 = vsub.f32 %v2532_v1, %v2564_v13  ;;  %vm2830_vm7 = vweird.f32 %v6261_v51  ;;  %v3136_v21 = vadd.f32 %v6322_v7, %v3135_v18  ;;  %v6770_v51 = vld [vmem:[#allocation17_spill] sm:$0xff] }
 0x30d   :  { %v2828_v59 = vsub.f32 1.5, %v2827_v22  ;;  %v6312_v63 = vpop.eup %3722  ;;  %v2320_v36 = vpop.xlane.xlu1 %2319  ;;  %v2819_v16 = vmul.f32 %v6279_v5, %v2818_v8  ;;  %vm2832_vm8 = vmor %vm2830_vm7, %vm2831_vm5  ;;  %vm2820_vm9 = vweird.f32 %v6245_v34  ;;  %v2625_v31 = vsub.f32 %v6770_v51, %v6225_v39 }
 0x30e   :  { %v6316_v19 = vpop.eup %3724  ;;  %v2845_v23 = vmul.f32 %v6312_v63, %v6292_v40  ;;  %v6333_v52 = vadd.f32 1e-05, %v2597_v6  ;;  %vm2822_vm10 = vmor %vm2820_vm9, %vm2821_vm6  ;;  %v6341_v0 = vadd.f32 1e-05, %v2596_v33  ;;  %3215 = vst [vmem:[#allocation8] sm:$0xff] %v3136_v21  ;;  %v2624_v10 = vsub.f32 %v6771_v62, %v6192_v15  ;;  %v6772_v33 = vld [vmem:[#allocation19_spill] sm:$0xff] }
 0x30f   :  { %v2829_v53 = vmul.f32 %v6283_v4, %v2828_v59  ;;  %v2835_v9 = vmul.f32 %v6316_v19, %v6298_v12  ;;  %v2823_v55 = vsel %vm2822_vm10, %v6279_v5, %v2819_v16  ;;  %v6348_v41 = vmul.f32 0.015625, %v2323_v2  ;;  %v2448_v5 = vpop.xlane.xlu0 %2447 }
 0x310   :  { %v2846_v37 = vmul.f32 %v6312_v63, %v2845_v23  ;;  %3726 = vrsqrt.f32 %v6333_v52  ;;  %v3008_v39 = vmul.f32 %v2823_v55, %v2624_v10  ;;  %v6351_v25 = vmul.f32 0.015625, %v2320_v36 }
 0x311   :  { %v2833_v43 = vsel %vm2832_vm8, %v6283_v4, %v2829_v53  ;;  %v2836_v60 = vmul.f32 %v6316_v19, %v2835_v9  ;;  %3728 = vrsqrt.f32 %v6341_v0  ;;  %v2567_v15 = vmul.f32 %v6348_v41, %v6348_v41 }
 0x312   :  { %v3009_v34 = vmul.f32 %v2833_v43, %v2625_v31  ;;  %v2847_v4 = vmul.f32 0.5, %v2846_v37  ;;  %v3137_v3 = vpop.f32.mrf.mxu3  ;;  %v2566_v46 = vmul.f32 %v6351_v25, %v6351_v25  ;;  %vm2851_vm11 = vweird.f32 %v6312_v63  ;;  %v6773_v43 = vld [vmem:[#allocation18_spill] sm:$0xff] }
 0x313   :  { %v3138_v35 = vadd.f32 %v6322_v7, %v3137_v3  ;;  %v2837_v26 = vmul.f32 0.5, %v2836_v60  ;;  %vm2841_vm12 = vweird.f32 %v6316_v19  ;;  %vm2850_vm14 = vweird.f32 %v6292_v40 }
 0x314   :  { %v3033_v22 = vpack.c.bf16 %v3009_v34, %v3008_v39  ;;  %v2848_v29 = vsub.f32 1.5, %v2847_v4  ;;  %vm2852_vm15 = vmor %vm2850_vm14, %vm2851_vm11  ;;  %vm2840_vm0 = vweird.f32 %v6298_v12  ;;  %v2627_v9 = vsub.f32 %v6772_v33, %v6266_v44 }
 0x315   :  { %v2451_v57 = vpop.xlane.xlu1 %2450  ;;  %3216 = vst [vmem:[#allocation8 + $0x8] sm:$0xff] %v3138_v35  ;;  %v2838_v50 = vsub.f32 1.5, %v2837_v26  ;;  %vm2842_vm1 = vmor %vm2840_vm0, %vm2841_vm12  ;;  %v2626_v2 = vsub.f32 %v6773_v43, %v6264_v58  ;;  %vm2870_vm4 = vweird.f32 %v6333_v52  ;;  %vm2860_vm6 = vweird.f32 %v6341_v0 }
 0x316   :  { %3545 = vmatmul.msk.bf16.gmra.mxu3 %vm2257_vm13, %v3032_v54  ;;  %v2535_v49 = vmul.f32 0.015625, %v2451_v57  ;;  %v6356_v47 = vpop.eup %3726  ;;  %v2534_v54 = vmul.f32 0.015625, %v2448_v5  ;;  %v2849_v1 = vmul.f32 %v6312_v63, %v2848_v29 }
 0x317   :  { %v6360_v38 = vpop.eup %3728  ;;  %v2865_v13 = vmul.f32 %v6356_v47, %v6333_v52  ;;  %v2839_v23 = vmul.f32 %v6316_v19, %v2838_v50  ;;  %vm2871_vm2 = vweird.f32 %v6356_v47  ;;  %v6774_v52 = vld [vmem:[#allocation21_spill] sm:$0xff] }
 0x318   :  { %v2599_v59 = vsub.f32 %v2535_v49, %v2567_v15  ;;  %v2598_v8 = vsub.f32 %v2534_v54, %v2566_v46  ;;  %v2855_v6 = vmul.f32 %v6360_v38, %v6341_v0  ;;  %v2853_v18 = vsel %vm2852_vm15, %v6312_v63, %v2849_v1  ;;  %vm2872_vm5 = vmor %vm2870_vm4, %vm2871_vm2 }
 0x319   :  { %v2866_v36 = vmul.f32 %v6356_v47, %v2865_v13  ;;  %v2843_v21 = vsel %vm2842_vm1, %v6316_v19, %v2839_v23  ;;  %v3011_v51 = vmul.f32 %v2853_v18, %v2627_v9  ;;  %vm2861_vm3 = vweird.f32 %v6360_v38  ;;  %v6775_v9 = vld [vmem:[#allocation20_spill] sm:$0xff] }
 0x31a   :  { %v6372_v53 = vadd.f32 1e-05, %v2599_v59  ;;  %v6379_v16 = vadd.f32 1e-05, %v2598_v8  ;;  %v2856_v40 = vmul.f32 %v6360_v38, %v2855_v6  ;;  %v3010_v44 = vmul.f32 %v2843_v21, %v2626_v2  ;;  %vm2862_vm7 = vmor %vm2860_vm6, %vm2861_vm3 }
 0x31b   :  { %v2867_v63 = vmul.f32 0.5, %v2866_v36  ;;  %v2629_v23 = vsub.f32 %v6774_v52, %v6305_v28  ;;  %v2628_v0 = vsub.f32 %v6775_v9, %v6308_v14 }
 0x31c   :  { %3730 = vrsqrt.f32 %v6372_v53  ;;  %v2857_v62 = vmul.f32 0.5, %v2856_v40  ;;  %v3034_v34 = vpack.c.bf16 %v3011_v51, %v3010_v44  ;;  %vm2890_vm10 = vweird.f32 %v6372_v53 }
 0x31d   :  { %v2326_v37 = vpop.xlane.xlu2 %2325  ;;  %3732 = vrsqrt.f32 %v6379_v16  ;;  %v2868_v58 = vsub.f32 1.5, %v2867_v63  ;;  %vm2880_vm12 = vweird.f32 %v6379_v16 }
 0x31e   :  { %v6388_v55 = vmul.f32 0.015625, %v2326_v37  ;;  %v2858_v39 = vsub.f32 1.5, %v2857_v62 }
 0x31f   :  { %v2869_v15 = vmul.f32 %v6356_v47, %v2868_v58 }
 0x320   :  { %v2568_v57 = vmul.f32 %v6388_v55, %v6388_v55  ;;  %v2859_v50 = vmul.f32 %v6360_v38, %v2858_v39 }
 0x321   :  { %v2873_v8 = vsel %vm2872_vm5, %v6356_v47, %v2869_v15 }
 0x322   :  { %v6392_v4 = vpop.eup %3730  ;;  %v2863_v33 = vsel %vm2862_vm7, %v6360_v38, %v2859_v50  ;;  %v3013_v40 = vmul.f32 %v2873_v8, %v2629_v23 }
 0x323   :  { %v2454_v10 = vpop.xlane.xlu1 %2453  ;;  %v6398_v26 = vpop.eup %3732  ;;  %v3012_v21 = vmul.f32 %v2863_v33, %v2628_v0  ;;  %vm2891_vm8 = vweird.f32 %v6392_v4 }
 0x324   :  { %v2536_v3 = vmul.f32 0.015625, %v2454_v10  ;;  %v2875_v54 = vmul.f32 %v6398_v26, %v6379_v16  ;;  %vm2881_vm9 = vweird.f32 %v6398_v26  ;;  %vm2892_vm11 = vmor %vm2890_vm10, %vm2891_vm8  ;;  %v2630_v16 = vsub.f32 %v5381_v32, %v6351_v25 }
 0x325   :  { %v3035_v43 = vpack.c.bf16 %v3013_v40, %v3012_v21  ;;  %vm2882_vm14 = vmor %vm2880_vm12, %vm2881_vm9 }
 0x326   :  { %3546 = vmatmul.msk.bf16.gmra.mxu3 %vm2257_vm13, %v3033_v22  ;;  %v2329_v12 = vpop.xlane.xlu0 %2328  ;;  %v2885_v22 = vmul.f32 %v6392_v4, %v6372_v53  ;;  %v2600_v29 = vsub.f32 %v2536_v3, %v2568_v57  ;;  %v2876_v18 = vmul.f32 %v6398_v26, %v2875_v54  ;;  %v2631_v53 = vsub.f32 %v5438_v56, %v6348_v41 }
 0x327   :  { %v6390_v19 = vmul.f32 0.015625, %v2329_v12 }
 0x328   :  { %v2886_v1 = vmul.f32 %v6392_v4, %v2885_v22  ;;  %v6418_v36 = vadd.f32 1e-05, %v2600_v29  ;;  %v2877_v37 = vmul.f32 0.5, %v2876_v18 }
 0x329   :  { %v2569_v35 = vmul.f32 %v6390_v19, %v6390_v19 }
 0x32a   :  { %v2887_v47 = vmul.f32 0.5, %v2886_v1  ;;  %vm2900_vm3 = vweird.f32 %v6418_v36 }
 0x32b   :  { %v3140_v31 = vpop.f32.mrf.mxu3 }
 0x32c   :  { %v3141_v60 = vadd.f32 %v6322_v7, %v3140_v31  ;;  %v2888_v28 = vsub.f32 1.5, %v2887_v47  ;;  %v2878_v31 = vsub.f32 1.5, %v2877_v37 }
 0x32e   :  { %3217 = vst [vmem:[#allocation8 + $0x10] sm:$0xff] %v3141_v60  ;;  %v2889_v62 = vmul.f32 %v6392_v4, %v2888_v28  ;;  %v2879_v58 = vmul.f32 %v6398_v26, %v2878_v31 }
 0x330   :  { %v2883_v29 = vsel %vm2882_vm14, %v6398_v26, %v2879_v58 }
 0x331   :  { %v3014_v41 = vmul.f32 %v2883_v29, %v2630_v16 }
 0x332   :  { %v2457_v5 = vpop.xlane.xlu2 %2456 }
 0x333   :  { %v2537_v49 = vmul.f32 0.015625, %v2457_v5  ;;  %v3142_v46 = vpop.f32.mrf.mxu3 }
 0x334   :  { %v3143_v13 = vadd.f32 %v6322_v7, %v3142_v46 }
 0x335   :  { %v2601_v59 = vsub.f32 %v2537_v49, %v2569_v35  ;;  %v2893_v35 = vsel %vm2892_vm11, %v6392_v4, %v2889_v62 }
 0x336   :  { %3547 = vmatmul.msk.bf16.gmra.mxu3 %vm2257_vm13, %v3034_v34  ;;  %3218 = vst [vmem:[#allocation8 + $0x18] sm:$0xff] %v3143_v13  ;;  %v3015_v54 = vmul.f32 %v2893_v35, %v2631_v53 }
 0x337   :  { %v6414_v6 = vadd.f32 1e-05, %v2601_v59 }
 0x338   :  { %v3036_v8 = vpack.c.bf16 %v3015_v54, %v3014_v41 }
 0x339   :  { %3734 = vrsqrt.f32 %v6414_v6  ;;  %vm2910_vm1 = vweird.f32 %v6414_v6 }
 0x33a   :  { %3736 = vrsqrt.f32 %v6418_v36 }
 0x33e   :  { %v2332_v2 = vpop.xlane.xlu0 %2331 }
 0x33f   :  { %v6426_v51 = vmul.f32 0.015625, %v2332_v2  ;;  %v6428_v12 = vpop.eup %3734 }
 0x340   :  { %v6432_v14 = vpop.eup %3736  ;;  %v2905_v60 = vmul.f32 %v6428_v12, %v6414_v6  ;;  %vm2911_vm15 = vweird.f32 %v6428_v12  ;;  %v2633_v6 = vsub.f32 %v5654_v17, %v6390_v19 }
 0x341   :  { %v2570_v38 = vmul.f32 %v6426_v51, %v6426_v51  ;;  %v2895_v10 = vmul.f32 %v6432_v14, %v6418_v36  ;;  %vm2901_vm0 = vweird.f32 %v6432_v14  ;;  %vm2912_vm2 = vmor %vm2910_vm1, %vm2911_vm15 }
 0x342   :  { %v2460_v63 = vpop.xlane.xlu2 %2459  ;;  %v2906_v39 = vmul.f32 %v6428_v12, %v2905_v60  ;;  %vm2902_vm4 = vmor %vm2900_vm3, %vm2901_vm0 }
 0x343   :  { %v2538_v44 = vmul.f32 0.015625, %v2460_v63  ;;  %v2896_v49 = vmul.f32 %v6432_v14, %v2895_v10 }
 0x344   :  { %v2907_v50 = vmul.f32 0.5, %v2906_v39 }
 0x345   :  { %v2602_v34 = vsub.f32 %v2538_v44, %v2570_v38  ;;  %v2897_v13 = vmul.f32 0.5, %v2896_v49  ;;  %v2632_v44 = vsub.f32 %v5549_v45, %v6388_v55 }
 0x346   :  { %3548 = vmatmul.msk.bf16.gmra.mxu3 %vm2257_vm13, %v3035_v43  ;;  %v2335_v57 = vpop.xlane.xlu1 %2334  ;;  %v2908_v52 = vsub.f32 1.5, %v2907_v50 }
 0x347   :  { %v6444_v3 = vmul.f32 0.015625, %v2335_v57  ;;  %v6451_v5 = vadd.f32 1e-05, %v2602_v34  ;;  %v2898_v26 = vsub.f32 1.5, %v2897_v13 }
 0x348   :  { %v2909_v33 = vmul.f32 %v6428_v12, %v2908_v52 }
 0x349   :  { %v2571_v22 = vmul.f32 %v6444_v3, %v6444_v3  ;;  %v2463_v15 = vpop.xlane.xlu0 %2462  ;;  %3738 = vrsqrt.f32 %v6451_v5  ;;  %v2899_v47 = vmul.f32 %v6432_v14, %v2898_v26  ;;  %vm2920_vm9 = vweird.f32 %v6451_v5 }
 0x34a   :  { %v2539_v46 = vmul.f32 0.015625, %v2463_v15  ;;  %v2913_v28 = vsel %vm2912_vm2, %v6428_v12, %v2909_v33  ;;  %v2635_v52 = vsub.f32 %v5804_v42, %v6444_v3  ;;  %v2634_v33 = vsub.f32 %v5725_v11, %v6426_v51 }
 0x34b   :  { %v2903_v60 = vsel %vm2902_vm4, %v6432_v14, %v2899_v47  ;;  %v3017_v62 = vmul.f32 %v2913_v28, %v2633_v6 }
 0x34c   :  { %v3145_v4 = vpop.f32.mrf.mxu3  ;;  %v2603_v56 = vsub.f32 %v2539_v46, %v2571_v22  ;;  %v3016_v58 = vmul.f32 %v2903_v60, %v2632_v44 }
 0x34d   :  { %v3146_v59 = vadd.f32 %v6322_v7, %v3145_v4 }
 0x34e   :  { %v6461_v1 = vadd.f32 1e-05, %v2603_v56  ;;  %v3037_v39 = vpack.c.bf16 %v3017_v62, %v3016_v58 }
 0x34f   :  { %3219 = vst [vmem:[#allocation8 + $0x20] sm:$0xff] %v3146_v59  ;;  %v6464_v23 = vpop.eup %3738 }
 0x350   :  { %3740 = vrsqrt.f32 %v6461_v1  ;;  %v2915_v40 = vmul.f32 %v6464_v23, %v6451_v5  ;;  %vm2930_vm6 = vweird.f32 %v6461_v1  ;;  %vm2921_vm7 = vweird.f32 %v6464_v23 }
 0x351   :  { %vm2922_vm10 = vmor %vm2920_vm9, %vm2921_vm7 }
 0x352   :  { %v2916_v38 = vmul.f32 %v6464_v23, %v2915_v40 }
 0x354   :  { %v3147_v32 = vpop.f32.mrf.mxu3  ;;  %v2917_v57 = vmul.f32 0.5, %v2916_v38 }
 0x355   :  { %v2338_v25 = vpop.xlane.xlu1 %2337  ;;  %v3148_v18 = vadd.f32 %v6322_v7, %v3147_v32 }
 0x356   :  { %3549 = vmatmul.msk.bf16.gmra.mxu3 %vm2257_vm13, %v3036_v8  ;;  %v6470_v9 = vmul.f32 0.015625, %v2338_v25  ;;  %v6472_v0 = vpop.eup %3740  ;;  %v2918_v45 = vsub.f32 1.5, %v2917_v57 }
 0x357   :  { %3220 = vst [vmem:[#allocation8 + $0x28] sm:$0xff] %v3148_v18  ;;  %v2925_v21 = vmul.f32 %v6472_v0, %v6461_v1  ;;  %vm2931_vm5 = vweird.f32 %v6472_v0 }
 0x358   :  { %v2572_v37 = vmul.f32 %v6470_v9, %v6470_v9  ;;  %v2466_v43 = vpop.xlane.xlu0 %2465  ;;  %v2919_v46 = vmul.f32 %v6464_v23, %v2918_v45  ;;  %vm6516_vm8 = vmor %vm2930_vm6, %vm2931_vm5 }
 0x359   :  { %v2540_v2 = vmul.f32 0.015625, %v2466_v43  ;;  %v2926_v31 = vmul.f32 %v6472_v0, %v2925_v21 }
 0x35a   :  { %v2923_v25 = vsel %vm2922_vm10, %v6464_v23, %v2919_v46 }
 0x35b   :  { %v2604_v63 = vsub.f32 %v2540_v2, %v2572_v37  ;;  %v2927_v36 = vmul.f32 0.5, %v2926_v31  ;;  %v3018_v3 = vmul.f32 %v2923_v25, %v2634_v33 }
 0x35c   :  { %v2341_v10 = vpop.xlane.xlu2 %2340 }
 0x35d   :  { %v6492_v34 = vadd.f32 1e-05, %v2604_v63  ;;  %v6494_v12 = vmul.f32 0.015625, %v2341_v10  ;;  %v2928_v35 = vsub.f32 1.5, %v2927_v36 }
 0x35f   :  { %3742 = vrsqrt.f32 %v6492_v34  ;;  %v2573_v17 = vmul.f32 %v6494_v12, %v6494_v12  ;;  %v2469_v19 = vpop.xlane.xlu1 %2468  ;;  %v2929_v49 = vmul.f32 %v6472_v0, %v2928_v35  ;;  %vm2940_vm0 = vweird.f32 %v6492_v34 }
 0x360   :  { %v2541_v14 = vmul.f32 0.015625, %v2469_v19  ;;  %v2637_v46 = vsub.f32 %v6017_v27, %v6494_v12 }
 0x361   :  { %v2933_v1 = vsel %vm6516_vm8, %v6472_v0, %v2929_v49 }
 0x362   :  { %v2605_v53 = vsub.f32 %v2541_v14, %v2573_v17  ;;  %v3019_v40 = vmul.f32 %v2933_v1, %v2635_v52 }
 0x364   :  { %v6500_v55 = vadd.f32 1e-05, %v2605_v53  ;;  %v3038_v6 = vpack.c.bf16 %v3019_v40, %v3018_v3 }
 0x365   :  { %v2344_v22 = vpop.xlane.xlu2 %2343  ;;  %v6502_v15 = vpop.eup %3742 }
 0x366   :  { %3550 = vmatmul.msk.bf16.gmra.mxu3 %vm2257_vm13, %v3037_v39  ;;  %v6506_v29 = vmul.f32 0.015625, %v2344_v22  ;;  %3744 = vrsqrt.f32 %v6500_v55  ;;  %v2935_v16 = vmul.f32 %v6502_v15, %v6492_v34  ;;  %vm2941_vm12 = vweird.f32 %v6502_v15 }
 0x367   :  { %v2472_v50 = vpop.xlane.xlu1 %2471  ;;  %v2347_v13 = vpop.xlane.xlu0 %2346  ;;  %vm2950_vm14 = vweird.f32 %v6500_v55  ;;  %vm2942_vm1 = vmor %vm2940_vm0, %vm2941_vm12  ;;  %v2636_v34 = vsub.f32 %v5859_v24, %v6470_v9 }
 0x368   :  { %v3150_v54 = vpop.f32.mrf.mxu3  ;;  %v2574_v4 = vmul.f32 %v6506_v29, %v6506_v29  ;;  %v2542_v41 = vmul.f32 0.015625, %v2472_v50  ;;  %v6525_v8 = vmul.f32 0.015625, %v2347_v13  ;;  %v2936_v32 = vmul.f32 %v6502_v15, %v2935_v16 }
 0x369   :  { %v3151_v56 = vadd.f32 %v6322_v7, %v3150_v54 }
 0x36a   :  { %v2606_v26 = vsub.f32 %v2542_v41, %v2574_v4  ;;  %v2575_v18 = vmul.f32 %v6525_v8, %v6525_v8  ;;  %v2937_v37 = vmul.f32 0.5, %v2936_v32 }
 0x36b   :  { %3221 = vst [vmem:[#allocation8 + $0x30] sm:$0xff] %v3151_v56 }
 0x36c   :  { %v3745_v5 = vpop.eup %3744  ;;  %v6535_v0 = vadd.f32 1e-05, %v2606_v26  ;;  %v2938_v63 = vsub.f32 1.5, %v2937_v37 }
 0x36d   :  { %v2475_v47 = vpop.xlane.xlu2 %2474  ;;  %v2945_v21 = vmul.f32 %v3745_v5, %v6500_v55  ;;  %vm2951_vm11 = vweird.f32 %v3745_v5 }
 0x36e   :  { %v2543_v42 = vmul.f32 0.015625, %v2475_v47  ;;  %3746 = vrsqrt.f32 %v6535_v0  ;;  %v2939_v57 = vmul.f32 %v6502_v15, %v2938_v63  ;;  %vm6552_vm15 = vmor %vm2950_vm14, %vm2951_vm11  ;;  %vm2960_vm6 = vweird.f32 %v6535_v0 }
 0x36f   :  { %v2946_v43 = vmul.f32 %v3745_v5, %v2945_v21 }
 0x370   :  { %v3152_v23 = vpop.f32.mrf.mxu3  ;;  %v2607_v2 = vsub.f32 %v2543_v42, %v2575_v18  ;;  %v2350_v31 = vpop.xlane.xlu0 %2349  ;;  %v2943_v59 = vsel %vm2942_vm1, %v6502_v15, %v2939_v57 }
 0x371   :  { %v3153_v28 = vadd.f32 %v6322_v7, %v3152_v23  ;;  %v2947_v38 = vmul.f32 0.5, %v2946_v43  ;;  %v6540_v51 = vmul.f32 0.015625, %v2350_v31  ;;  %v3020_v27 = vmul.f32 %v2943_v59, %v2636_v34 }
 0x372   :  { %v2671_v11 = vadd.f32 1e-05, %v2607_v2  ;;  %v2639_v43 = vsub.f32 %v6163_v61, %v6525_v8 }
 0x373   :  { %3222 = vst [vmem:[#allocation8 + $0x38] sm:$0xff] %v3153_v28  ;;  %v2948_v60 = vsub.f32 1.5, %v2947_v38  ;;  %v2576_v44 = vmul.f32 %v6540_v51, %v6540_v51 }
 0x374   :  { %3748 = vrsqrt.f32 %v2671_v11  ;;  %v6544_v62 = vpop.eup %3746  ;;  %vm2970_vm4 = vweird.f32 %v2671_v11 }
 0x375   :  { %v2478_v10 = vpop.xlane.xlu2 %2477  ;;  %v2949_v36 = vmul.f32 %v3745_v5, %v2948_v60  ;;  %v2955_v17 = vmul.f32 %v6544_v62, %v6535_v0  ;;  %vm2961_vm3 = vweird.f32 %v6544_v62 }
 0x376   :  { %3551 = vmatmul.msk.bf16.gmra.mxu3 %vm2257_vm13, %v3038_v6  ;;  %v2544_v58 = vmul.f32 0.015625, %v2478_v10  ;;  %vm2962_vm7 = vmor %vm2960_vm6, %vm2961_vm3  ;;  %v2638_v6 = vsub.f32 %v6147_v20, %v6506_v29 }
 0x377   :  { %v2953_v55 = vsel %vm6552_vm15, %v3745_v5, %v2949_v36  ;;  %v2956_v50 = vmul.f32 %v6544_v62, %v2955_v17  ;;  %v2640_v17 = vsub.f32 %v6208_v30, %v6540_v51 }
 0x378   :  { %v2608_v39 = vsub.f32 %v2544_v58, %v2576_v44  ;;  %v2353_v14 = vpop.xlane.xlu1 %2352  ;;  %v3021_v41 = vmul.f32 %v2953_v55, %v2637_v46 }
 0x379   :  { %v3155_v19 = vpop.f32.mrf.mxu3  ;;  %v6557_v45 = vmul.f32 0.015625, %v2353_v14  ;;  %v2957_v52 = vmul.f32 0.5, %v2956_v50 }
 0x37a   :  { %v3156_v53 = vadd.f32 %v6322_v7, %v3155_v19  ;;  %v3749_v22 = vpop.eup %3748  ;;  %v2481_v49 = vpop.xlane.xlu0 %2480  ;;  %v6564_v54 = vadd.f32 1e-05, %v2608_v39  ;;  %v3039_v25 = vpack.c.bf16 %v3021_v41, %v3020_v27 }
 0x37b   :  { %v2965_v16 = vmul.f32 %v3749_v22, %v2671_v11  ;;  %v2577_v4 = vmul.f32 %v6557_v45, %v6557_v45  ;;  %v2545_v13 = vmul.f32 0.015625, %v2481_v49  ;;  %v2958_v15 = vsub.f32 1.5, %v2957_v52 }
 0x37c   :  { %3223 = vst [vmem:[#allocation8 + $0x40] sm:$0xff] %v3156_v53  ;;  %3750 = vrsqrt.f32 %v6564_v54  ;;  %vm2971_vm2 = vweird.f32 %v3749_v22  ;;  %vm2980_vm12 = vweird.f32 %v6564_v54  ;;  %v2641_v58 = vsub.f32 %v6269_v48, %v6557_v45 }
 0x37d   :  { %v2966_v56 = vmul.f32 %v3749_v22, %v2965_v16  ;;  %v2609_v12 = vsub.f32 %v2545_v13, %v2577_v4  ;;  %v2959_v9 = vmul.f32 %v6544_v62, %v2958_v15  ;;  %vm2972_vm5 = vmor %vm2970_vm4, %vm2971_vm2 }
 0x37f   :  { %v2967_v1 = vmul.f32 0.5, %v2966_v56  ;;  %v2673_v18 = vadd.f32 1e-05, %v2609_v12  ;;  %v2963_v28 = vsel %vm2962_vm7, %v6544_v62, %v2959_v9 }
 0x380   :  { %v3022_v11 = vmul.f32 %v2963_v28, %v2638_v6 }
 0x381   :  { %v3157_v26 = vpop.f32.mrf.mxu3  ;;  %v2968_v5 = vsub.f32 1.5, %v2967_v1  ;;  %3752 = vrsqrt.f32 %v2673_v18  ;;  %vm2990_vm10 = vweird.f32 %v2673_v18 }
 0x382   :  { %v3158_v32 = vadd.f32 %v6322_v7, %v3157_v26  ;;  %v3751_v33 = vpop.eup %3750 }
 0x383   :  { %v2969_v24 = vmul.f32 %v3749_v22, %v2968_v5  ;;  %v2975_v40 = vmul.f32 %v3751_v33, %v6564_v54  ;;  %vm2981_vm9 = vweird.f32 %v3751_v33 }
 0x384   :  { %3224 = vst [vmem:[#allocation8 + $0x48] sm:$0xff] %v3158_v32  ;;  %vm2982_vm14 = vmor %vm2980_vm12, %vm2981_vm9 }
 0x385   :  { %v2973_v37 = vsel %vm2972_vm5, %v3749_v22, %v2969_v24  ;;  %v2976_v23 = vmul.f32 %v3751_v33, %v2975_v40 }
 0x386   :  { %3552 = vmatmul.msk.bf16.gmra.mxu3 %vm2257_vm13, %v3039_v25  ;;  %v3023_v31 = vmul.f32 %v2973_v37, %v2639_v43 }
 0x387   :  { %v3753_v21 = vpop.eup %3752  ;;  %v2977_v63 = vmul.f32 0.5, %v2976_v23 }
 0x388   :  { %v2985_v3 = vmul.f32 %v3753_v21, %v2673_v18  ;;  %v3040_v44 = vpack.c.bf16 %v3023_v31, %v3022_v11  ;;  %vm2991_vm8 = vweird.f32 %v3753_v21 }
 0x389   :  { %v3160_v47 = vpop.f32.mrf.mxu3  ;;  %v2978_v36 = vsub.f32 1.5, %v2977_v63  ;;  %vm2992_vm11 = vmor %vm2990_vm10, %vm2991_vm8 }
 0x38a   :  { %v3161_v42 = vadd.f32 %v6322_v7, %v3160_v47  ;;  %v2986_v2 = vmul.f32 %v3753_v21, %v2985_v3 }
 0x38b   :  { %v2979_v8 = vmul.f32 %v3751_v33, %v2978_v36 }
 0x38c   :  { %3225 = vst [vmem:[#allocation8 + $0x50] sm:$0xff] %v3161_v42  ;;  %v2987_v38 = vmul.f32 0.5, %v2986_v2 }
 0x38d   :  { %v2983_v57 = vsel %vm2982_vm14, %v3751_v33, %v2979_v8 }
 0x38e   :  { %v2988_v10 = vsub.f32 1.5, %v2987_v38  ;;  %v3024_v39 = vmul.f32 %v2983_v57, %v2640_v17 }
 0x390   :  { %v2989_v61 = vmul.f32 %v3753_v21, %v2988_v10 }
 0x391   :  { %v3162_v60 = vpop.f32.mrf.mxu3 }
 0x392   :  { %v3163_v0 = vadd.f32 %v6322_v7, %v3162_v60  ;;  %v2993_v29 = vsel %vm2992_vm11, %v3753_v21, %v2989_v61 }
 0x393   :  { %v3025_v19 = vmul.f32 %v2993_v29, %v2641_v58 }
 0x394   :  { %3226 = vst [vmem:[#allocation8 + $0x58] sm:$0xff] %v3163_v0 }
 0x395   :  { %v3041_v53 = vpack.c.bf16 %v3025_v19, %v3024_v39 }
 0x396   :  { %3553 = vmatmul.msk.bf16.gmra.mxu3 %vm2257_vm13, %v3040_v44 }
 0x399   :  { %v3165_v62 = vpop.f32.mrf.mxu3 }
 0x39a   :  { %v3166_v20 = vadd.f32 %v6322_v7, %v3165_v62 }
 0x39c   :  { %3227 = vst [vmem:[#allocation8 + $0x60] sm:$0xff] %v3166_v20 }
 0x3a1   :  { %v3167_v14 = vpop.f32.mrf.mxu3 }
 0x3a2   :  { %v3168_v35 = vadd.f32 %v6322_v7, %v3167_v14 }
 0x3a4   :  { %3228 = vst [vmem:[#allocation8 + $0x68] sm:$0xff] %v3168_v35 }
 0x3a6   :  { %3554 = vmatmul.msk.bf16.gmra.mxu3 %vm2257_vm13, %v3041_v53 }
 0x3a9   :  { %v3170_v22 = vpop.f32.mrf.mxu3 }
 0x3aa   :  { %v3171_v55 = vadd.f32 %v6322_v7, %v3170_v22 }
 0x3ac   :  { %3229 = vst [vmem:[#allocation8 + $0x70] sm:$0xff] %v3171_v55 }
 0x3b1   :  { %v3172_v49 = vpop.f32.mrf.mxu3 }
 0x3b2   :  { %v3173_v48 = vadd.f32 %v6322_v7, %v3172_v49 }
 0x3b4   :  { %3230 = vst [vmem:[#allocation8 + $0x78] sm:$0xff] %v3173_v48 }
 0x3b9   :  { %v3175_v45 = vpop.f32.mrf.mxu3 }
 0x3ba   :  { %v3176_v30 = vadd.f32 %v6322_v7, %v3175_v45 }
 0x3bc   :  { %3231 = vst [vmem:[#allocation8 + $0x80] sm:$0xff] %v3176_v30 }
 0x3c1   :  { %v3177_v51 = vpop.f32.mrf.mxu3 }
 0x3c2   :  { %v3178_v46 = vadd.f32 %v6322_v7, %v3177_v51 }
 0x3c4   :  { %3232 = vst [vmem:[#allocation8 + $0x88] sm:$0xff] %v3178_v46 }
 0x3c9   :  { %v3180_v16 = vpop.f32.mrf.mxu3 }
 0x3ca   :  { %v3181_v54 = vadd.f32 %v6322_v7, %v3180_v16 }
 0x3cc   :  { %3233 = vst [vmem:[#allocation8 + $0x90] sm:$0xff] %v3181_v54 }
 0x3d1   :  { %v3182_v4 = vpop.f32.mrf.mxu3 }
 0x3d2   :  { %v3183_v50 = vadd.f32 %v6322_v7, %v3182_v4 }
 0x3d4   :  { %3234 = vst [vmem:[#allocation8 + $0x98] sm:$0xff] %v3183_v50 }
 0x3d9   :  { %v3185_v59 = vpop.f32.mrf.mxu3 }
 0x3da   :  { %v3186_v34 = vadd.f32 %v6322_v7, %v3185_v59 }
 0x3dc   :  { %3235 = vst [vmem:[#allocation8 + $0xa0] sm:$0xff] %v3186_v34 }
 0x3e1   :  { %v3187_v56 = vpop.f32.mrf.mxu3 }
 0x3e2   :  { %v3188_v41 = vadd.f32 %v6322_v7, %v3187_v56 }
 0x3e4   :  { %3236 = vst [vmem:[#allocation8 + $0xa8] sm:$0xff] %v3188_v41 }
 0x3e9   :  { %v3190_v13 = vpop.f32.mrf.mxu3 }
 0x3ea   :  { %v3191_v1 = vadd.f32 %v6322_v7, %v3190_v13 }
 0x3ec   :  { %3237 = vst [vmem:[#allocation8 + $0xb0] sm:$0xff] %v3191_v1 }
 0x3f1   :  { %v3192_v27 = vpop.f32.mrf.mxu3 }
 0x3f2   :  { %v3193_v12 = vadd.f32 %v6322_v7, %v3192_v27 }
 0x3f4   :  { %3238 = vst [vmem:[#allocation8 + $0xb8] sm:$0xff] %v3193_v12 }
 0x3f9   :  { %v3195_v52 = vpop.f32.mrf.mxu3 }
 0x3fa   :  { %v3196_v26 = vadd.f32 %v6322_v7, %v3195_v52 }
 0x3fc   :  { %3239 = vst [vmem:[#allocation8 + $0xc0] sm:$0xff] %v3196_v26 }
 0x401   :  { %v3197_v32 = vpop.f32.mrf.mxu3 }
 0x402   :  { %v3198_v25 = vadd.f32 %v6322_v7, %v3197_v32 }
 0x404   :  { %3240 = vst [vmem:[#allocation8 + $0xc8] sm:$0xff] %v3198_v25 }
 0x409   :  { %v3200_v18 = vpop.f32.mrf.mxu3 }
 0x40a   :  { %v3201_v5 = vadd.f32 %v6322_v7, %v3200_v18 }
 0x40c   :  { %3241 = vst [vmem:[#allocation8 + $0xd0] sm:$0xff] %v3201_v5 }
 0x411   :  { %v3202_v15 = vpop.f32.mrf.mxu3 }
 0x412   :  { %v3203_v33 = vadd.f32 %v6322_v7, %v3202_v15 }
 0x414   :  { %3242 = vst [vmem:[#allocation8 + $0xd8] sm:$0xff] %v3203_v33 }
 0x419   :  { %v3205_v24 = vpop.f32.mrf.mxu3 }
 0x41a   :  { %v3206_v9 = vadd.f32 %v6322_v7, %v3205_v24 }
 0x41c   :  { %3243 = vst [vmem:[#allocation8 + $0xe0] sm:$0xff] %v3206_v9 }
 0x421   :  { %v3207_v40 = vpop.f32.mrf.mxu3 }
 0x422   :  { %v3208_v47 = vadd.f32 %v6322_v7, %v3207_v40 }
 0x424   :  { %3244 = vst [vmem:[#allocation8 + $0xe8] sm:$0xff] %v3208_v47 }
 0x429   :  { %v3210_v21 = vpop.f32.mrf.mxu3 }
 0x42a   :  { %v3211_v42 = vadd.f32 %v6322_v7, %v3210_v21 }
 0x42c   :  { %3245 = vst [vmem:[#allocation8 + $0xf0] sm:$0xff] %v3211_v42 }
 0x431   :  { %v3212_v3 = vpop.f32.mrf.mxu3 }
 0x432   :  { %v3213_v37 = vadd.f32 %v6322_v7, %v3212_v3 }
 0x434   :  { %3246 = vst [vmem:[#allocation8 + $0xf8] sm:$0xff] %v3213_v37 }
 0x435   :  { %3259 = dma.vmem_to_hbm [thread:$0]  %s3252_s28, 4096, %s3254_s9, [#allocation4], %s3866_s10, %s3866_s10, %s3867_s11  }
 0x436   :  { %3858 = dma.done.wait [#allocation4], 4096  }
 0x437   :  { %3859 = vsyncadd [#allocation4], 4294963200 }
 0x438   :  { %3264 = vsyncpa [#allocation3], 1 }
 0x439   :  { %3265 = vsyncpa [#allocation6], 1 }
 0x43a   :  { %3266 = vsyncpa [#allocation4], 1 }

</bundles_post_ra>
